<compile_context>
chip_gen: v7x
topology: tpu7x:2x2x1
jax: 0.10.0
libtpu: 0.0.40
codegen_flags: <defaults>
</compile_context>

<pallas_src>
import jax
import jax.numpy as jnp
import numpy as np
from jax import lax
from jax.experimental import pallas as pl
from jax.experimental.pallas import tpu as pltpu

EPS = 1e-9

# ----------------------------- problem sizes ------------------------------
B = 2          # batch
F_BIN = 16     # frequency bins
T_BIN = 8      # time frames
HID = 32       # hidden_channels (power of two -> cheap fwd/bwd lane mask)
NUM_LAYERS = 2
DIM = 4        # embedding dimension
NUM_DIR = 2    # bidirectional (causal=False)

BPAD = 8                   # batch rows padded to one full sublane group
FD = F_BIN * DIM           # 64   FC output features
FD_PAD = 128               # lane-dense padded output width
SLAB_W = 8 * HID           # 256  parameter-slab width (gate-major columns)


def _round8(n):
    return (n + 7) // 8 * 8


def _slab_layout():
    """Row offsets of each parameter section inside the packed slab.

    Every section starts at a multiple of 8 rows so in-kernel static slices
    are sublane-aligned.
    """
    offs, r = {}, 0
    in_size = F_BIN
    for layer in range(NUM_LAYERS):
        offs["wih%d" % layer] = r; r += _round8(in_size)
        offs["whh%d" % layer] = r; r += _round8(NUM_DIR * HID)
        offs["b%d" % layer] = r; r += 8
        in_size = NUM_DIR * HID
    offs["fcw"] = r; r += _round8(NUM_DIR * HID)
    offs["fcb"] = r; r += 8
    offs["gmat"] = r; r += FD_PAD
    return offs, r


_SLAB_OFFS, SLAB_ROWS = _slab_layout()


# ----------------------------- fused Pallas kernel -------------------------
def _embedding_fused_kernel(x_ref, slab_ref, o_ref, yf_scr, yb_scr):
    """Fused 2-layer BiLSTM + FC + sigmoid + grouped L2 norm (one call).

    x_ref    (T*BPAD, F)        time-major input rows, batch padded to BPAD
    slab_ref (SLAB_ROWS, 256)   packed params; per layer the 8H=256 columns
                                are gate-major over both directions:
                                [ i_f i_b | f_f f_b | g_f g_b | o_f o_b ]
                                (whh is block-diagonal: fwd rows feed only
                                 fwd gate columns, bwd rows only bwd cols)
    o_ref    (T*BPAD, 128)      normalized sigmoid(FC); columns >= F*D are
                                dead lanes (sigmoid(0)=0.5 normalized among
                                themselves) that the host slices off.
    yf_scr / yb_scr (T*BPAD, 2H) per-direction layer-output scratch.
    """
    H, H2, G = HID, 2 * HID, 8 * HID
    T, Bp = T_BIN, BPAD
    R = T * Bp

    # Lane masks (hoisted, built once): within each 2H-wide gate group,
    # lanes [0, H) belong to the forward direction (H is a power of two).
    lane_g = lax.broadcasted_iota(jnp.int32, (Bp, G), 1)
    fwd_gate_mask = jnp.bitwise_and(lane_g, H) == 0           # (BPAD, 8H)
    lane_h = lax.broadcasted_iota(jnp.int32, (R, H2), 1)
    fwd_out_mask = lane_h < H                                 # (T*BPAD, 2H)

    def run_layer(x_f32, wih_r, wih_rows, whh_r, b_r):
        # Hoisted input projection: ONE (T*BPAD, In) x (In, 8H) bf16 matmul.
        wih = slab_ref[wih_r:wih_r + wih_rows, :].astype(jnp.bfloat16)
        whh = slab_ref[whh_r:whh_r + H2, :].astype(jnp.bfloat16)
        bias = slab_ref[b_r:b_r + 1, :]                       # (1, 8H) f32
        xw = jnp.dot(x_f32.astype(jnp.bfloat16), wih,
                     preferred_element_type=jnp.float32) + bias   # (R, 8H)

        h = jnp.zeros((Bp, H2), jnp.float32)                  # [h_fwd | h_bwd]
        c = jnp.zeros((Bp, H2), jnp.float32)
        for s in range(T):                                    # fully unrolled
            tf, tb = s, T - 1 - s                             # fwd/bwd time
            # forward direction consumes time tf, backward consumes time tb
            xw_t = jnp.where(fwd_gate_mask,
                             xw[tf * Bp:(tf + 1) * Bp, :],
                             xw[tb * Bp:(tb + 1) * Bp, :])    # (BPAD, 8H)
            if s == 0:                                        # h == c == 0
                gates = xw_t
            else:
                gates = xw_t + jnp.dot(h.astype(jnp.bfloat16), whh,
                                       preferred_element_type=jnp.float32)
            i_g = jax.nn.sigmoid(gates[:, 0 * H2:1 * H2])     # (BPAD, 2H) each
            f_g = jax.nn.sigmoid(gates[:, 1 * H2:2 * H2])
            g_g = jnp.tanh(gates[:, 2 * H2:3 * H2])
            o_g = jax.nn.sigmoid(gates[:, 3 * H2:4 * H2])
            c = i_g * g_g if s == 0 else f_g * c + i_g * g_g
            h = o_g * jnp.tanh(c)
            # Full-width, 8-row aligned stores (no lane masking inside the
            # serial loop); fwd/bwd halves are recombined after the loop.
            yf_scr[tf * Bp:(tf + 1) * Bp, :] = h
            yb_scr[tb * Bp:(tb + 1) * Bp, :] = h
        # y[t] = [ fwd(t) from yf | bwd(t) from yb ]: one full-width select.
        return jnp.where(fwd_out_mask, yf_scr[...], yb_scr[...])  # (R, 2H)

    hidden = x_ref[...]                                       # (R, F)
    in_rows = F_BIN
    for layer in range(NUM_LAYERS):
        hidden = run_layer(hidden,
                           _SLAB_OFFS["wih%d" % layer], in_rows,
                           _SLAB_OFFS["whh%d" % layer],
                           _SLAB_OFFS["b%d" % layer])
        in_rows = H2

    # FC -> sigmoid -> per-frequency L2 normalization over D-wide groups.
    fcw = slab_ref[_SLAB_OFFS["fcw"]:_SLAB_OFFS["fcw"] + H2,
                   0:FD_PAD].astype(jnp.bfloat16)
    fcb = slab_ref[_SLAB_OFFS["fcb"]:_SLAB_OFFS["fcb"] + 1, 0:FD_PAD]
    gmat = slab_ref[_SLAB_OFFS["gmat"]:_SLAB_OFFS["gmat"] + FD_PAD, 0:FD_PAD]
    z = jax.nn.sigmoid(
        jnp.dot(hidden.astype(jnp.bfloat16), fcw,
                preferred_element_type=jnp.float32) + fcb)    # (R, FD_PAD)
    sumsq = jnp.dot(z * z, gmat, preferred_element_type=jnp.float32)
    # Exact divide: matches torch `x / (norm + EPS)`; off the critical path.
    o_ref[...] = z / (jnp.sqrt(sumsq) + EPS)


# ----------------------------- host wrappers -------------------------------
def _full_spec(shape):
    return pl.BlockSpec(shape, lambda i: (0,) * len(shape))


def embedding_fused_pallas(x_flat, slab):
    n_rows = x_flat.shape[0]
    return pl.pallas_call(
        _embedding_fused_kernel,
        out_shape=jax.ShapeDtypeStruct((n_rows, FD_PAD), jnp.float32),
        grid=(1,),
        in_specs=[_full_spec(x_flat.shape), _full_spec(slab.shape)],
        out_specs=_full_spec((n_rows, FD_PAD)),
        scratch_shapes=[pltpu.VMEM((n_rows, NUM_DIR * HID), jnp.float32),
                        pltpu.VMEM((n_rows, NUM_DIR * HID), jnp.float32)],
        compiler_params=pltpu.CompilerParams(
            dimension_semantics=("arbitrary",)),
    )(x_flat, slab)


@jax.jit
def embedding_forward(x, slab):
    """x: (B, 1, F, T) -> (B, D, F, T)."""
    Bb, _, F, T = x.shape
    # (B, 1, F, T) -> (T, B, F), pad batch rows to BPAD, flatten time-major.
    x_tm = jnp.transpose(x[:, 0], (2, 0, 1))                  # (T, B, F)
    x_pad = jnp.pad(x_tm, ((0, 0), (0, BPAD - Bb), (0, 0)))   # (T, BPAD, F)
    x_flat = x_pad.reshape(T * BPAD, F)
    out_pad = embedding_fused_pallas(x_flat, slab)            # (T*BPAD, 128)
    out = out_pad.reshape(T, BPAD, FD_PAD)[:, :Bb, :F * DIM]
    out = out.reshape(T, Bb, F, DIM)
    return jnp.transpose(out, (1, 3, 2, 0))                   # (B, D, F, T)


# ----------------------------- parameter packing ---------------------------
def pack_params(lstm_params, fc_w, fc_b):
    """Repack natural-layout params into ONE fused-kernel slab (f32)."""
    slab = np.zeros((SLAB_ROWS, SLAB_W), np.float32)
    for l, layer in enumerate(lstm_params):
        (wi_f, wh_f, b_f), (wi_b, wh_b, b_b) = layer
        In = wi_f.shape[0]
        H = wh_f.shape[0]
        wih = np.zeros((In, 8 * H), np.float32)
        whh = np.zeros((2 * H, 8 * H), np.float32)   # block-diag in hidden dim
        bias = np.zeros((1, 8 * H), np.float32)
        for k in range(4):                           # gate order i, f, g, o
            c0 = 2 * H * k
            wih[:, c0:c0 + H] = np.asarray(wi_f[:, k * H:(k + 1) * H])
            wih[:, c0 + H:c0 + 2 * H] = np.asarray(wi_b[:, k * H:(k + 1) * H])
            whh[0:H, c0:c0 + H] = np.asarray(wh_f[:, k * H:(k + 1) * H])
            whh[H:2 * H, c0 + H:c0 + 2 * H] = np.asarray(wh_b[:, k * H:(k + 1) * H])
            bias[0, c0:c0 + H] = np.asarray(b_f[0, k * H:(k + 1) * H])
            bias[0, c0 + H:c0 + 2 * H] = np.asarray(b_b[0, k * H:(k + 1) * H])
        r = _SLAB_OFFS["wih%d" % l]; slab[r:r + In, :] = wih
        r = _SLAB_OFFS["whh%d" % l]; slab[r:r + 2 * H, :] = whh
        r = _SLAB_OFFS["b%d" % l];   slab[r:r + 1, :] = bias
    r = _SLAB_OFFS["fcw"]; slab[r:r + NUM_DIR * HID, :FD] = np.asarray(fc_w)
    r = _SLAB_OFFS["fcb"]; slab[r, :FD] = np.asarray(fc_b[0])
    # block-diagonal ones: sums z^2 within each D-wide group, broadcasts back
    gmat = np.kron(np.eye(FD_PAD // DIM, dtype=np.float32),
                   np.ones((DIM, DIM), np.float32))
    r = _SLAB_OFFS["gmat"]; slab[r:r + FD_PAD, :FD_PAD] = gmat
    return jnp.asarray(slab)


def init_params(key):
    lstm_params = []
    in_size = F_BIN
    for _ in range(NUM_LAYERS):
        layer = []
        for _ in range(NUM_DIR):
            key, k1, k2, k3 = jax.random.split(key, 4)
            w_ih = 0.1 * jax.random.normal(k1, (in_size, 4 * HID), jnp.float32)
            w_hh = 0.1 * jax.random.normal(k2, (HID, 4 * HID), jnp.float32)
            b = 0.05 * jax.random.normal(k3, (1, 4 * HID), jnp.float32)
            layer.append((w_ih, w_hh, b))
        lstm_params.append(tuple(layer))
        in_size = NUM_DIR * HID
    key, k1, k2 = jax.random.split(key, 3)
    fc_w = 0.1 * jax.random.normal(k1, (NUM_DIR * HID, FD), jnp.float32)
    fc_b = 0.05 * jax.random.normal(k2, (1, FD), jnp.float32)
    return tuple(lstm_params), fc_w, fc_b


# ----------------------------- pure-JAX reference --------------------------
def _lstm_ref_layer(x_tm, w_ih, w_hh, b):
    H = w_hh.shape[0]

    def cell(carry, x_t):
        h, c = carry
        gates = x_t @ w_ih + h @ w_hh + b[0]
        i_g = jax.nn.sigmoid(gates[:, 0 * H:1 * H])
        f_g = jax.nn.sigmoid(gates[:, 1 * H:2 * H])
        g_g = jnp.tanh(gates[:, 2 * H:3 * H])
        o_g = jax.nn.sigmoid(gates[:, 3 * H:4 * H])
        c_new = f_g * c + i_g * g_g
        h_new = o_g * jnp.tanh(c_new)
        return (h_new, c_new), h_new

    Bb = x_tm.shape[1]
    init = (jnp.zeros((Bb, H), jnp.float32), jnp.zeros((Bb, H), jnp.float32))
    _, ys = lax.scan(cell, init, x_tm)
    return ys


def embedding_forward_ref(x, lstm_params, fc_w, fc_b):
    Bb, _, F, T = x.shape
    h = jnp.transpose(x[:, 0], (2, 0, 1))                     # (T, B, F)
    for layer in lstm_params:
        outs = []
        for d, (w_ih, w_hh, b) in enumerate(layer):
            xin = h if d == 0 else h[::-1]
            y = _lstm_ref_layer(xin, w_ih, w_hh, b)
            if d == 1:
                y = y[::-1]
            outs.append(y)
        h = jnp.concatenate(outs, axis=-1)                    # (T, B, 2H)
    z = jax.nn.sigmoid(h @ fc_w + fc_b[0])                    # (T, B, F*D)
    z = z.reshape(T, Bb, F, DIM)
    z = jnp.transpose(z, (1, 3, 2, 0))                        # (B, D, F, T)
    norm = jnp.sqrt(jnp.sum(z * z, axis=1, keepdims=True))
    return z / (norm + EPS)


# --------------------------------- main -------------------------------------
if __name__ == "__main__":
    key = jax.random.PRNGKey(0)
    key, kx = jax.random.split(key)
    x = jax.random.normal(kx, (B, 1, F_BIN, T_BIN), jnp.float32)

    lstm_params, fc_w, fc_b = init_params(key)
    slab = pack_params(lstm_params, fc_w, fc_b)

    out = jax.block_until_ready(embedding_forward(x, slab))

    # shape check: (B, D, F, T)
    assert out.shape == (B, DIM, F_BIN, T_BIN), out.shape

    # sanity: L2 norm over the embedding axis is ~1 (sigmoid outputs > 0).
    norms = jnp.sqrt(jnp.sum(out * out, axis=1))
    np.testing.assert_allclose(np.asarray(norms), 1.0, atol=1e-3)

    # compare against pure-JAX f32 reference (kernel uses bf16 MXU operands
    # with f32 accumulation -> small differences through the recurrence).
    ref = jax.block_until_ready(embedding_forward_ref(x, lstm_params, fc_w, fc_b))
    np.testing.assert_allclose(np.asarray(out), np.asarray(ref),
                               atol=2e-2, rtol=2e-2)

    print("KERNEL_OK")
</pallas_src>

<mosaic_0001>
module attributes {stable_mosaic.version = 11 : i64} {
  func.func @_embedding_fused_kernel(%arg0: i32, %arg1: memref<64x16xf32, #tpu.memory_space<vmem>>, %arg2: memref<424x256xf32, #tpu.memory_space<vmem>>, %arg3: memref<64x128xf32, #tpu.memory_space<vmem>>, %arg4: memref<64x64xf32, #tpu.memory_space<vmem>>, %arg5: memref<64x64xf32, #tpu.memory_space<vmem>>) attributes {dimension_semantics = [#tpu.dimension_semantics<arbitrary>], iteration_bounds = array<i64: 1>, scalar_prefetch = 0 : i64, scratch_operands = 2 : i64, tpu.core_type = #tpu.core_type<tc>, window_params = [{pipeline_mode = #tpu.pipeline_mode<synchronous>, transform_indices = @transform_0, window_bounds = array<i64: 64, 16>}, {pipeline_mode = #tpu.pipeline_mode<synchronous>, transform_indices = @transform_1, window_bounds = array<i64: 424, 256>}, {pipeline_mode = #tpu.pipeline_mode<synchronous>, transform_indices = @transform_2, window_bounds = array<i64: 64, 128>}]} {
    %0 = tpu.iota {dimensions = array<i32: 1>} : vector<8x256xi32>
    %c32_i32 = arith.constant 32 : i32
    %1 = vector.broadcast %c32_i32 : i32 to vector<8x256xi32>
    %2 = arith.andi %0, %1 : vector<8x256xi32>
    %c0_i32 = arith.constant 0 : i32
    %3 = vector.broadcast %c0_i32 : i32 to vector<8x256xi32>
    %4 = arith.cmpi eq, %2, %3 : vector<8x256xi32>
    %5 = tpu.iota {dimensions = array<i32: 1>} : vector<64x64xi32>
    %c32_i32_0 = arith.constant 32 : i32
    %6 = vector.broadcast %c32_i32_0 : i32 to vector<64x64xi32>
    %7 = arith.cmpi slt, %5, %6 : vector<64x64xi32>
    %c0 = arith.constant 0 : index
    %c0_1 = arith.constant 0 : index
    %8 = vector.load %arg1[%c0, %c0_1] : memref<64x16xf32, #tpu.memory_space<vmem>>, vector<64x16xf32>
    %c0_2 = arith.constant 0 : index
    %c0_3 = arith.constant 0 : index
    %9 = vector.load %arg2[%c0_2, %c0_3] : memref<424x256xf32, #tpu.memory_space<vmem>>, vector<16x256xf32>
    %10 = arith.truncf %9 : vector<16x256xf32> to vector<16x256xbf16>
    %c16 = arith.constant 16 : index
    %c0_4 = arith.constant 0 : index
    %11 = vector.load %arg2[%c16, %c0_4] : memref<424x256xf32, #tpu.memory_space<vmem>>, vector<64x256xf32>
    %12 = arith.truncf %11 : vector<64x256xf32> to vector<64x256xbf16>
    %c80 = arith.constant 80 : index
    %c0_5 = arith.constant 0 : index
    %13 = vector.load %arg2[%c80, %c0_5] : memref<424x256xf32, #tpu.memory_space<vmem>>, vector<1x256xf32>
    %14 = arith.truncf %8 : vector<64x16xf32> to vector<64x16xbf16>
    %cst = arith.constant dense<0.000000e+00> : vector<64x256xf32>
    %15 = tpu.matmul %14, %10, %cst {dimension_numbers = #tpu.dot_dimension_numbers<[1], [0], [0], [1], [0, 0, 1, 1], [], []>} : vector<64x16xbf16>, vector<16x256xbf16>, vector<64x256xf32> -> vector<64x256xf32>
    %16 = vector.broadcast %13 : vector<1x256xf32> to vector<64x256xf32>
    %17 = arith.addf %15, %16 : vector<64x256xf32>
    %18 = vector.extract_strided_slice %17 {offsets = [0, 0], sizes = [8, 256], strides = [1, 1]} : vector<64x256xf32> to vector<8x256xf32>
    %19 = vector.extract_strided_slice %17 {offsets = [56, 0], sizes = [8, 256], strides = [1, 1]} : vector<64x256xf32> to vector<8x256xf32>
    %20 = arith.select %4, %18, %19 : vector<8x256xi1>, vector<8x256xf32>
    %21 = vector.extract_strided_slice %20 {offsets = [0, 0], sizes = [8, 64], strides = [1, 1]} : vector<8x256xf32> to vector<8x64xf32>
    %22 = arith.negf %21 : vector<8x64xf32>
    %23 = math.exp %22 : vector<8x64xf32>
    %cst_6 = arith.constant 1.000000e+00 : f32
    %24 = vector.broadcast %cst_6 : f32 to vector<8x64xf32>
    %25 = arith.addf %24, %23 : vector<8x64xf32>
    %26 = arith.divf %24, %25 : vector<8x64xf32>
    %27 = vector.extract_strided_slice %20 {offsets = [0, 128], sizes = [8, 64], strides = [1, 1]} : vector<8x256xf32> to vector<8x64xf32>
    %28 = math.tanh %27 : vector<8x64xf32>
    %29 = vector.extract_strided_slice %20 {offsets = [0, 192], sizes = [8, 64], strides = [1, 1]} : vector<8x256xf32> to vector<8x64xf32>
    %30 = arith.negf %29 : vector<8x64xf32>
    %31 = math.exp %30 : vector<8x64xf32>
    %cst_7 = arith.constant 1.000000e+00 : f32
    %32 = vector.broadcast %cst_7 : f32 to vector<8x64xf32>
    %33 = arith.addf %32, %31 : vector<8x64xf32>
    %34 = arith.divf %32, %33 : vector<8x64xf32>
    %35 = arith.mulf %26, %28 : vector<8x64xf32>
    %36 = math.tanh %35 : vector<8x64xf32>
    %37 = arith.mulf %34, %36 : vector<8x64xf32>
    %c0_8 = arith.constant 0 : index
    %c0_9 = arith.constant 0 : index
    %38 = vector.load %arg4[%c0_8, %c0_9] : memref<64x64xf32, #tpu.memory_space<vmem>>, vector<8x64xf32>
    tpu.vector_store %arg4[%c0_8, %c0_9], %37 {strides = array<i32>} : memref<64x64xf32, #tpu.memory_space<vmem>>, vector<8x64xf32>,
    %c56 = arith.constant 56 : index
    %c0_10 = arith.constant 0 : index
    %39 = vector.load %arg5[%c56, %c0_10] : memref<64x64xf32, #tpu.memory_space<vmem>>, vector<8x64xf32>
    tpu.vector_store %arg5[%c56, %c0_10], %37 {strides = array<i32>} : memref<64x64xf32, #tpu.memory_space<vmem>>, vector<8x64xf32>,
    %40 = vector.extract_strided_slice %17 {offsets = [8, 0], sizes = [8, 256], strides = [1, 1]} : vector<64x256xf32> to vector<8x256xf32>
    %41 = vector.extract_strided_slice %17 {offsets = [48, 0], sizes = [8, 256], strides = [1, 1]} : vector<64x256xf32> to vector<8x256xf32>
    %42 = arith.select %4, %40, %41 : vector<8x256xi1>, vector<8x256xf32>
    %43 = arith.truncf %37 : vector<8x64xf32> to vector<8x64xbf16>
    %cst_11 = arith.constant dense<0.000000e+00> : vector<8x256xf32>
    %44 = tpu.matmul %43, %12, %cst_11 {dimension_numbers = #tpu.dot_dimension_numbers<[1], [0], [0], [1], [0, 0, 1, 1], [], []>} : vector<8x64xbf16>, vector<64x256xbf16>, vector<8x256xf32> -> vector<8x256xf32>
    %45 = arith.addf %42, %44 : vector<8x256xf32>
    %46 = vector.extract_strided_slice %45 {offsets = [0, 0], sizes = [8, 64], strides = [1, 1]} : vector<8x256xf32> to vector<8x64xf32>
    %47 = arith.negf %46 : vector<8x64xf32>
    %48 = math.exp %47 : vector<8x64xf32>
    %cst_12 = arith.constant 1.000000e+00 : f32
    %49 = vector.broadcast %cst_12 : f32 to vector<8x64xf32>
    %50 = arith.addf %49, %48 : vector<8x64xf32>
    %51 = arith.divf %49, %50 : vector<8x64xf32>
    %52 = vector.extract_strided_slice %45 {offsets = [0, 64], sizes = [8, 64], strides = [1, 1]} : vector<8x256xf32> to vector<8x64xf32>
    %53 = arith.negf %52 : vector<8x64xf32>
    %54 = math.exp %53 : vector<8x64xf32>
    %cst_13 = arith.constant 1.000000e+00 : f32
    %55 = vector.broadcast %cst_13 : f32 to vector<8x64xf32>
    %56 = arith.addf %55, %54 : vector<8x64xf32>
    %57 = arith.divf %55, %56 : vector<8x64xf32>
    %58 = vector.extract_strided_slice %45 {offsets = [0, 128], sizes = [8, 64], strides = [1, 1]} : vector<8x256xf32> to vector<8x64xf32>
    %59 = math.tanh %58 : vector<8x64xf32>
    %60 = vector.extract_strided_slice %45 {offsets = [0, 192], sizes = [8, 64], strides = [1, 1]} : vector<8x256xf32> to vector<8x64xf32>
    %61 = arith.negf %60 : vector<8x64xf32>
    %62 = math.exp %61 : vector<8x64xf32>
    %cst_14 = arith.constant 1.000000e+00 : f32
    %63 = vector.broadcast %cst_14 : f32 to vector<8x64xf32>
    %64 = arith.addf %63, %62 : vector<8x64xf32>
    %65 = arith.divf %63, %64 : vector<8x64xf32>
    %66 = arith.mulf %57, %35 : vector<8x64xf32>
    %67 = arith.mulf %51, %59 : vector<8x64xf32>
    %68 = arith.addf %66, %67 : vector<8x64xf32>
    %69 = math.tanh %68 : vector<8x64xf32>
    %70 = arith.mulf %65, %69 : vector<8x64xf32>
    %c8 = arith.constant 8 : index
    %c0_15 = arith.constant 0 : index
    %71 = vector.load %arg4[%c8, %c0_15] : memref<64x64xf32, #tpu.memory_space<vmem>>, vector<8x64xf32>
    tpu.vector_store %arg4[%c8, %c0_15], %70 {strides = array<i32>} : memref<64x64xf32, #tpu.memory_space<vmem>>, vector<8x64xf32>,
    %c48 = arith.constant 48 : index
    %c0_16 = arith.constant 0 : index
    %72 = vector.load %arg5[%c48, %c0_16] : memref<64x64xf32, #tpu.memory_space<vmem>>, vector<8x64xf32>
    tpu.vector_store %arg5[%c48, %c0_16], %70 {strides = array<i32>} : memref<64x64xf32, #tpu.memory_space<vmem>>, vector<8x64xf32>,
    %73 = vector.extract_strided_slice %17 {offsets = [16, 0], sizes = [8, 256], strides = [1, 1]} : vector<64x256xf32> to vector<8x256xf32>
    %74 = vector.extract_strided_slice %17 {offsets = [40, 0], sizes = [8, 256], strides = [1, 1]} : vector<64x256xf32> to vector<8x256xf32>
    %75 = arith.select %4, %73, %74 : vector<8x256xi1>, vector<8x256xf32>
    %76 = arith.truncf %70 : vector<8x64xf32> to vector<8x64xbf16>
    %cst_17 = arith.constant dense<0.000000e+00> : vector<8x256xf32>
    %77 = tpu.matmul %76, %12, %cst_17 {dimension_numbers = #tpu.dot_dimension_numbers<[1], [0], [0], [1], [0, 0, 1, 1], [], []>} : vector<8x64xbf16>, vector<64x256xbf16>, vector<8x256xf32> -> vector<8x256xf32>
    %78 = arith.addf %75, %77 : vector<8x256xf32>
    %79 = vector.extract_strided_slice %78 {offsets = [0, 0], sizes = [8, 64], strides = [1, 1]} : vector<8x256xf32> to vector<8x64xf32>
    %80 = arith.negf %79 : vector<8x64xf32>
    %81 = math.exp %80 : vector<8x64xf32>
    %cst_18 = arith.constant 1.000000e+00 : f32
    %82 = vector.broadcast %cst_18 : f32 to vector<8x64xf32>
    %83 = arith.addf %82, %81 : vector<8x64xf32>
    %84 = arith.divf %82, %83 : vector<8x64xf32>
    %85 = vector.extract_strided_slice %78 {offsets = [0, 64], sizes = [8, 64], strides = [1, 1]} : vector<8x256xf32> to vector<8x64xf32>
    %86 = arith.negf %85 : vector<8x64xf32>
    %87 = math.exp %86 : vector<8x64xf32>
    %cst_19 = arith.constant 1.000000e+00 : f32
    %88 = vector.broadcast %cst_19 : f32 to vector<8x64xf32>
    %89 = arith.addf %88, %87 : vector<8x64xf32>
    %90 = arith.divf %88, %89 : vector<8x64xf32>
    %91 = vector.extract_strided_slice %78 {offsets = [0, 128], sizes = [8, 64], strides = [1, 1]} : vector<8x256xf32> to vector<8x64xf32>
    %92 = math.tanh %91 : vector<8x64xf32>
    %93 = vector.extract_strided_slice %78 {offsets = [0, 192], sizes = [8, 64], strides = [1, 1]} : vector<8x256xf32> to vector<8x64xf32>
    %94 = arith.negf %93 : vector<8x64xf32>
    %95 = math.exp %94 : vector<8x64xf32>
    %cst_20 = arith.constant 1.000000e+00 : f32
    %96 = vector.broadcast %cst_20 : f32 to vector<8x64xf32>
    %97 = arith.addf %96, %95 : vector<8x64xf32>
    %98 = arith.divf %96, %97 : vector<8x64xf32>
    %99 = arith.mulf %90, %68 : vector<8x64xf32>
    %100 = arith.mulf %84, %92 : vector<8x64xf32>
    %101 = arith.addf %99, %100 : vector<8x64xf32>
    %102 = math.tanh %101 : vector<8x64xf32>
    %103 = arith.mulf %98, %102 : vector<8x64xf32>
    %c16_21 = arith.constant 16 : index
    %c0_22 = arith.constant 0 : index
    %104 = vector.load %arg4[%c16_21, %c0_22] : memref<64x64xf32, #tpu.memory_space<vmem>>, vector<8x64xf32>
    tpu.vector_store %arg4[%c16_21, %c0_22], %103 {strides = array<i32>} : memref<64x64xf32, #tpu.memory_space<vmem>>, vector<8x64xf32>,
    %c40 = arith.constant 40 : index
    %c0_23 = arith.constant 0 : index
    %105 = vector.load %arg5[%c40, %c0_23] : memref<64x64xf32, #tpu.memory_space<vmem>>, vector<8x64xf32>
    tpu.vector_store %arg5[%c40, %c0_23], %103 {strides = array<i32>} : memref<64x64xf32, #tpu.memory_space<vmem>>, vector<8x64xf32>,
    %106 = vector.extract_strided_slice %17 {offsets = [24, 0], sizes = [8, 256], strides = [1, 1]} : vector<64x256xf32> to vector<8x256xf32>
    %107 = vector.extract_strided_slice %17 {offsets = [32, 0], sizes = [8, 256], strides = [1, 1]} : vector<64x256xf32> to vector<8x256xf32>
    %108 = arith.select %4, %106, %107 : vector<8x256xi1>, vector<8x256xf32>
    %109 = arith.truncf %103 : vector<8x64xf32> to vector<8x64xbf16>
    %cst_24 = arith.constant dense<0.000000e+00> : vector<8x256xf32>
    %110 = tpu.matmul %109, %12, %cst_24 {dimension_numbers = #tpu.dot_dimension_numbers<[1], [0], [0], [1], [0, 0, 1, 1], [], []>} : vector<8x64xbf16>, vector<64x256xbf16>, vector<8x256xf32> -> vector<8x256xf32>
    %111 = arith.addf %108, %110 : vector<8x256xf32>
    %112 = vector.extract_strided_slice %111 {offsets = [0, 0], sizes = [8, 64], strides = [1, 1]} : vector<8x256xf32> to vector<8x64xf32>
    %113 = arith.negf %112 : vector<8x64xf32>
    %114 = math.exp %113 : vector<8x64xf32>
    %cst_25 = arith.constant 1.000000e+00 : f32
    %115 = vector.broadcast %cst_25 : f32 to vector<8x64xf32>
    %116 = arith.addf %115, %114 : vector<8x64xf32>
    %117 = arith.divf %115, %116 : vector<8x64xf32>
    %118 = vector.extract_strided_slice %111 {offsets = [0, 64], sizes = [8, 64], strides = [1, 1]} : vector<8x256xf32> to vector<8x64xf32>
    %119 = arith.negf %118 : vector<8x64xf32>
    %120 = math.exp %119 : vector<8x64xf32>
    %cst_26 = arith.constant 1.000000e+00 : f32
    %121 = vector.broadcast %cst_26 : f32 to vector<8x64xf32>
    %122 = arith.addf %121, %120 : vector<8x64xf32>
    %123 = arith.divf %121, %122 : vector<8x64xf32>
    %124 = vector.extract_strided_slice %111 {offsets = [0, 128], sizes = [8, 64], strides = [1, 1]} : vector<8x256xf32> to vector<8x64xf32>
    %125 = math.tanh %124 : vector<8x64xf32>
    %126 = vector.extract_strided_slice %111 {offsets = [0, 192], sizes = [8, 64], strides = [1, 1]} : vector<8x256xf32> to vector<8x64xf32>
    %127 = arith.negf %126 : vector<8x64xf32>
    %128 = math.exp %127 : vector<8x64xf32>
    %cst_27 = arith.constant 1.000000e+00 : f32
    %129 = vector.broadcast %cst_27 : f32 to vector<8x64xf32>
    %130 = arith.addf %129, %128 : vector<8x64xf32>
    %131 = arith.divf %129, %130 : vector<8x64xf32>
    %132 = arith.mulf %123, %101 : vector<8x64xf32>
    %133 = arith.mulf %117, %125 : vector<8x64xf32>
    %134 = arith.addf %132, %133 : vector<8x64xf32>
    %135 = math.tanh %134 : vector<8x64xf32>
    %136 = arith.mulf %131, %135 : vector<8x64xf32>
    %c24 = arith.constant 24 : index
    %c0_28 = arith.constant 0 : index
    %137 = vector.load %arg4[%c24, %c0_28] : memref<64x64xf32, #tpu.memory_space<vmem>>, vector<8x64xf32>
    tpu.vector_store %arg4[%c24, %c0_28], %136 {strides = array<i32>} : memref<64x64xf32, #tpu.memory_space<vmem>>, vector<8x64xf32>,
    %c32 = arith.constant 32 : index
    %c0_29 = arith.constant 0 : index
    %138 = vector.load %arg5[%c32, %c0_29] : memref<64x64xf32, #tpu.memory_space<vmem>>, vector<8x64xf32>
    tpu.vector_store %arg5[%c32, %c0_29], %136 {strides = array<i32>} : memref<64x64xf32, #tpu.memory_space<vmem>>, vector<8x64xf32>,
    %139 = vector.extract_strided_slice %17 {offsets = [32, 0], sizes = [8, 256], strides = [1, 1]} : vector<64x256xf32> to vector<8x256xf32>
    %140 = vector.extract_strided_slice %17 {offsets = [24, 0], sizes = [8, 256], strides = [1, 1]} : vector<64x256xf32> to vector<8x256xf32>
    %141 = arith.select %4, %139, %140 : vector<8x256xi1>, vector<8x256xf32>
    %142 = arith.truncf %136 : vector<8x64xf32> to vector<8x64xbf16>
    %cst_30 = arith.constant dense<0.000000e+00> : vector<8x256xf32>
    %143 = tpu.matmul %142, %12, %cst_30 {dimension_numbers = #tpu.dot_dimension_numbers<[1], [0], [0], [1], [0, 0, 1, 1], [], []>} : vector<8x64xbf16>, vector<64x256xbf16>, vector<8x256xf32> -> vector<8x256xf32>
    %144 = arith.addf %141, %143 : vector<8x256xf32>
    %145 = vector.extract_strided_slice %144 {offsets = [0, 0], sizes = [8, 64], strides = [1, 1]} : vector<8x256xf32> to vector<8x64xf32>
    %146 = arith.negf %145 : vector<8x64xf32>
    %147 = math.exp %146 : vector<8x64xf32>
    %cst_31 = arith.constant 1.000000e+00 : f32
    %148 = vector.broadcast %cst_31 : f32 to vector<8x64xf32>
    %149 = arith.addf %148, %147 : vector<8x64xf32>
    %150 = arith.divf %148, %149 : vector<8x64xf32>
    %151 = vector.extract_strided_slice %144 {offsets = [0, 64], sizes = [8, 64], strides = [1, 1]} : vector<8x256xf32> to vector<8x64xf32>
    %152 = arith.negf %151 : vector<8x64xf32>
    %153 = math.exp %152 : vector<8x64xf32>
    %cst_32 = arith.constant 1.000000e+00 : f32
    %154 = vector.broadcast %cst_32 : f32 to vector<8x64xf32>
    %155 = arith.addf %154, %153 : vector<8x64xf32>
    %156 = arith.divf %154, %155 : vector<8x64xf32>
    %157 = vector.extract_strided_slice %144 {offsets = [0, 128], sizes = [8, 64], strides = [1, 1]} : vector<8x256xf32> to vector<8x64xf32>
    %158 = math.tanh %157 : vector<8x64xf32>
    %159 = vector.extract_strided_slice %144 {offsets = [0, 192], sizes = [8, 64], strides = [1, 1]} : vector<8x256xf32> to vector<8x64xf32>
    %160 = arith.negf %159 : vector<8x64xf32>
    %161 = math.exp %160 : vector<8x64xf32>
    %cst_33 = arith.constant 1.000000e+00 : f32
    %162 = vector.broadcast %cst_33 : f32 to vector<8x64xf32>
    %163 = arith.addf %162, %161 : vector<8x64xf32>
    %164 = arith.divf %162, %163 : vector<8x64xf32>
    %165 = arith.mulf %156, %134 : vector<8x64xf32>
    %166 = arith.mulf %150, %158 : vector<8x64xf32>
    %167 = arith.addf %165, %166 : vector<8x64xf32>
    %168 = math.tanh %167 : vector<8x64xf32>
    %169 = arith.mulf %164, %168 : vector<8x64xf32>
    %c32_34 = arith.constant 32 : index
    %c0_35 = arith.constant 0 : index
    %170 = vector.load %arg4[%c32_34, %c0_35] : memref<64x64xf32, #tpu.memory_space<vmem>>, vector<8x64xf32>
    tpu.vector_store %arg4[%c32_34, %c0_35], %169 {strides = array<i32>} : memref<64x64xf32, #tpu.memory_space<vmem>>, vector<8x64xf32>,
    %c24_36 = arith.constant 24 : index
    %c0_37 = arith.constant 0 : index
    %171 = vector.load %arg5[%c24_36, %c0_37] : memref<64x64xf32, #tpu.memory_space<vmem>>, vector<8x64xf32>
    tpu.vector_store %arg5[%c24_36, %c0_37], %169 {strides = array<i32>} : memref<64x64xf32, #tpu.memory_space<vmem>>, vector<8x64xf32>,
    %172 = vector.extract_strided_slice %17 {offsets = [40, 0], sizes = [8, 256], strides = [1, 1]} : vector<64x256xf32> to vector<8x256xf32>
    %173 = vector.extract_strided_slice %17 {offsets = [16, 0], sizes = [8, 256], strides = [1, 1]} : vector<64x256xf32> to vector<8x256xf32>
    %174 = arith.select %4, %172, %173 : vector<8x256xi1>, vector<8x256xf32>
    %175 = arith.truncf %169 : vector<8x64xf32> to vector<8x64xbf16>
    %cst_38 = arith.constant dense<0.000000e+00> : vector<8x256xf32>
    %176 = tpu.matmul %175, %12, %cst_38 {dimension_numbers = #tpu.dot_dimension_numbers<[1], [0], [0], [1], [0, 0, 1, 1], [], []>} : vector<8x64xbf16>, vector<64x256xbf16>, vector<8x256xf32> -> vector<8x256xf32>
    %177 = arith.addf %174, %176 : vector<8x256xf32>
    %178 = vector.extract_strided_slice %177 {offsets = [0, 0], sizes = [8, 64], strides = [1, 1]} : vector<8x256xf32> to vector<8x64xf32>
    %179 = arith.negf %178 : vector<8x64xf32>
    %180 = math.exp %179 : vector<8x64xf32>
    %cst_39 = arith.constant 1.000000e+00 : f32
    %181 = vector.broadcast %cst_39 : f32 to vector<8x64xf32>
    %182 = arith.addf %181, %180 : vector<8x64xf32>
    %183 = arith.divf %181, %182 : vector<8x64xf32>
    %184 = vector.extract_strided_slice %177 {offsets = [0, 64], sizes = [8, 64], strides = [1, 1]} : vector<8x256xf32> to vector<8x64xf32>
    %185 = arith.negf %184 : vector<8x64xf32>
    %186 = math.exp %185 : vector<8x64xf32>
    %cst_40 = arith.constant 1.000000e+00 : f32
    %187 = vector.broadcast %cst_40 : f32 to vector<8x64xf32>
    %188 = arith.addf %187, %186 : vector<8x64xf32>
    %189 = arith.divf %187, %188 : vector<8x64xf32>
    %190 = vector.extract_strided_slice %177 {offsets = [0, 128], sizes = [8, 64], strides = [1, 1]} : vector<8x256xf32> to vector<8x64xf32>
    %191 = math.tanh %190 : vector<8x64xf32>
    %192 = vector.extract_strided_slice %177 {offsets = [0, 192], sizes = [8, 64], strides = [1, 1]} : vector<8x256xf32> to vector<8x64xf32>
    %193 = arith.negf %192 : vector<8x64xf32>
    %194 = math.exp %193 : vector<8x64xf32>
    %cst_41 = arith.constant 1.000000e+00 : f32
    %195 = vector.broadcast %cst_41 : f32 to vector<8x64xf32>
    %196 = arith.addf %195, %194 : vector<8x64xf32>
    %197 = arith.divf %195, %196 : vector<8x64xf32>
    %198 = arith.mulf %189, %167 : vector<8x64xf32>
    %199 = arith.mulf %183, %191 : vector<8x64xf32>
    %200 = arith.addf %198, %199 : vector<8x64xf32>
    %201 = math.tanh %200 : vector<8x64xf32>
    %202 = arith.mulf %197, %201 : vector<8x64xf32>
    %c40_42 = arith.constant 40 : index
    %c0_43 = arith.constant 0 : index
    %203 = vector.load %arg4[%c40_42, %c0_43] : memref<64x64xf32, #tpu.memory_space<vmem>>, vector<8x64xf32>
    tpu.vector_store %arg4[%c40_42, %c0_43], %202 {strides = array<i32>} : memref<64x64xf32, #tpu.memory_space<vmem>>, vector<8x64xf32>,
    %c16_44 = arith.constant 16 : index
    %c0_45 = arith.constant 0 : index
    %204 = vector.load %arg5[%c16_44, %c0_45] : memref<64x64xf32, #tpu.memory_space<vmem>>, vector<8x64xf32>
    tpu.vector_store %arg5[%c16_44, %c0_45], %202 {strides = array<i32>} : memref<64x64xf32, #tpu.memory_space<vmem>>, vector<8x64xf32>,
    %205 = vector.extract_strided_slice %17 {offsets = [48, 0], sizes = [8, 256], strides = [1, 1]} : vector<64x256xf32> to vector<8x256xf32>
    %206 = vector.extract_strided_slice %17 {offsets = [8, 0], sizes = [8, 256], strides = [1, 1]} : vector<64x256xf32> to vector<8x256xf32>
    %207 = arith.select %4, %205, %206 : vector<8x256xi1>, vector<8x256xf32>
    %208 = arith.truncf %202 : vector<8x64xf32> to vector<8x64xbf16>
    %cst_46 = arith.constant dense<0.000000e+00> : vector<8x256xf32>
    %209 = tpu.matmul %208, %12, %cst_46 {dimension_numbers = #tpu.dot_dimension_numbers<[1], [0], [0], [1], [0, 0, 1, 1], [], []>} : vector<8x64xbf16>, vector<64x256xbf16>, vector<8x256xf32> -> vector<8x256xf32>
    %210 = arith.addf %207, %209 : vector<8x256xf32>
    %211 = vector.extract_strided_slice %210 {offsets = [0, 0], sizes = [8, 64], strides = [1, 1]} : vector<8x256xf32> to vector<8x64xf32>
    %212 = arith.negf %211 : vector<8x64xf32>
    %213 = math.exp %212 : vector<8x64xf32>
    %cst_47 = arith.constant 1.000000e+00 : f32
    %214 = vector.broadcast %cst_47 : f32 to vector<8x64xf32>
    %215 = arith.addf %214, %213 : vector<8x64xf32>
    %216 = arith.divf %214, %215 : vector<8x64xf32>
    %217 = vector.extract_strided_slice %210 {offsets = [0, 64], sizes = [8, 64], strides = [1, 1]} : vector<8x256xf32> to vector<8x64xf32>
    %218 = arith.negf %217 : vector<8x64xf32>
    %219 = math.exp %218 : vector<8x64xf32>
    %cst_48 = arith.constant 1.000000e+00 : f32
    %220 = vector.broadcast %cst_48 : f32 to vector<8x64xf32>
    %221 = arith.addf %220, %219 : vector<8x64xf32>
    %222 = arith.divf %220, %221 : vector<8x64xf32>
    %223 = vector.extract_strided_slice %210 {offsets = [0, 128], sizes = [8, 64], strides = [1, 1]} : vector<8x256xf32> to vector<8x64xf32>
    %224 = math.tanh %223 : vector<8x64xf32>
    %225 = vector.extract_strided_slice %210 {offsets = [0, 192], sizes = [8, 64], strides = [1, 1]} : vector<8x256xf32> to vector<8x64xf32>
    %226 = arith.negf %225 : vector<8x64xf32>
    %227 = math.exp %226 : vector<8x64xf32>
    %cst_49 = arith.constant 1.000000e+00 : f32
    %228 = vector.broadcast %cst_49 : f32 to vector<8x64xf32>
    %229 = arith.addf %228, %227 : vector<8x64xf32>
    %230 = arith.divf %228, %229 : vector<8x64xf32>
    %231 = arith.mulf %222, %200 : vector<8x64xf32>
    %232 = arith.mulf %216, %224 : vector<8x64xf32>
    %233 = arith.addf %231, %232 : vector<8x64xf32>
    %234 = math.tanh %233 : vector<8x64xf32>
    %235 = arith.mulf %230, %234 : vector<8x64xf32>
    %c48_50 = arith.constant 48 : index
    %c0_51 = arith.constant 0 : index
    %236 = vector.load %arg4[%c48_50, %c0_51] : memref<64x64xf32, #tpu.memory_space<vmem>>, vector<8x64xf32>
    tpu.vector_store %arg4[%c48_50, %c0_51], %235 {strides = array<i32>} : memref<64x64xf32, #tpu.memory_space<vmem>>, vector<8x64xf32>,
    %c8_52 = arith.constant 8 : index
    %c0_53 = arith.constant 0 : index
    %237 = vector.load %arg5[%c8_52, %c0_53] : memref<64x64xf32, #tpu.memory_space<vmem>>, vector<8x64xf32>
    tpu.vector_store %arg5[%c8_52, %c0_53], %235 {strides = array<i32>} : memref<64x64xf32, #tpu.memory_space<vmem>>, vector<8x64xf32>,
    %238 = vector.extract_strided_slice %17 {offsets = [56, 0], sizes = [8, 256], strides = [1, 1]} : vector<64x256xf32> to vector<8x256xf32>
    %239 = vector.extract_strided_slice %17 {offsets = [0, 0], sizes = [8, 256], strides = [1, 1]} : vector<64x256xf32> to vector<8x256xf32>
    %240 = arith.select %4, %238, %239 : vector<8x256xi1>, vector<8x256xf32>
    %241 = arith.truncf %235 : vector<8x64xf32> to vector<8x64xbf16>
    %cst_54 = arith.constant dense<0.000000e+00> : vector<8x256xf32>
    %242 = tpu.matmul %241, %12, %cst_54 {dimension_numbers = #tpu.dot_dimension_numbers<[1], [0], [0], [1], [0, 0, 1, 1], [], []>} : vector<8x64xbf16>, vector<64x256xbf16>, vector<8x256xf32> -> vector<8x256xf32>
    %243 = arith.addf %240, %242 : vector<8x256xf32>
    %244 = vector.extract_strided_slice %243 {offsets = [0, 0], sizes = [8, 64], strides = [1, 1]} : vector<8x256xf32> to vector<8x64xf32>
    %245 = arith.negf %244 : vector<8x64xf32>
    %246 = math.exp %245 : vector<8x64xf32>
    %cst_55 = arith.constant 1.000000e+00 : f32
    %247 = vector.broadcast %cst_55 : f32 to vector<8x64xf32>
    %248 = arith.addf %247, %246 : vector<8x64xf32>
    %249 = arith.divf %247, %248 : vector<8x64xf32>
    %250 = vector.extract_strided_slice %243 {offsets = [0, 64], sizes = [8, 64], strides = [1, 1]} : vector<8x256xf32> to vector<8x64xf32>
    %251 = arith.negf %250 : vector<8x64xf32>
    %252 = math.exp %251 : vector<8x64xf32>
    %cst_56 = arith.constant 1.000000e+00 : f32
    %253 = vector.broadcast %cst_56 : f32 to vector<8x64xf32>
    %254 = arith.addf %253, %252 : vector<8x64xf32>
    %255 = arith.divf %253, %254 : vector<8x64xf32>
    %256 = vector.extract_strided_slice %243 {offsets = [0, 128], sizes = [8, 64], strides = [1, 1]} : vector<8x256xf32> to vector<8x64xf32>
    %257 = math.tanh %256 : vector<8x64xf32>
    %258 = vector.extract_strided_slice %243 {offsets = [0, 192], sizes = [8, 64], strides = [1, 1]} : vector<8x256xf32> to vector<8x64xf32>
    %259 = arith.negf %258 : vector<8x64xf32>
    %260 = math.exp %259 : vector<8x64xf32>
    %cst_57 = arith.constant 1.000000e+00 : f32
    %261 = vector.broadcast %cst_57 : f32 to vector<8x64xf32>
    %262 = arith.addf %261, %260 : vector<8x64xf32>
    %263 = arith.divf %261, %262 : vector<8x64xf32>
    %264 = arith.mulf %255, %233 : vector<8x64xf32>
    %265 = arith.mulf %249, %257 : vector<8x64xf32>
    %266 = arith.addf %264, %265 : vector<8x64xf32>
    %267 = math.tanh %266 : vector<8x64xf32>
    %268 = arith.mulf %263, %267 : vector<8x64xf32>
    %c56_58 = arith.constant 56 : index
    %c0_59 = arith.constant 0 : index
    %269 = vector.load %arg4[%c56_58, %c0_59] : memref<64x64xf32, #tpu.memory_space<vmem>>, vector<8x64xf32>
    tpu.vector_store %arg4[%c56_58, %c0_59], %268 {strides = array<i32>} : memref<64x64xf32, #tpu.memory_space<vmem>>, vector<8x64xf32>,
    %c0_60 = arith.constant 0 : index
    %c0_61 = arith.constant 0 : index
    %270 = vector.load %arg5[%c0_60, %c0_61] : memref<64x64xf32, #tpu.memory_space<vmem>>, vector<8x64xf32>
    tpu.vector_store %arg5[%c0_60, %c0_61], %268 {strides = array<i32>} : memref<64x64xf32, #tpu.memory_space<vmem>>, vector<8x64xf32>,
    %c0_62 = arith.constant 0 : index
    %c0_63 = arith.constant 0 : index
    %271 = vector.load %arg4[%c0_62, %c0_63] : memref<64x64xf32, #tpu.memory_space<vmem>>, vector<64x64xf32>
    %c0_64 = arith.constant 0 : index
    %c0_65 = arith.constant 0 : index
    %272 = vector.load %arg5[%c0_64, %c0_65] : memref<64x64xf32, #tpu.memory_space<vmem>>, vector<64x64xf32>
    %273 = arith.select %7, %271, %272 : vector<64x64xi1>, vector<64x64xf32>
    %c88 = arith.constant 88 : index
    %c0_66 = arith.constant 0 : index
    %274 = vector.load %arg2[%c88, %c0_66] : memref<424x256xf32, #tpu.memory_space<vmem>>, vector<64x256xf32>
    %275 = arith.truncf %274 : vector<64x256xf32> to vector<64x256xbf16>
    %c152 = arith.constant 152 : index
    %c0_67 = arith.constant 0 : index
    %276 = vector.load %arg2[%c152, %c0_67] : memref<424x256xf32, #tpu.memory_space<vmem>>, vector<64x256xf32>
    %277 = arith.truncf %276 : vector<64x256xf32> to vector<64x256xbf16>
    %c216 = arith.constant 216 : index
    %c0_68 = arith.constant 0 : index
    %278 = vector.load %arg2[%c216, %c0_68] : memref<424x256xf32, #tpu.memory_space<vmem>>, vector<1x256xf32>
    %279 = arith.truncf %273 : vector<64x64xf32> to vector<64x64xbf16>
    %cst_69 = arith.constant dense<0.000000e+00> : vector<64x256xf32>
    %280 = tpu.matmul %279, %275, %cst_69 {dimension_numbers = #tpu.dot_dimension_numbers<[1], [0], [0], [1], [0, 0, 1, 1], [], []>} : vector<64x64xbf16>, vector<64x256xbf16>, vector<64x256xf32> -> vector<64x256xf32>
    %281 = vector.broadcast %278 : vector<1x256xf32> to vector<64x256xf32>
    %282 = arith.addf %280, %281 : vector<64x256xf32>
    %283 = vector.extract_strided_slice %282 {offsets = [0, 0], sizes = [8, 256], strides = [1, 1]} : vector<64x256xf32> to vector<8x256xf32>
    %284 = vector.extract_strided_slice %282 {offsets = [56, 0], sizes = [8, 256], strides = [1, 1]} : vector<64x256xf32> to vector<8x256xf32>
    %285 = arith.select %4, %283, %284 : vector<8x256xi1>, vector<8x256xf32>
    %286 = vector.extract_strided_slice %285 {offsets = [0, 0], sizes = [8, 64], strides = [1, 1]} : vector<8x256xf32> to vector<8x64xf32>
    %287 = arith.negf %286 : vector<8x64xf32>
    %288 = math.exp %287 : vector<8x64xf32>
    %cst_70 = arith.constant 1.000000e+00 : f32
    %289 = vector.broadcast %cst_70 : f32 to vector<8x64xf32>
    %290 = arith.addf %289, %288 : vector<8x64xf32>
    %291 = arith.divf %289, %290 : vector<8x64xf32>
    %292 = vector.extract_strided_slice %285 {offsets = [0, 128], sizes = [8, 64], strides = [1, 1]} : vector<8x256xf32> to vector<8x64xf32>
    %293 = math.tanh %292 : vector<8x64xf32>
    %294 = vector.extract_strided_slice %285 {offsets = [0, 192], sizes = [8, 64], strides = [1, 1]} : vector<8x256xf32> to vector<8x64xf32>
    %295 = arith.negf %294 : vector<8x64xf32>
    %296 = math.exp %295 : vector<8x64xf32>
    %cst_71 = arith.constant 1.000000e+00 : f32
    %297 = vector.broadcast %cst_71 : f32 to vector<8x64xf32>
    %298 = arith.addf %297, %296 : vector<8x64xf32>
    %299 = arith.divf %297, %298 : vector<8x64xf32>
    %300 = arith.mulf %291, %293 : vector<8x64xf32>
    %301 = math.tanh %300 : vector<8x64xf32>
    %302 = arith.mulf %299, %301 : vector<8x64xf32>
    %c0_72 = arith.constant 0 : index
    %c0_73 = arith.constant 0 : index
    %303 = vector.load %arg4[%c0_72, %c0_73] : memref<64x64xf32, #tpu.memory_space<vmem>>, vector<8x64xf32>
    tpu.vector_store %arg4[%c0_72, %c0_73], %302 {strides = array<i32>} : memref<64x64xf32, #tpu.memory_space<vmem>>, vector<8x64xf32>,
    %c56_74 = arith.constant 56 : index
    %c0_75 = arith.constant 0 : index
    %304 = vector.load %arg5[%c56_74, %c0_75] : memref<64x64xf32, #tpu.memory_space<vmem>>, vector<8x64xf32>
    tpu.vector_store %arg5[%c56_74, %c0_75], %302 {strides = array<i32>} : memref<64x64xf32, #tpu.memory_space<vmem>>, vector<8x64xf32>,
    %305 = vector.extract_strided_slice %282 {offsets = [8, 0], sizes = [8, 256], strides = [1, 1]} : vector<64x256xf32> to vector<8x256xf32>
    %306 = vector.extract_strided_slice %282 {offsets = [48, 0], sizes = [8, 256], strides = [1, 1]} : vector<64x256xf32> to vector<8x256xf32>
    %307 = arith.select %4, %305, %306 : vector<8x256xi1>, vector<8x256xf32>
    %308 = arith.truncf %302 : vector<8x64xf32> to vector<8x64xbf16>
    %cst_76 = arith.constant dense<0.000000e+00> : vector<8x256xf32>
    %309 = tpu.matmul %308, %277, %cst_76 {dimension_numbers = #tpu.dot_dimension_numbers<[1], [0], [0], [1], [0, 0, 1, 1], [], []>} : vector<8x64xbf16>, vector<64x256xbf16>, vector<8x256xf32> -> vector<8x256xf32>
    %310 = arith.addf %307, %309 : vector<8x256xf32>
    %311 = vector.extract_strided_slice %310 {offsets = [0, 0], sizes = [8, 64], strides = [1, 1]} : vector<8x256xf32> to vector<8x64xf32>
    %312 = arith.negf %311 : vector<8x64xf32>
    %313 = math.exp %312 : vector<8x64xf32>
    %cst_77 = arith.constant 1.000000e+00 : f32
    %314 = vector.broadcast %cst_77 : f32 to vector<8x64xf32>
    %315 = arith.addf %314, %313 : vector<8x64xf32>
    %316 = arith.divf %314, %315 : vector<8x64xf32>
    %317 = vector.extract_strided_slice %310 {offsets = [0, 64], sizes = [8, 64], strides = [1, 1]} : vector<8x256xf32> to vector<8x64xf32>
    %318 = arith.negf %317 : vector<8x64xf32>
    %319 = math.exp %318 : vector<8x64xf32>
    %cst_78 = arith.constant 1.000000e+00 : f32
    %320 = vector.broadcast %cst_78 : f32 to vector<8x64xf32>
    %321 = arith.addf %320, %319 : vector<8x64xf32>
    %322 = arith.divf %320, %321 : vector<8x64xf32>
    %323 = vector.extract_strided_slice %310 {offsets = [0, 128], sizes = [8, 64], strides = [1, 1]} : vector<8x256xf32> to vector<8x64xf32>
    %324 = math.tanh %323 : vector<8x64xf32>
    %325 = vector.extract_strided_slice %310 {offsets = [0, 192], sizes = [8, 64], strides = [1, 1]} : vector<8x256xf32> to vector<8x64xf32>
    %326 = arith.negf %325 : vector<8x64xf32>
    %327 = math.exp %326 : vector<8x64xf32>
    %cst_79 = arith.constant 1.000000e+00 : f32
    %328 = vector.broadcast %cst_79 : f32 to vector<8x64xf32>
    %329 = arith.addf %328, %327 : vector<8x64xf32>
    %330 = arith.divf %328, %329 : vector<8x64xf32>
    %331 = arith.mulf %322, %300 : vector<8x64xf32>
    %332 = arith.mulf %316, %324 : vector<8x64xf32>
    %333 = arith.addf %331, %332 : vector<8x64xf32>
    %334 = math.tanh %333 : vector<8x64xf32>
    %335 = arith.mulf %330, %334 : vector<8x64xf32>
    %c8_80 = arith.constant 8 : index
    %c0_81 = arith.constant 0 : index
    %336 = vector.load %arg4[%c8_80, %c0_81] : memref<64x64xf32, #tpu.memory_space<vmem>>, vector<8x64xf32>
    tpu.vector_store %arg4[%c8_80, %c0_81], %335 {strides = array<i32>} : memref<64x64xf32, #tpu.memory_space<vmem>>, vector<8x64xf32>,
    %c48_82 = arith.constant 48 : index
    %c0_83 = arith.constant 0 : index
    %337 = vector.load %arg5[%c48_82, %c0_83] : memref<64x64xf32, #tpu.memory_space<vmem>>, vector<8x64xf32>
    tpu.vector_store %arg5[%c48_82, %c0_83], %335 {strides = array<i32>} : memref<64x64xf32, #tpu.memory_space<vmem>>, vector<8x64xf32>,
    %338 = vector.extract_strided_slice %282 {offsets = [16, 0], sizes = [8, 256], strides = [1, 1]} : vector<64x256xf32> to vector<8x256xf32>
    %339 = vector.extract_strided_slice %282 {offsets = [40, 0], sizes = [8, 256], strides = [1, 1]} : vector<64x256xf32> to vector<8x256xf32>
    %340 = arith.select %4, %338, %339 : vector<8x256xi1>, vector<8x256xf32>
    %341 = arith.truncf %335 : vector<8x64xf32> to vector<8x64xbf16>
    %cst_84 = arith.constant dense<0.000000e+00> : vector<8x256xf32>
    %342 = tpu.matmul %341, %277, %cst_84 {dimension_numbers = #tpu.dot_dimension_numbers<[1], [0], [0], [1], [0, 0, 1, 1], [], []>} : vector<8x64xbf16>, vector<64x256xbf16>, vector<8x256xf32> -> vector<8x256xf32>
    %343 = arith.addf %340, %342 : vector<8x256xf32>
    %344 = vector.extract_strided_slice %343 {offsets = [0, 0], sizes = [8, 64], strides = [1, 1]} : vector<8x256xf32> to vector<8x64xf32>
    %345 = arith.negf %344 : vector<8x64xf32>
    %346 = math.exp %345 : vector<8x64xf32>
    %cst_85 = arith.constant 1.000000e+00 : f32
    %347 = vector.broadcast %cst_85 : f32 to vector<8x64xf32>
    %348 = arith.addf %347, %346 : vector<8x64xf32>
    %349 = arith.divf %347, %348 : vector<8x64xf32>
    %350 = vector.extract_strided_slice %343 {offsets = [0, 64], sizes = [8, 64], strides = [1, 1]} : vector<8x256xf32> to vector<8x64xf32>
    %351 = arith.negf %350 : vector<8x64xf32>
    %352 = math.exp %351 : vector<8x64xf32>
    %cst_86 = arith.constant 1.000000e+00 : f32
    %353 = vector.broadcast %cst_86 : f32 to vector<8x64xf32>
    %354 = arith.addf %353, %352 : vector<8x64xf32>
    %355 = arith.divf %353, %354 : vector<8x64xf32>
    %356 = vector.extract_strided_slice %343 {offsets = [0, 128], sizes = [8, 64], strides = [1, 1]} : vector<8x256xf32> to vector<8x64xf32>
    %357 = math.tanh %356 : vector<8x64xf32>
    %358 = vector.extract_strided_slice %343 {offsets = [0, 192], sizes = [8, 64], strides = [1, 1]} : vector<8x256xf32> to vector<8x64xf32>
    %359 = arith.negf %358 : vector<8x64xf32>
    %360 = math.exp %359 : vector<8x64xf32>
    %cst_87 = arith.constant 1.000000e+00 : f32
    %361 = vector.broadcast %cst_87 : f32 to vector<8x64xf32>
    %362 = arith.addf %361, %360 : vector<8x64xf32>
    %363 = arith.divf %361, %362 : vector<8x64xf32>
    %364 = arith.mulf %355, %333 : vector<8x64xf32>
    %365 = arith.mulf %349, %357 : vector<8x64xf32>
    %366 = arith.addf %364, %365 : vector<8x64xf32>
    %367 = math.tanh %366 : vector<8x64xf32>
    %368 = arith.mulf %363, %367 : vector<8x64xf32>
    %c16_88 = arith.constant 16 : index
    %c0_89 = arith.constant 0 : index
    %369 = vector.load %arg4[%c16_88, %c0_89] : memref<64x64xf32, #tpu.memory_space<vmem>>, vector<8x64xf32>
    tpu.vector_store %arg4[%c16_88, %c0_89], %368 {strides = array<i32>} : memref<64x64xf32, #tpu.memory_space<vmem>>, vector<8x64xf32>,
    %c40_90 = arith.constant 40 : index
    %c0_91 = arith.constant 0 : index
    %370 = vector.load %arg5[%c40_90, %c0_91] : memref<64x64xf32, #tpu.memory_space<vmem>>, vector<8x64xf32>
    tpu.vector_store %arg5[%c40_90, %c0_91], %368 {strides = array<i32>} : memref<64x64xf32, #tpu.memory_space<vmem>>, vector<8x64xf32>,
    %371 = vector.extract_strided_slice %282 {offsets = [24, 0], sizes = [8, 256], strides = [1, 1]} : vector<64x256xf32> to vector<8x256xf32>
    %372 = vector.extract_strided_slice %282 {offsets = [32, 0], sizes = [8, 256], strides = [1, 1]} : vector<64x256xf32> to vector<8x256xf32>
    %373 = arith.select %4, %371, %372 : vector<8x256xi1>, vector<8x256xf32>
    %374 = arith.truncf %368 : vector<8x64xf32> to vector<8x64xbf16>
    %cst_92 = arith.constant dense<0.000000e+00> : vector<8x256xf32>
    %375 = tpu.matmul %374, %277, %cst_92 {dimension_numbers = #tpu.dot_dimension_numbers<[1], [0], [0], [1], [0, 0, 1, 1], [], []>} : vector<8x64xbf16>, vector<64x256xbf16>, vector<8x256xf32> -> vector<8x256xf32>
    %376 = arith.addf %373, %375 : vector<8x256xf32>
    %377 = vector.extract_strided_slice %376 {offsets = [0, 0], sizes = [8, 64], strides = [1, 1]} : vector<8x256xf32> to vector<8x64xf32>
    %378 = arith.negf %377 : vector<8x64xf32>
    %379 = math.exp %378 : vector<8x64xf32>
    %cst_93 = arith.constant 1.000000e+00 : f32
    %380 = vector.broadcast %cst_93 : f32 to vector<8x64xf32>
    %381 = arith.addf %380, %379 : vector<8x64xf32>
    %382 = arith.divf %380, %381 : vector<8x64xf32>
    %383 = vector.extract_strided_slice %376 {offsets = [0, 64], sizes = [8, 64], strides = [1, 1]} : vector<8x256xf32> to vector<8x64xf32>
    %384 = arith.negf %383 : vector<8x64xf32>
    %385 = math.exp %384 : vector<8x64xf32>
    %cst_94 = arith.constant 1.000000e+00 : f32
    %386 = vector.broadcast %cst_94 : f32 to vector<8x64xf32>
    %387 = arith.addf %386, %385 : vector<8x64xf32>
    %388 = arith.divf %386, %387 : vector<8x64xf32>
    %389 = vector.extract_strided_slice %376 {offsets = [0, 128], sizes = [8, 64], strides = [1, 1]} : vector<8x256xf32> to vector<8x64xf32>
    %390 = math.tanh %389 : vector<8x64xf32>
    %391 = vector.extract_strided_slice %376 {offsets = [0, 192], sizes = [8, 64], strides = [1, 1]} : vector<8x256xf32> to vector<8x64xf32>
    %392 = arith.negf %391 : vector<8x64xf32>
    %393 = math.exp %392 : vector<8x64xf32>
    %cst_95 = arith.constant 1.000000e+00 : f32
    %394 = vector.broadcast %cst_95 : f32 to vector<8x64xf32>
    %395 = arith.addf %394, %393 : vector<8x64xf32>
    %396 = arith.divf %394, %395 : vector<8x64xf32>
    %397 = arith.mulf %388, %366 : vector<8x64xf32>
    %398 = arith.mulf %382, %390 : vector<8x64xf32>
    %399 = arith.addf %397, %398 : vector<8x64xf32>
    %400 = math.tanh %399 : vector<8x64xf32>
    %401 = arith.mulf %396, %400 : vector<8x64xf32>
    %c24_96 = arith.constant 24 : index
    %c0_97 = arith.constant 0 : index
    %402 = vector.load %arg4[%c24_96, %c0_97] : memref<64x64xf32, #tpu.memory_space<vmem>>, vector<8x64xf32>
    tpu.vector_store %arg4[%c24_96, %c0_97], %401 {strides = array<i32>} : memref<64x64xf32, #tpu.memory_space<vmem>>, vector<8x64xf32>,
    %c32_98 = arith.constant 32 : index
    %c0_99 = arith.constant 0 : index
    %403 = vector.load %arg5[%c32_98, %c0_99] : memref<64x64xf32, #tpu.memory_space<vmem>>, vector<8x64xf32>
    tpu.vector_store %arg5[%c32_98, %c0_99], %401 {strides = array<i32>} : memref<64x64xf32, #tpu.memory_space<vmem>>, vector<8x64xf32>,
    %404 = vector.extract_strided_slice %282 {offsets = [32, 0], sizes = [8, 256], strides = [1, 1]} : vector<64x256xf32> to vector<8x256xf32>
    %405 = vector.extract_strided_slice %282 {offsets = [24, 0], sizes = [8, 256], strides = [1, 1]} : vector<64x256xf32> to vector<8x256xf32>
    %406 = arith.select %4, %404, %405 : vector<8x256xi1>, vector<8x256xf32>
    %407 = arith.truncf %401 : vector<8x64xf32> to vector<8x64xbf16>
    %cst_100 = arith.constant dense<0.000000e+00> : vector<8x256xf32>
    %408 = tpu.matmul %407, %277, %cst_100 {dimension_numbers = #tpu.dot_dimension_numbers<[1], [0], [0], [1], [0, 0, 1, 1], [], []>} : vector<8x64xbf16>, vector<64x256xbf16>, vector<8x256xf32> -> vector<8x256xf32>
    %409 = arith.addf %406, %408 : vector<8x256xf32>
    %410 = vector.extract_strided_slice %409 {offsets = [0, 0], sizes = [8, 64], strides = [1, 1]} : vector<8x256xf32> to vector<8x64xf32>
    %411 = arith.negf %410 : vector<8x64xf32>
    %412 = math.exp %411 : vector<8x64xf32>
    %cst_101 = arith.constant 1.000000e+00 : f32
    %413 = vector.broadcast %cst_101 : f32 to vector<8x64xf32>
    %414 = arith.addf %413, %412 : vector<8x64xf32>
    %415 = arith.divf %413, %414 : vector<8x64xf32>
    %416 = vector.extract_strided_slice %409 {offsets = [0, 64], sizes = [8, 64], strides = [1, 1]} : vector<8x256xf32> to vector<8x64xf32>
    %417 = arith.negf %416 : vector<8x64xf32>
    %418 = math.exp %417 : vector<8x64xf32>
    %cst_102 = arith.constant 1.000000e+00 : f32
    %419 = vector.broadcast %cst_102 : f32 to vector<8x64xf32>
    %420 = arith.addf %419, %418 : vector<8x64xf32>
    %421 = arith.divf %419, %420 : vector<8x64xf32>
    %422 = vector.extract_strided_slice %409 {offsets = [0, 128], sizes = [8, 64], strides = [1, 1]} : vector<8x256xf32> to vector<8x64xf32>
    %423 = math.tanh %422 : vector<8x64xf32>
    %424 = vector.extract_strided_slice %409 {offsets = [0, 192], sizes = [8, 64], strides = [1, 1]} : vector<8x256xf32> to vector<8x64xf32>
    %425 = arith.negf %424 : vector<8x64xf32>
    %426 = math.exp %425 : vector<8x64xf32>
    %cst_103 = arith.constant 1.000000e+00 : f32
    %427 = vector.broadcast %cst_103 : f32 to vector<8x64xf32>
    %428 = arith.addf %427, %426 : vector<8x64xf32>
    %429 = arith.divf %427, %428 : vector<8x64xf32>
    %430 = arith.mulf %421, %399 : vector<8x64xf32>
    %431 = arith.mulf %415, %423 : vector<8x64xf32>
    %432 = arith.addf %430, %431 : vector<8x64xf32>
    %433 = math.tanh %432 : vector<8x64xf32>
    %434 = arith.mulf %429, %433 : vector<8x64xf32>
    %c32_104 = arith.constant 32 : index
    %c0_105 = arith.constant 0 : index
    %435 = vector.load %arg4[%c32_104, %c0_105] : memref<64x64xf32, #tpu.memory_space<vmem>>, vector<8x64xf32>
    tpu.vector_store %arg4[%c32_104, %c0_105], %434 {strides = array<i32>} : memref<64x64xf32, #tpu.memory_space<vmem>>, vector<8x64xf32>,
    %c24_106 = arith.constant 24 : index
    %c0_107 = arith.constant 0 : index
    %436 = vector.load %arg5[%c24_106, %c0_107] : memref<64x64xf32, #tpu.memory_space<vmem>>, vector<8x64xf32>
    tpu.vector_store %arg5[%c24_106, %c0_107], %434 {strides = array<i32>} : memref<64x64xf32, #tpu.memory_space<vmem>>, vector<8x64xf32>,
    %437 = vector.extract_strided_slice %282 {offsets = [40, 0], sizes = [8, 256], strides = [1, 1]} : vector<64x256xf32> to vector<8x256xf32>
    %438 = vector.extract_strided_slice %282 {offsets = [16, 0], sizes = [8, 256], strides = [1, 1]} : vector<64x256xf32> to vector<8x256xf32>
    %439 = arith.select %4, %437, %438 : vector<8x256xi1>, vector<8x256xf32>
    %440 = arith.truncf %434 : vector<8x64xf32> to vector<8x64xbf16>
    %cst_108 = arith.constant dense<0.000000e+00> : vector<8x256xf32>
    %441 = tpu.matmul %440, %277, %cst_108 {dimension_numbers = #tpu.dot_dimension_numbers<[1], [0], [0], [1], [0, 0, 1, 1], [], []>} : vector<8x64xbf16>, vector<64x256xbf16>, vector<8x256xf32> -> vector<8x256xf32>
    %442 = arith.addf %439, %441 : vector<8x256xf32>
    %443 = vector.extract_strided_slice %442 {offsets = [0, 0], sizes = [8, 64], strides = [1, 1]} : vector<8x256xf32> to vector<8x64xf32>
    %444 = arith.negf %443 : vector<8x64xf32>
    %445 = math.exp %444 : vector<8x64xf32>
    %cst_109 = arith.constant 1.000000e+00 : f32
    %446 = vector.broadcast %cst_109 : f32 to vector<8x64xf32>
    %447 = arith.addf %446, %445 : vector<8x64xf32>
    %448 = arith.divf %446, %447 : vector<8x64xf32>
    %449 = vector.extract_strided_slice %442 {offsets = [0, 64], sizes = [8, 64], strides = [1, 1]} : vector<8x256xf32> to vector<8x64xf32>
    %450 = arith.negf %449 : vector<8x64xf32>
    %451 = math.exp %450 : vector<8x64xf32>
    %cst_110 = arith.constant 1.000000e+00 : f32
    %452 = vector.broadcast %cst_110 : f32 to vector<8x64xf32>
    %453 = arith.addf %452, %451 : vector<8x64xf32>
    %454 = arith.divf %452, %453 : vector<8x64xf32>
    %455 = vector.extract_strided_slice %442 {offsets = [0, 128], sizes = [8, 64], strides = [1, 1]} : vector<8x256xf32> to vector<8x64xf32>
    %456 = math.tanh %455 : vector<8x64xf32>
    %457 = vector.extract_strided_slice %442 {offsets = [0, 192], sizes = [8, 64], strides = [1, 1]} : vector<8x256xf32> to vector<8x64xf32>
    %458 = arith.negf %457 : vector<8x64xf32>
    %459 = math.exp %458 : vector<8x64xf32>
    %cst_111 = arith.constant 1.000000e+00 : f32
    %460 = vector.broadcast %cst_111 : f32 to vector<8x64xf32>
    %461 = arith.addf %460, %459 : vector<8x64xf32>
    %462 = arith.divf %460, %461 : vector<8x64xf32>
    %463 = arith.mulf %454, %432 : vector<8x64xf32>
    %464 = arith.mulf %448, %456 : vector<8x64xf32>
    %465 = arith.addf %463, %464 : vector<8x64xf32>
    %466 = math.tanh %465 : vector<8x64xf32>
    %467 = arith.mulf %462, %466 : vector<8x64xf32>
    %c40_112 = arith.constant 40 : index
    %c0_113 = arith.constant 0 : index
    %468 = vector.load %arg4[%c40_112, %c0_113] : memref<64x64xf32, #tpu.memory_space<vmem>>, vector<8x64xf32>
    tpu.vector_store %arg4[%c40_112, %c0_113], %467 {strides = array<i32>} : memref<64x64xf32, #tpu.memory_space<vmem>>, vector<8x64xf32>,
    %c16_114 = arith.constant 16 : index
    %c0_115 = arith.constant 0 : index
    %469 = vector.load %arg5[%c16_114, %c0_115] : memref<64x64xf32, #tpu.memory_space<vmem>>, vector<8x64xf32>
    tpu.vector_store %arg5[%c16_114, %c0_115], %467 {strides = array<i32>} : memref<64x64xf32, #tpu.memory_space<vmem>>, vector<8x64xf32>,
    %470 = vector.extract_strided_slice %282 {offsets = [48, 0], sizes = [8, 256], strides = [1, 1]} : vector<64x256xf32> to vector<8x256xf32>
    %471 = vector.extract_strided_slice %282 {offsets = [8, 0], sizes = [8, 256], strides = [1, 1]} : vector<64x256xf32> to vector<8x256xf32>
    %472 = arith.select %4, %470, %471 : vector<8x256xi1>, vector<8x256xf32>
    %473 = arith.truncf %467 : vector<8x64xf32> to vector<8x64xbf16>
    %cst_116 = arith.constant dense<0.000000e+00> : vector<8x256xf32>
    %474 = tpu.matmul %473, %277, %cst_116 {dimension_numbers = #tpu.dot_dimension_numbers<[1], [0], [0], [1], [0, 0, 1, 1], [], []>} : vector<8x64xbf16>, vector<64x256xbf16>, vector<8x256xf32> -> vector<8x256xf32>
    %475 = arith.addf %472, %474 : vector<8x256xf32>
    %476 = vector.extract_strided_slice %475 {offsets = [0, 0], sizes = [8, 64], strides = [1, 1]} : vector<8x256xf32> to vector<8x64xf32>
    %477 = arith.negf %476 : vector<8x64xf32>
    %478 = math.exp %477 : vector<8x64xf32>
    %cst_117 = arith.constant 1.000000e+00 : f32
    %479 = vector.broadcast %cst_117 : f32 to vector<8x64xf32>
    %480 = arith.addf %479, %478 : vector<8x64xf32>
    %481 = arith.divf %479, %480 : vector<8x64xf32>
    %482 = vector.extract_strided_slice %475 {offsets = [0, 64], sizes = [8, 64], strides = [1, 1]} : vector<8x256xf32> to vector<8x64xf32>
    %483 = arith.negf %482 : vector<8x64xf32>
    %484 = math.exp %483 : vector<8x64xf32>
    %cst_118 = arith.constant 1.000000e+00 : f32
    %485 = vector.broadcast %cst_118 : f32 to vector<8x64xf32>
    %486 = arith.addf %485, %484 : vector<8x64xf32>
    %487 = arith.divf %485, %486 : vector<8x64xf32>
    %488 = vector.extract_strided_slice %475 {offsets = [0, 128], sizes = [8, 64], strides = [1, 1]} : vector<8x256xf32> to vector<8x64xf32>
    %489 = math.tanh %488 : vector<8x64xf32>
    %490 = vector.extract_strided_slice %475 {offsets = [0, 192], sizes = [8, 64], strides = [1, 1]} : vector<8x256xf32> to vector<8x64xf32>
    %491 = arith.negf %490 : vector<8x64xf32>
    %492 = math.exp %491 : vector<8x64xf32>
    %cst_119 = arith.constant 1.000000e+00 : f32
    %493 = vector.broadcast %cst_119 : f32 to vector<8x64xf32>
    %494 = arith.addf %493, %492 : vector<8x64xf32>
    %495 = arith.divf %493, %494 : vector<8x64xf32>
    %496 = arith.mulf %487, %465 : vector<8x64xf32>
    %497 = arith.mulf %481, %489 : vector<8x64xf32>
    %498 = arith.addf %496, %497 : vector<8x64xf32>
    %499 = math.tanh %498 : vector<8x64xf32>
    %500 = arith.mulf %495, %499 : vector<8x64xf32>
    %c48_120 = arith.constant 48 : index
    %c0_121 = arith.constant 0 : index
    %501 = vector.load %arg4[%c48_120, %c0_121] : memref<64x64xf32, #tpu.memory_space<vmem>>, vector<8x64xf32>
    tpu.vector_store %arg4[%c48_120, %c0_121], %500 {strides = array<i32>} : memref<64x64xf32, #tpu.memory_space<vmem>>, vector<8x64xf32>,
    %c8_122 = arith.constant 8 : index
    %c0_123 = arith.constant 0 : index
    %502 = vector.load %arg5[%c8_122, %c0_123] : memref<64x64xf32, #tpu.memory_space<vmem>>, vector<8x64xf32>
    tpu.vector_store %arg5[%c8_122, %c0_123], %500 {strides = array<i32>} : memref<64x64xf32, #tpu.memory_space<vmem>>, vector<8x64xf32>,
    %503 = vector.extract_strided_slice %282 {offsets = [56, 0], sizes = [8, 256], strides = [1, 1]} : vector<64x256xf32> to vector<8x256xf32>
    %504 = vector.extract_strided_slice %282 {offsets = [0, 0], sizes = [8, 256], strides = [1, 1]} : vector<64x256xf32> to vector<8x256xf32>
    %505 = arith.select %4, %503, %504 : vector<8x256xi1>, vector<8x256xf32>
    %506 = arith.truncf %500 : vector<8x64xf32> to vector<8x64xbf16>
    %cst_124 = arith.constant dense<0.000000e+00> : vector<8x256xf32>
    %507 = tpu.matmul %506, %277, %cst_124 {dimension_numbers = #tpu.dot_dimension_numbers<[1], [0], [0], [1], [0, 0, 1, 1], [], []>} : vector<8x64xbf16>, vector<64x256xbf16>, vector<8x256xf32> -> vector<8x256xf32>
    %508 = arith.addf %505, %507 : vector<8x256xf32>
    %509 = vector.extract_strided_slice %508 {offsets = [0, 0], sizes = [8, 64], strides = [1, 1]} : vector<8x256xf32> to vector<8x64xf32>
    %510 = arith.negf %509 : vector<8x64xf32>
    %511 = math.exp %510 : vector<8x64xf32>
    %cst_125 = arith.constant 1.000000e+00 : f32
    %512 = vector.broadcast %cst_125 : f32 to vector<8x64xf32>
    %513 = arith.addf %512, %511 : vector<8x64xf32>
    %514 = arith.divf %512, %513 : vector<8x64xf32>
    %515 = vector.extract_strided_slice %508 {offsets = [0, 64], sizes = [8, 64], strides = [1, 1]} : vector<8x256xf32> to vector<8x64xf32>
    %516 = arith.negf %515 : vector<8x64xf32>
    %517 = math.exp %516 : vector<8x64xf32>
    %cst_126 = arith.constant 1.000000e+00 : f32
    %518 = vector.broadcast %cst_126 : f32 to vector<8x64xf32>
    %519 = arith.addf %518, %517 : vector<8x64xf32>
    %520 = arith.divf %518, %519 : vector<8x64xf32>
    %521 = vector.extract_strided_slice %508 {offsets = [0, 128], sizes = [8, 64], strides = [1, 1]} : vector<8x256xf32> to vector<8x64xf32>
    %522 = math.tanh %521 : vector<8x64xf32>
    %523 = vector.extract_strided_slice %508 {offsets = [0, 192], sizes = [8, 64], strides = [1, 1]} : vector<8x256xf32> to vector<8x64xf32>
    %524 = arith.negf %523 : vector<8x64xf32>
    %525 = math.exp %524 : vector<8x64xf32>
    %cst_127 = arith.constant 1.000000e+00 : f32
    %526 = vector.broadcast %cst_127 : f32 to vector<8x64xf32>
    %527 = arith.addf %526, %525 : vector<8x64xf32>
    %528 = arith.divf %526, %527 : vector<8x64xf32>
    %529 = arith.mulf %520, %498 : vector<8x64xf32>
    %530 = arith.mulf %514, %522 : vector<8x64xf32>
    %531 = arith.addf %529, %530 : vector<8x64xf32>
    %532 = math.tanh %531 : vector<8x64xf32>
    %533 = arith.mulf %528, %532 : vector<8x64xf32>
    %c56_128 = arith.constant 56 : index
    %c0_129 = arith.constant 0 : index
    %534 = vector.load %arg4[%c56_128, %c0_129] : memref<64x64xf32, #tpu.memory_space<vmem>>, vector<8x64xf32>
    tpu.vector_store %arg4[%c56_128, %c0_129], %533 {strides = array<i32>} : memref<64x64xf32, #tpu.memory_space<vmem>>, vector<8x64xf32>,
    %c0_130 = arith.constant 0 : index
    %c0_131 = arith.constant 0 : index
    %535 = vector.load %arg5[%c0_130, %c0_131] : memref<64x64xf32, #tpu.memory_space<vmem>>, vector<8x64xf32>
    tpu.vector_store %arg5[%c0_130, %c0_131], %533 {strides = array<i32>} : memref<64x64xf32, #tpu.memory_space<vmem>>, vector<8x64xf32>,
    %c0_132 = arith.constant 0 : index
    %c0_133 = arith.constant 0 : index
    %536 = vector.load %arg4[%c0_132, %c0_133] : memref<64x64xf32, #tpu.memory_space<vmem>>, vector<64x64xf32>
    %c0_134 = arith.constant 0 : index
    %c0_135 = arith.constant 0 : index
    %537 = vector.load %arg5[%c0_134, %c0_135] : memref<64x64xf32, #tpu.memory_space<vmem>>, vector<64x64xf32>
    %538 = arith.select %7, %536, %537 : vector<64x64xi1>, vector<64x64xf32>
    %c224 = arith.constant 224 : index
    %c0_136 = arith.constant 0 : index
    %539 = vector.load %arg2[%c224, %c0_136] : memref<424x256xf32, #tpu.memory_space<vmem>>, vector<64x128xf32>
    %540 = arith.truncf %539 : vector<64x128xf32> to vector<64x128xbf16>
    %c288 = arith.constant 288 : index
    %c0_137 = arith.constant 0 : index
    %541 = vector.load %arg2[%c288, %c0_137] : memref<424x256xf32, #tpu.memory_space<vmem>>, vector<1x128xf32>
    %c296 = arith.constant 296 : index
    %c0_138 = arith.constant 0 : index
    %542 = vector.load %arg2[%c296, %c0_138] : memref<424x256xf32, #tpu.memory_space<vmem>>, vector<128x128xf32>
    %543 = arith.truncf %538 : vector<64x64xf32> to vector<64x64xbf16>
    %cst_139 = arith.constant dense<0.000000e+00> : vector<64x128xf32>
    %544 = tpu.matmul %543, %540, %cst_139 {dimension_numbers = #tpu.dot_dimension_numbers<[1], [0], [0], [1], [0, 0, 1, 1], [], []>} : vector<64x64xbf16>, vector<64x128xbf16>, vector<64x128xf32> -> vector<64x128xf32>
    %545 = vector.broadcast %541 : vector<1x128xf32> to vector<64x128xf32>
    %546 = arith.addf %544, %545 : vector<64x128xf32>
    %547 = arith.negf %546 : vector<64x128xf32>
    %548 = math.exp %547 : vector<64x128xf32>
    %cst_140 = arith.constant 1.000000e+00 : f32
    %549 = vector.broadcast %cst_140 : f32 to vector<64x128xf32>
    %550 = arith.addf %549, %548 : vector<64x128xf32>
    %551 = arith.divf %549, %550 : vector<64x128xf32>
    %552 = arith.mulf %551, %551 : vector<64x128xf32>
    %cst_141 = arith.constant dense<0.000000e+00> : vector<64x128xf32>
    %553 = tpu.matmul %552, %542, %cst_141 {dimension_numbers = #tpu.dot_dimension_numbers<[1], [0], [0], [1], [0, 0, 1, 1], [], []>} : vector<64x128xf32>, vector<128x128xf32>, vector<64x128xf32> -> vector<64x128xf32>
    %554 = math.sqrt %553 : vector<64x128xf32>
    %cst_142 = arith.constant 9.99999971E-10 : f32
    %555 = vector.broadcast %cst_142 : f32 to vector<64x128xf32>
    %556 = arith.addf %554, %555 : vector<64x128xf32>
    %557 = arith.divf %551, %556 : vector<64x128xf32>
    %c0_143 = arith.constant 0 : index
    %c0_144 = arith.constant 0 : index
    %558 = vector.load %arg3[%c0_143, %c0_144] : memref<64x128xf32, #tpu.memory_space<vmem>>, vector<64x128xf32>
    tpu.vector_store %arg3[%c0_143, %c0_144], %557 {strides = array<i32>} : memref<64x128xf32, #tpu.memory_space<vmem>>, vector<64x128xf32>,
    return
  }
  func.func @transform_0(%arg0: i32) -> (i32, i32) {
    %c0_i32 = arith.constant 0 : i32
    %c0_i32_0 = arith.constant 0 : i32
    %c0_i32_1 = arith.constant 0 : i32
    return %c0_i32, %c0_i32_0 : i32, i32
  }
  func.func @transform_1(%arg0: i32) -> (i32, i32) {
    %c0_i32 = arith.constant 0 : i32
    %c0_i32_0 = arith.constant 0 : i32
    %c0_i32_1 = arith.constant 0 : i32
    return %c0_i32, %c0_i32_0 : i32, i32
  }
  func.func @transform_2(%arg0: i32) -> (i32, i32) {
    %c0_i32 = arith.constant 0 : i32
    %c0_i32_0 = arith.constant 0 : i32
    %c0_i32_1 = arith.constant 0 : i32
    return %c0_i32, %c0_i32_0 : i32, i32
  }
}

</mosaic_0001>

<bundles_post_ra>
// kernel: embedding_forward.1
= control target key start
LH: loop header
LB: loop body
LE: loop exit
PB: predicated region body
PF: predicated region fallthrough
CT: control target
= control target key end

     0   :  { %7 = vsyncpa [#allocation5], 0  ;;  %s2397_s9 = smov [#allocation4]   ;;  %s3254_s0 = inlined_call_operand.vmem [shape: f32[64,16], index: 0, kind: input, shape index: {}]   ;;  %s3255_s1 = inlined_call_operand.hbm [shape: f32[424,256], index: 1, kind: input, shape index: {}]   ;;  %s3256_s2 = inlined_call_operand.vmem [shape: f32[64,128], index: 2, kind: output, shape index: {}]  }
   0x1   :  { %s15_s10 = sshll.u32 %s2397_s9, 4  ;;  %s2373_s13 = scalar_lea.hbm %s3255_s1, 13568  ;;  %s16_s10 = int_to_ptr.vmem [resolvable:$true] %s15_s10 }
   0x2   :  { %p2374_p0 = scmp.ne.s32.totalorder %s3255_s1, %s2373_s13  ;;  %p2377_p1 = scmp.lt.u32.totalorder %s2373_s13, %s3255_s1 }
   0x4   :  { %p2379_p2 = pnand %p2377_p1, %p2374_p0 }
   0x6   :  { %2382 = shalt.err (!%p2379_p2)
}
   0x7   :  { %s2383_s18 = scalar_lea.vmem %s16_s10, 13568  ;;  %p2388_p4 = scmp.lt.s32.totalorder %s16_s10, %s16_s10 }
   0x8   :  { %p2384_p3 = scmp.ne.s32.totalorder %s16_s10, %s2383_s18  ;;  %p2389_p5 = scmp.lt.s32.totalorder %s2383_s18, %s2383_s18 }
   0xa   :  { %p2390_p6 = por %p2389_p5, %p2388_p4 }
   0xc   :  { %p2391_p7 = pnand %p2390_p6, %p2384_p3 }
   0xe   :  { %2394 = shalt.err (!%p2391_p7)
}
   0xf   :  { %s2398_s19 = smov 256   ;;  %s2399_s20 = smov 16  }
  0x10   :  { %21 = dma.hbm_to_vmem [thread:$0]  %s3255_s1, 13568, %s16_s10, [#allocation5], %s2398_s19, %s2398_s19, %s2399_s20  }
  0x11   :  { %2395 = dma.done.wait [#allocation5], 13568  }
  0x12   :  { %2396 = vsyncadd [#allocation5], 4294953728  ;;  %v2400_v0 = vmov 0   ;;  %v43_v1 = vld [vmem:[#allocation4 + $0x8] sm:$0xff]  ;;  %v45_v2 = vld [vmem:[#allocation4 + $0x18] sm:$0xff]  ;;  %vm89_vm0 = vcmask 130048   ;;  %v26_v19 = vlaneseq }
  0x13   :  { %134 = vmatprep.mubr.bf16.mxu0 %v2400_v0  ;;  %329 = vmatprep.mubr.bf16.mxu1 %v2400_v0  ;;  %v42_v3 = vld [vmem:[#allocation4] sm:$0xff]  ;;  %v47_v4 = vpack.c.bf16 %v45_v2, %v43_v1  ;;  %v44_v5 = vld [vmem:[#allocation4 + $0x10] sm:$0xff]  ;;  %v35_v7 = vld [vmem:[%s3254_s0 + $0x8] sm:$0xff]  ;;  %vm201_vm3 = vcmask 523264  }
  0x14   :  { %v34_v6 = vld [vmem:[%s3254_s0] sm:$0xff]  ;;  %v46_v8 = vpack.c.bf16 %v44_v5, %v42_v3  ;;  %v36_v10 = vld [vmem:[%s3254_s0 + $0x10] sm:$0xff]  ;;  %v37_v11 = vld [vmem:[%s3254_s0 + $0x18] sm:$0xff]  ;;  %v2463_v20 = vshrl.u32 %v26_v19, 7  ;;  %v2475_v32 = vand.u32 127, %v26_v19 }
  0x15   :  { %102 = vmatprep.subr.bf16.mxu0 %v47_v4  ;;  %v74_v9 = vpack.c.bf16 %v35_v7, %v34_v6  ;;  %v75_v12 = vpack.c.bf16 %v37_v11, %v36_v10  ;;  %v38_v13 = vld [vmem:[%s3254_s0 + $0x20] sm:$0xff]  ;;  %v39_v14 = vld [vmem:[%s3254_s0 + $0x28] sm:$0xff]  ;;  %v40_v16 = vld [vmem:[%s3254_s0 + $0x30] sm:$0xff] }
  0x16   :  { %103 = vmatpush1.bf16.msra.mxu0 %v46_v8  ;;  %v76_v15 = vpack.c.bf16 %v39_v14, %v38_v13  ;;  %v41_v17 = vld [vmem:[%s3254_s0 + $0x38] sm:$0xff]  ;;  %v81_v21 = vsub.s32 0, %v2463_v20  ;;  %v73_v22 = vld [vmem:[#allocation4 + $0xa0] ss:$8 sm:$0x3]  ;;  %v85_v23 = vsub.s32 1, %v2463_v20 }
  0x17   :  { %v77_v18 = vpack.c.bf16 %v41_v17, %v40_v16  ;;  %v28_v34 = vadd.s32 128, %v2475_v32  ;;  %v29_v41 = vand.u32 32, %v2475_v32  ;;  %s2401_s0 = smov 64   ;;  %vm33_vm4 = vcmp.lt.s32.totalorder %v2475_v32, 32  ;;  %v1558_v46 = vld [vmem:[#allocation4 + $0x1c0] sm:$0xff]  ;;  %v1577_v32 = vld [vmem:[#allocation4 + $0x2b0] sm:$0xff] }
  0x18   :  { %v82_v25 = vrot.slane %v73_v22, %v81_v21  ;;  %v86_v27 = vrot.slane %v73_v22, %v85_v23 }
  0x19   :  { %1922 = vmatmul.mubr.msk.bf16.vlgmr.msra.gmra.mrb[0].mxu0 %vm89_vm0, %v74_v9  ;;  %v30_v43 = vand.u32 32, %v28_v34  ;;  %vm2487_vm1 = vcmp.eq.s32.totalorder %v29_v41, 0  ;;  %v53_v34 = vld [vmem:[#allocation4 + $0x48] sm:$0xff]  ;;  %v52_v41 = vld [vmem:[#allocation4 + $0x40] sm:$0xff] }
  0x1a   :  { %144 = vmatprep.mubr.bf16.mxu0 %v2400_v0 }
  0x1b   :  { %vm2491_vm2 = vcmp.eq.s32.totalorder %v30_v43, 0  ;;  %v54_v43 = vld [vmem:[#allocation4 + $0x50] sm:$0xff] }
  0x21   :  { %1923 = vmatmul.mubr.msk.bf16.gmra.mrb[4].mxu0 %vm89_vm0, %v75_v12 }
  0x22   :  { %154 = vmatprep.mubr.bf16.mxu0 %v2400_v0 }
  0x29   :  { %1924 = vmatmul.mubr.msk.bf16.gmra.mrb[8].mxu0 %vm89_vm0, %v76_v15 }
  0x2a   :  { %164 = vmatprep.mubr.bf16.mxu0 %v2400_v0 }
  0x31   :  { %1925 = vmatmul.mubr.msk.bf16.gmra.mrb[12].mxu0 %vm89_vm0, %v77_v18 }
  0x32   :  { %245 = vmatprep.mubr.bf16.mxu0 %v2400_v0 }
  0xec   :  { %v136_v24 = vpop.f32.mrb[0].mxu0 }
  0xed   :  { %v138_v26 = vpop.f32.mrb[1].mxu0  ;;  %v2539_v4 = vadd.f32 %v136_v24, %v82_v25 }
  0xee   :  { %v140_v28 = vpop.f32.mrb[2].mxu0  ;;  %v2551_v9 = vadd.f32 %v138_v26, %v86_v27  ;;  %v49_v26 = vld [vmem:[#allocation4 + $0x28] sm:$0xff] }
  0xef   :  { %v2471_v29 = vadd.f32 %v140_v28, %v82_v25  ;;  %v142_v30 = vpop.f32.mrb[3].mxu0  ;;  %v48_v28 = vld [vmem:[#allocation4 + $0x20] sm:$0xff] }
  0xf0   :  { %v2473_v31 = vadd.f32 %v142_v30, %v86_v27 }
  0xf4   :  { %v146_v33 = vpop.f32.mrb[4].mxu0 }
  0xf5   :  { %v2478_v35 = vadd.f32 %v146_v33, %v82_v25  ;;  %v148_v36 = vpop.f32.mrb[5].mxu0  ;;  %v50_v33 = vld [vmem:[#allocation4 + $0x30] sm:$0xff] }
  0xf6   :  { %v2480_v37 = vadd.f32 %v148_v36, %v86_v27  ;;  %v150_v38 = vpop.f32.mrb[6].mxu0  ;;  %v55_v36 = vld [vmem:[#allocation4 + $0x58] sm:$0xff] }
  0xf7   :  { %v2482_v39 = vadd.f32 %v150_v38, %v82_v25  ;;  %v152_v40 = vpop.f32.mrb[7].mxu0  ;;  %v2582_v38 = vpack.c.bf16 %v50_v33, %v48_v28 }
  0xf8   :  { %v2485_v42 = vadd.f32 %v152_v40, %v86_v27  ;;  %v2584_v40 = vpack.c.bf16 %v55_v36, %v53_v34 }
  0xfc   :  { %v156_v45 = vpop.f32.mrb[8].mxu0 }
  0xfd   :  { %v2495_v47 = vadd.f32 %v156_v45, %v82_v25  ;;  %v158_v48 = vpop.f32.mrb[9].mxu0  ;;  %v57_v45 = vld [vmem:[#allocation4 + $0x68] sm:$0xff] }
  0xfe   :  { %v2497_v49 = vadd.f32 %v158_v48, %v86_v27  ;;  %v160_v50 = vpop.f32.mrb[10].mxu0  ;;  %v59_v48 = vld [vmem:[#allocation4 + $0x78] sm:$0xff] }
  0xff   :  { %v2499_v51 = vadd.f32 %v160_v50, %v82_v25  ;;  %v162_v52 = vpop.f32.mrb[11].mxu0  ;;  %v368_v53 = vsel %vm2487_vm1, %v2482_v39, %v2495_v47  ;;  %v448_v54 = vsel %vm2487_vm1, %v2495_v47, %v2482_v39  ;;  %v2589_v50 = vpack.c.bf16 %v54_v43, %v52_v41 }
 0x100   :  { %v2509_v55 = vadd.f32 %v162_v52, %v86_v27  ;;  %v369_v56 = vsel %vm2491_vm2, %v2485_v42, %v2497_v49  ;;  %v449_v57 = vsel %vm2491_vm2, %v2497_v49, %v2485_v42  ;;  %v2593_v52 = vpack.c.bf16 %v59_v48, %v57_v45 }
 0x101   :  { %v288_v58 = vsel %vm2487_vm1, %v2478_v35, %v2499_v51  ;;  %v528_v59 = vsel %vm2487_vm1, %v2499_v51, %v2478_v35 }
 0x102   :  { %v289_v60 = vsel %vm2491_vm2, %v2480_v37, %v2509_v55  ;;  %v529_v61 = vsel %vm2491_vm2, %v2509_v55, %v2480_v37 }
 0x104   :  { %v166_v62 = vpop.f32.mrb[12].mxu0 }
 0x105   :  { %v2535_v63 = vadd.f32 %v166_v62, %v82_v25  ;;  %v168_v1 = vpop.f32.mrb[13].mxu0  ;;  %v56_v62 = vld [vmem:[#allocation4 + $0x60] sm:$0xff] }
 0x106   :  { %v2537_v2 = vadd.f32 %v168_v1, %v86_v27  ;;  %v170_v3 = vpop.f32.mrb[14].mxu0  ;;  %v58_v1 = vld [vmem:[#allocation4 + $0x70] sm:$0xff] }
 0x107   :  { %v2541_v5 = vadd.f32 %v170_v3, %v82_v25  ;;  %v172_v6 = vpop.f32.mrb[15].mxu0  ;;  %v204_v7 = vsel %vm2487_vm1, %v2471_v29, %v2535_v63  ;;  %v608_v8 = vsel %vm2487_vm1, %v2535_v63, %v2471_v29  ;;  %v61_v3 = vld [vmem:[#allocation4 + $0x88] sm:$0xff] }
 0x108   :  { %v2553_v10 = vadd.f32 %v172_v6, %v86_v27  ;;  %v205_v11 = vsel %vm2491_vm2, %v2473_v31, %v2537_v2  ;;  %v609_v12 = vsel %vm2491_vm2, %v2537_v2, %v2473_v31  ;;  %v51_v27 = vld [vmem:[#allocation4 + $0x38] sm:$0xff] }
 0x109   :  { %v175_v13 = vsel %vm2487_vm1, %v2539_v4, %v2541_v5  ;;  %v688_v14 = vsel %vm2487_vm1, %v2541_v5, %v2539_v4  ;;  %v2580_v30 = vpack.c.bf16 %v51_v27, %v49_v26  ;;  %v63_v6 = vld [vmem:[#allocation4 + $0x98] sm:$0xff]  ;;  %v795_v5 = vld [vmem:[#allocation4 + $0xc8] sm:$0xff] }
 0x10a   :  { %v1926_v15 = vmul.f32 -1.442695, %v175_v13  ;;  %v176_v16 = vsel %vm2491_vm2, %v2551_v9, %v2553_v10  ;;  %v689_v17 = vsel %vm2491_vm2, %v2553_v10, %v2551_v9  ;;  %v793_v4 = vld [vmem:[#allocation4 + $0xb8] sm:$0xff]  ;;  %v792_v9 = vld [vmem:[#allocation4 + $0xb0] sm:$0xff] }
 0x10b   :  { %213 = vmatprep.subr.bf16.mxu0 %v2580_v30  ;;  %297 = vmatprep.subr.bf16.mxu1 %v2580_v30  ;;  %v809_v10 = vpack.c.bf16 %v795_v5, %v793_v4 }
 0x10c   :  { %2117 = vpow2.f32 %v1926_v15  ;;  %214 = vmatpush1.bf16.msra.mxu0 %v2582_v38  ;;  %298 = vmatpush1.bf16.msra.mxu1 %v2582_v38  ;;  %v2597_v15 = vpack.c.bf16 %v58_v1, %v56_v62 }
 0x10d   :  { %2119 = vtanh.f32 %v176_v16  ;;  %215 = vmatprep.subr.bf16.mxu0 %v2584_v40  ;;  %299 = vmatprep.subr.bf16.mxu1 %v2584_v40 }
 0x110   :  { %216 = vmatpush1.bf16.msra.mxu0 %v2589_v50  ;;  %300 = vmatpush1.bf16.msra.mxu1 %v2589_v50 }
 0x111   :  { %217 = vmatprep.subr.bf16.mxu0 %v2593_v52  ;;  %301 = vmatprep.subr.bf16.mxu1 %v2593_v52 }
 0x114   :  { %218 = vmatpush1.bf16.msra.mxu0 %v2597_v15  ;;  %302 = vmatpush1.bf16.msra.mxu1 %v2597_v15 }
 0x116   :  { %v2118_v18 = vpop.eup %2117 }
 0x117   :  { %v180_v19 = vadd.f32 1.0, %v2118_v18  ;;  %v2120_v22 = vpop.eup %2119  ;;  %v2602_v18 = vpack.c.bf16 %v63_v6, %v61_v3 }
 0x119   :  { %2121 = vrcp.f32 %v180_v19  ;;  %v60_v19 = vld [vmem:[#allocation4 + $0x80] sm:$0xff]  ;;  %219 = vmatprep.subr.bf16.mxu0 %v2602_v18  ;;  %303 = vmatprep.subr.bf16.mxu1 %v2602_v18 }
 0x123   :  { %v2122_v24 = vpop.eup %2121 }
 0x124   :  { %v190_v25 = vmul.f32 %v2122_v24, %v2120_v22  ;;  %v62_v22 = vld [vmem:[#allocation4 + $0x90] sm:$0xff] }
 0x125   :  { %v2606_v24 = vpack.c.bf16 %v62_v22, %v60_v19 }
 0x126   :  { %270 = vrot.lane.b32.xlu1 %v190_v25, %s2401_s0  ;;  %2123 = vtanh.f32 %v190_v25  ;;  %v1927_v25 = vmul.f32 -1.442695, %v176_v16 }
 0x127   :  { %220 = vmatpush1.bf16.msra.mxu0 %v2606_v24  ;;  %304 = vmatpush1.bf16.msra.mxu1 %v2606_v24 }
 0x128   :  { %377 = vmatprep.subr.bf16.mxu0 %v2580_v30  ;;  %457 = vmatprep.subr.bf16.mxu1 %v2580_v30  ;;  %2125 = vpow2.f32 %v1927_v25 }
 0x130   :  { %v2124_v13 = vpop.eup %2123 }
 0x131   :  { %193 = vrot.lane.b32.xlu0 %v2124_v13, %s2401_s0 }
 0x132   :  { %v2126_v26 = vpop.eup %2125 }
 0x133   :  { %v187_v27 = vadd.f32 1.0, %v2126_v26 }
 0x135   :  { %2127 = vrcp.f32 %v187_v27 }
 0x13f   :  { %v2128_v28 = vpop.eup %2127 }
 0x198   :  { %v271_v27 = vpop.permute.xlu1 %270 }
 0x1a3   :  { %v194_v33 = vpop.permute.xlu0 %193 }
 0x1a4   :  { %v2615_v34 = vmul.f32 %v2128_v28, %v194_v33 }
 0x1a6   :  { %v206_v36 = vpack.c.bf16 %v2615_v34, %v2615_v34 }
 0x1a8   :  { %208 = vrot.lane.b32.xlu0 %v206_v36, %s2401_s0 }
 0x21a   :  { %v209_v41 = vpop.permute.xlu0 %208 }
 0x21b   :  { %1928 = vmatmul.mubr.msk.bf16.vlgmr.msra.gmra.mrb[16].mxu0 %vm201_vm3, %v209_v41 }
 0x21c   :  { %378 = vmatpush1.bf16.msra.mxu0 %v2582_v38  ;;  %409 = vmatprep.mubr.bf16.mxu0 %v2400_v0 }
 0x21d   :  { %379 = vmatprep.subr.bf16.mxu0 %v2584_v40 }
 0x220   :  { %380 = vmatpush1.bf16.msra.mxu0 %v2589_v50 }
 0x221   :  { %381 = vmatprep.subr.bf16.mxu0 %v2593_v52 }
 0x224   :  { %382 = vmatpush1.bf16.msra.mxu0 %v2597_v15 }
 0x225   :  { %383 = vmatprep.subr.bf16.mxu0 %v2602_v18 }
 0x228   :  { %384 = vmatpush1.bf16.msra.mxu0 %v2606_v24 }
 0x229   :  { %537 = vmatprep.subr.bf16.mxu0 %v2580_v30 }
 0x2ee   :  { %v247_v16 = vpop.f32.mrb[16].mxu0 }
 0x2ef   :  { %v254_v43 = vadd.f32 %v247_v16, %v204_v7  ;;  %v249_v45 = vpop.f32.mrb[17].mxu0 }
 0x2f0   :  { %v255_v48 = vadd.f32 %v249_v45, %v205_v11  ;;  %v251_v62 = vpop.f32.mrb[18].mxu0 }
 0x2f1   :  { %v1929_v1 = vmul.f32 -1.442695, %v254_v43  ;;  %v252_v3 = vpop.f32.mrb[19].mxu0 }
 0x2f2   :  { %v1930_v7 = vmul.f32 -1.442695, %v255_v48 }
 0x2f3   :  { %2129 = vpow2.f32 %v1929_v1 }
 0x2f4   :  { %2131 = vtanh.f32 %v255_v48 }
 0x2fd   :  { %v2130_v6 = vpop.eup %2129 }
 0x2fe   :  { %v259_v13 = vadd.f32 1.0, %v2130_v6  ;;  %v2132_v19 = vpop.eup %2131 }
 0x300   :  { %2133 = vrcp.f32 %v259_v13 }
 0x301   :  { %2135 = vpow2.f32 %v1930_v7 }
 0x30a   :  { %v2134_v22 = vpop.eup %2133 }
 0x30b   :  { %v274_v25 = vmul.f32 %v2134_v22, %v2132_v19  ;;  %v2136_v26 = vpop.eup %2135  ;;  %v273_v33 = vmul.f32 %v2134_v22, %v271_v27 }
 0x30c   :  { %v266_v28 = vadd.f32 1.0, %v2136_v26 }
 0x30d   :  { %276 = vrot.lane.b32.xlu1 %v274_v25, %s2401_s0 }
 0x30e   :  { %2137 = vrcp.f32 %v266_v28 }
 0x318   :  { %v2138_v41 = vpop.eup %2137 }
 0x37f   :  { %v277_v11 = vpop.permute.xlu1 %276 }
 0x380   :  { %v279_v36 = vadd.f32 %v277_v11, %v273_v33 }
 0x382   :  { %2139 = vtanh.f32 %v279_v36 }
 0x38c   :  { %v2140_v16 = vpop.eup %2139 }
 0x38d   :  { %v2641_v43 = vmul.f32 %v2140_v16, %v2138_v41 }
 0x38f   :  { %v290_v45 = vpack.c.bf16 %v2641_v43, %v2641_v43 }
 0x391   :  { %292 = vrot.lane.b32.xlu0 %v290_v45, %s2401_s0 }
 0x403   :  { %v293_v62 = vpop.permute.xlu0 %292 }
 0x404   :  { %1931 = vmatmul.mubr.msk.bf16.vlgmr.msra.gmra.mrb[0].mxu1 %vm201_vm3, %v293_v62 }
 0x405   :  { %458 = vmatpush1.bf16.msra.mxu1 %v2582_v38  ;;  %489 = vmatprep.mubr.bf16.mxu1 %v2400_v0 }
 0x406   :  { %459 = vmatprep.subr.bf16.mxu1 %v2584_v40 }
 0x409   :  { %460 = vmatpush1.bf16.msra.mxu1 %v2589_v50 }
 0x40a   :  { %461 = vmatprep.subr.bf16.mxu1 %v2593_v52 }
 0x40d   :  { %462 = vmatpush1.bf16.msra.mxu1 %v2597_v15 }
 0x40e   :  { %463 = vmatprep.subr.bf16.mxu1 %v2602_v18 }
 0x411   :  { %464 = vmatpush1.bf16.msra.mxu1 %v2606_v24 }
 0x412   :  { %617 = vmatprep.subr.bf16.mxu1 %v2580_v30 }
 0x4d7   :  { %v331_v48 = vpop.f32.mrb[0].mxu1 }
 0x4d8   :  { %v338_v1 = vadd.f32 %v331_v48, %v288_v58  ;;  %v333_v3 = vpop.f32.mrb[1].mxu1 }
 0x4d9   :  { %v339_v6 = vadd.f32 %v333_v3, %v289_v60  ;;  %v335_v13 = vpop.f32.mrb[2].mxu1 }
 0x4da   :  { %v1932_v19 = vmul.f32 -1.442695, %v338_v1  ;;  %v336_v22 = vpop.f32.mrb[3].mxu1 }
 0x4db   :  { %v1933_v58 = vmul.f32 -1.442695, %v339_v6 }
 0x4dc   :  { %2141 = vpow2.f32 %v1932_v19 }
 0x4dd   :  { %2143 = vtanh.f32 %v339_v6 }
 0x4e6   :  { %v2142_v25 = vpop.eup %2141 }
 0x4e7   :  { %v343_v7 = vadd.f32 1.0, %v2142_v25  ;;  %v2144_v26 = vpop.eup %2143 }
 0x4e9   :  { %2145 = vrcp.f32 %v343_v7 }
 0x4ea   :  { %2147 = vpow2.f32 %v1933_v58 }
 0x4f3   :  { %v2146_v27 = vpop.eup %2145 }
 0x4f4   :  { %v354_v28 = vmul.f32 %v2146_v27, %v2144_v26  ;;  %v2148_v33 = vpop.eup %2147  ;;  %v353_v41 = vmul.f32 %v2146_v27, %v279_v36 }
 0x4f5   :  { %v350_v11 = vadd.f32 1.0, %v2148_v33 }
 0x4f6   :  { %356 = vrot.lane.b32.xlu1 %v354_v28, %s2401_s0 }
 0x4f7   :  { %2149 = vrcp.f32 %v350_v11 }
 0x501   :  { %v2150_v45 = vpop.eup %2149 }
 0x568   :  { %v357_v16 = vpop.permute.xlu1 %356 }
 0x569   :  { %v359_v60 = vadd.f32 %v357_v16, %v353_v41 }
 0x56b   :  { %2151 = vtanh.f32 %v359_v60 }
 0x575   :  { %v2152_v62 = vpop.eup %2151 }
 0x576   :  { %v2667_v48 = vmul.f32 %v2152_v62, %v2150_v45 }
 0x578   :  { %v370_v1 = vpack.c.bf16 %v2667_v48, %v2667_v48 }
 0x57a   :  { %372 = vrot.lane.b32.xlu0 %v370_v1, %s2401_s0 }
 0x5ec   :  { %v373_v3 = vpop.permute.xlu0 %372 }
 0x5ed   :  { %1934 = vmatmul.mubr.msk.bf16.vlgmr.msra.gmra.mrb[20].mxu0 %vm201_vm3, %v373_v3 }
 0x5ee   :  { %538 = vmatpush1.bf16.msra.mxu0 %v2582_v38  ;;  %569 = vmatprep.mubr.bf16.mxu0 %v2400_v0 }
 0x5ef   :  { %539 = vmatprep.subr.bf16.mxu0 %v2584_v40 }
 0x5f2   :  { %540 = vmatpush1.bf16.msra.mxu0 %v2589_v50 }
 0x5f3   :  { %541 = vmatprep.subr.bf16.mxu0 %v2593_v52 }
 0x5f6   :  { %542 = vmatpush1.bf16.msra.mxu0 %v2597_v15 }
 0x5f7   :  { %543 = vmatprep.subr.bf16.mxu0 %v2602_v18 }
 0x5fa   :  { %544 = vmatpush1.bf16.msra.mxu0 %v2606_v24 }
 0x5fb   :  { %697 = vmatprep.subr.bf16.mxu0 %v2580_v30 }
 0x6c0   :  { %v411_v36 = vpop.f32.mrb[20].mxu0 }
 0x6c1   :  { %v418_v6 = vadd.f32 %v411_v36, %v368_v53  ;;  %v413_v13 = vpop.f32.mrb[21].mxu0 }
 0x6c2   :  { %v419_v19 = vadd.f32 %v413_v13, %v369_v56  ;;  %v415_v22 = vpop.f32.mrb[22].mxu0 }
 0x6c3   :  { %v1935_v25 = vmul.f32 -1.442695, %v418_v6  ;;  %v416_v7 = vpop.f32.mrb[23].mxu0 }
 0x6c4   :  { %v1936_v53 = vmul.f32 -1.442695, %v419_v19 }
 0x6c5   :  { %2153 = vpow2.f32 %v1935_v25 }
 0x6c6   :  { %2155 = vtanh.f32 %v419_v19 }
 0x6cf   :  { %v2154_v26 = vpop.eup %2153 }
 0x6d0   :  { %v423_v30 = vadd.f32 1.0, %v2154_v26  ;;  %v2156_v27 = vpop.eup %2155 }
 0x6d2   :  { %2157 = vrcp.f32 %v423_v30 }
 0x6d3   :  { %2159 = vpow2.f32 %v1936_v53 }
 0x6dc   :  { %v2158_v28 = vpop.eup %2157 }
 0x6dd   :  { %v434_v58 = vmul.f32 %v2158_v28, %v2156_v27  ;;  %v2160_v33 = vpop.eup %2159  ;;  %v433_v41 = vmul.f32 %v2158_v28, %v359_v60 }
 0x6de   :  { %v430_v11 = vadd.f32 1.0, %v2160_v33 }
 0x6df   :  { %436 = vrot.lane.b32.xlu1 %v434_v58, %s2401_s0 }
 0x6e0   :  { %2161 = vrcp.f32 %v430_v11 }
 0x6ea   :  { %v2162_v45 = vpop.eup %2161 }
 0x751   :  { %v437_v16 = vpop.permute.xlu1 %436 }
 0x752   :  { %v439_v56 = vadd.f32 %v437_v16, %v433_v41 }
 0x754   :  { %2163 = vtanh.f32 %v439_v56 }
 0x75e   :  { %v2164_v62 = vpop.eup %2163 }
 0x75f   :  { %v2693_v1 = vmul.f32 %v2164_v62, %v2162_v45 }
 0x761   :  { %v450_v3 = vpack.c.bf16 %v2693_v1, %v2693_v1 }
 0x763   :  { %452 = vrot.lane.b32.xlu0 %v450_v3, %s2401_s0 }
 0x7d5   :  { %v453_v36 = vpop.permute.xlu0 %452 }
 0x7d6   :  { %1937 = vmatmul.mubr.msk.bf16.vlgmr.msra.gmra.mrb[4].mxu1 %vm201_vm3, %v453_v36 }
 0x7d7   :  { %618 = vmatpush1.bf16.msra.mxu1 %v2582_v38  ;;  %649 = vmatprep.mubr.bf16.mxu1 %v2400_v0 }
 0x7d8   :  { %619 = vmatprep.subr.bf16.mxu1 %v2584_v40 }
 0x7db   :  { %620 = vmatpush1.bf16.msra.mxu1 %v2589_v50 }
 0x7dc   :  { %621 = vmatprep.subr.bf16.mxu1 %v2593_v52 }
 0x7df   :  { %622 = vmatpush1.bf16.msra.mxu1 %v2597_v15 }
 0x7e0   :  { %623 = vmatprep.subr.bf16.mxu1 %v2602_v18 }
 0x7e3   :  { %624 = vmatpush1.bf16.msra.mxu1 %v2606_v24 }
 0x7e4   :  { %869 = vmatprep.subr.bf16.mxu1 %v809_v10 }
 0x8a9   :  { %v491_v60 = vpop.f32.mrb[4].mxu1 }
 0x8aa   :  { %v498_v6 = vadd.f32 %v491_v60, %v448_v54  ;;  %v493_v13 = vpop.f32.mrb[5].mxu1 }
 0x8ab   :  { %v499_v19 = vadd.f32 %v493_v13, %v449_v57  ;;  %v495_v22 = vpop.f32.mrb[6].mxu1 }
 0x8ac   :  { %v1938_v25 = vmul.f32 -1.442695, %v498_v6  ;;  %v496_v7 = vpop.f32.mrb[7].mxu1 }
 0x8ad   :  { %v1939_v39 = vmul.f32 -1.442695, %v499_v19 }
 0x8ae   :  { %2165 = vpow2.f32 %v1938_v25 }
 0x8af   :  { %2167 = vtanh.f32 %v499_v19 }
 0x8b8   :  { %v2166_v26 = vpop.eup %2165 }
 0x8b9   :  { %v503_v30 = vadd.f32 1.0, %v2166_v26  ;;  %v2168_v27 = vpop.eup %2167 }
 0x8bb   :  { %2169 = vrcp.f32 %v503_v30 }
 0x8bc   :  { %2171 = vpow2.f32 %v1939_v39 }
 0x8c5   :  { %v2170_v28 = vpop.eup %2169 }
 0x8c6   :  { %v514_v58 = vmul.f32 %v2170_v28, %v2168_v27  ;;  %v2172_v47 = vpop.eup %2171  ;;  %v513_v53 = vmul.f32 %v2170_v28, %v439_v56 }
 0x8c7   :  { %v510_v54 = vadd.f32 1.0, %v2172_v47 }
 0x8c8   :  { %516 = vrot.lane.b32.xlu1 %v514_v58, %s2401_s0 }
 0x8c9   :  { %2173 = vrcp.f32 %v510_v54 }
 0x8d3   :  { %v2174_v57 = vpop.eup %2173 }
 0x93a   :  { %v517_v42 = vpop.permute.xlu1 %516 }
 0x93b   :  { %v519_v49 = vadd.f32 %v517_v42, %v513_v53 }
 0x93d   :  { %2175 = vtanh.f32 %v519_v49 }
 0x947   :  { %v2176_v33 = vpop.eup %2175 }
 0x948   :  { %v2718_v11 = vmul.f32 %v2176_v33, %v2174_v57 }
 0x94a   :  { %v530_v41 = vpack.c.bf16 %v2718_v11, %v2718_v11 }
 0x94c   :  { %532 = vrot.lane.b32.xlu0 %v530_v41, %s2401_s0 }
 0x9be   :  { %v533_v16 = vpop.permute.xlu0 %532 }
 0x9bf   :  { %1940 = vmatmul.mubr.msk.bf16.vlgmr.msra.gmra.mrb[24].mxu0 %vm201_vm3, %v533_v16 }
 0x9c0   :  { %698 = vmatpush1.bf16.msra.mxu0 %v2582_v38  ;;  %729 = vmatprep.mubr.bf16.mxu0 %v2400_v0 }
 0x9c1   :  { %699 = vmatprep.subr.bf16.mxu0 %v2584_v40 }
 0x9c4   :  { %700 = vmatpush1.bf16.msra.mxu0 %v2589_v50 }
 0x9c5   :  { %701 = vmatprep.subr.bf16.mxu0 %v2593_v52 }
 0x9c8   :  { %702 = vmatpush1.bf16.msra.mxu0 %v2597_v15 }
 0x9c9   :  { %703 = vmatprep.subr.bf16.mxu0 %v2602_v18 }
 0x9cc   :  { %704 = vmatpush1.bf16.msra.mxu0 %v2606_v24 }
 0xa92   :  { %v571_v56 = vpop.f32.mrb[24].mxu0 }
 0xa93   :  { %v578_v38 = vadd.f32 %v571_v56, %v528_v59  ;;  %v573_v45 = vpop.f32.mrb[25].mxu0 }
 0xa94   :  { %v579_v40 = vadd.f32 %v573_v45, %v529_v61  ;;  %v575_v50 = vpop.f32.mrb[26].mxu0 }
 0xa95   :  { %v1941_v52 = vmul.f32 -1.442695, %v578_v38  ;;  %v576_v15 = vpop.f32.mrb[27].mxu0 }
 0xa96   :  { %v1942_v35 = vmul.f32 -1.442695, %v579_v40 }
 0xa97   :  { %2177 = vpow2.f32 %v1941_v52 }
 0xa98   :  { %2179 = vtanh.f32 %v579_v40 }
 0xaa1   :  { %v2178_v18 = vpop.eup %2177 }
 0xaa2   :  { %v583_v24 = vadd.f32 1.0, %v2178_v18  ;;  %v2180_v62 = vpop.eup %2179 }
 0xaa4   :  { %2181 = vrcp.f32 %v583_v24 }
 0xaa5   :  { %2183 = vpow2.f32 %v1942_v35 }
 0xaae   :  { %v2182_v3 = vpop.eup %2181 }
 0xaaf   :  { %v594_v36 = vmul.f32 %v2182_v3, %v2180_v62  ;;  %v2184_v51 = vpop.eup %2183  ;;  %v593_v60 = vmul.f32 %v2182_v3, %v519_v49 }
 0xab0   :  { %v590_v59 = vadd.f32 1.0, %v2184_v51  ;;  %v799_v51 = vld [vmem:[#allocation4 + $0xe8] sm:$0xff] }
 0xab1   :  { %596 = vrot.lane.b32.xlu1 %v594_v36, %s2401_s0 }
 0xab2   :  { %2185 = vrcp.f32 %v590_v59 }
 0xabc   :  { %v2186_v61 = vpop.eup %2185 }
 0xb23   :  { %v597_v37 = vpop.permute.xlu1 %596 }
 0xb24   :  { %v599_v55 = vadd.f32 %v597_v37, %v593_v60 }
 0xb26   :  { %2187 = vtanh.f32 %v599_v55 }
 0xb30   :  { %v2188_v6 = vpop.eup %2187 }
 0xb31   :  { %v2743_v13 = vmul.f32 %v2188_v6, %v2186_v61 }
 0xb33   :  { %v610_v19 = vpack.c.bf16 %v2743_v13, %v2743_v13 }
 0xb35   :  { %612 = vrot.lane.b32.xlu0 %v610_v19, %s2401_s0 }
 0xba7   :  { %v613_v22 = vpop.permute.xlu0 %612 }
 0xba8   :  { %1943 = vmatmul.mubr.msk.bf16.vlgmr.msra.gmra.mrb[8].mxu1 %vm201_vm3, %v613_v22  ;;  %v796_v22 = vld [vmem:[#allocation4 + $0xd0] sm:$0xff] }
 0xba9   :  { %901 = vmatprep.mubr.bf16.mxu1 %v2400_v0 }
 0xc7b   :  { %v651_v25 = vpop.f32.mrb[8].mxu1 }
 0xc7c   :  { %v658_v7 = vadd.f32 %v651_v25, %v608_v8  ;;  %v653_v26 = vpop.f32.mrb[9].mxu1 }
 0xc7d   :  { %v659_v30 = vadd.f32 %v653_v26, %v609_v12  ;;  %v655_v27 = vpop.f32.mrb[10].mxu1  ;;  %v801_v26 = vld [vmem:[#allocation4 + $0xf8] sm:$0xff] }
 0xc7e   :  { %v1944_v28 = vmul.f32 -1.442695, %v658_v7  ;;  %v656_v58 = vpop.f32.mrb[11].mxu1 }
 0xc7f   :  { %v1945_v29 = vmul.f32 -1.442695, %v659_v30  ;;  %v800_v58 = vld [vmem:[#allocation4 + $0xf0] sm:$0xff] }
 0xc80   :  { %2189 = vpow2.f32 %v1944_v28 }
 0xc81   :  { %2191 = vtanh.f32 %v659_v30  ;;  %v803_v30 = vld [vmem:[#allocation4 + $0x108] sm:$0xff] }
 0xc82   :  { %v813_v28 = vpack.c.bf16 %v803_v30, %v801_v26 }
 0xc8a   :  { %v2190_v39 = vpop.eup %2189 }
 0xc8b   :  { %v663_v47 = vadd.f32 1.0, %v2190_v39  ;;  %v2192_v54 = vpop.eup %2191  ;;  %v802_v39 = vld [vmem:[#allocation4 + $0x100] sm:$0xff] }
 0xc8d   :  { %2193 = vrcp.f32 %v663_v47  ;;  %v812_v47 = vpack.c.bf16 %v802_v39, %v800_v58 }
 0xc8e   :  { %2195 = vpow2.f32 %v1945_v29  ;;  %v804_v29 = vld [vmem:[#allocation4 + $0x110] sm:$0xff] }
 0xc97   :  { %v2194_v53 = vpop.eup %2193 }
 0xc98   :  { %v674_v42 = vmul.f32 %v2194_v53, %v2192_v54  ;;  %v2196_v63 = vpop.eup %2195  ;;  %v673_v49 = vmul.f32 %v2194_v53, %v599_v55  ;;  %v805_v54 = vld [vmem:[#allocation4 + $0x118] sm:$0xff]  ;;  %v807_v53 = vld [vmem:[#allocation4 + $0x128] sm:$0xff] }
 0xc99   :  { %v670_v8 = vadd.f32 1.0, %v2196_v63  ;;  %v806_v63 = vld [vmem:[#allocation4 + $0x120] sm:$0xff] }
 0xc9a   :  { %676 = vrot.lane.b32.xlu1 %v674_v42, %s2401_s0  ;;  %v815_v42 = vpack.c.bf16 %v807_v53, %v805_v54 }
 0xc9b   :  { %2197 = vrcp.f32 %v670_v8  ;;  %v814_v8 = vpack.c.bf16 %v806_v63, %v804_v29 }
 0xca5   :  { %v2198_v12 = vpop.eup %2197 }
 0xd0c   :  { %v677_v31 = vpop.permute.xlu1 %676 }
 0xd0d   :  { %v679_v2 = vadd.f32 %v677_v31, %v673_v49 }
 0xd0f   :  { %2199 = vtanh.f32 %v679_v2 }
 0xd19   :  { %v2200_v57 = vpop.eup %2199 }
 0xd1a   :  { %v681_v33 = vmul.f32 %v2200_v57, %v2198_v12 }
 0xd1c   :  { %v690_v41 = vpack.c.bf16 %v681_v33, %v681_v33 }
 0xd1e   :  { %692 = vrot.lane.b32.xlu0 %v690_v41, %s2401_s0 }
 0xd22   :  { %198 = vrot.lane.b32.xlu0 %v2615_v34, %s2401_s0 }
 0xd26   :  { %683 = vrot.lane.b32.xlu0 %v681_v33, %s2401_s0 }
 0xd2a   :  { %363 = vrot.lane.b32.xlu0 %v2667_v48, %s2401_s0 }
 0xd2e   :  { %523 = vrot.lane.b32.xlu0 %v2718_v11, %s2401_s0 }
 0xd90   :  { %v693_v16 = vpop.permute.xlu0 %692 }
 0xd91   :  { %1946 = vmatmul.mubr.msk.bf16.vlgmr.msra.gmra.mrb[28].mxu0 %vm201_vm3, %v693_v16 }
 0xd92   :  { %1011 = vmatprep.mubr.bf16.mxu0 %v2400_v0 }
 0xd94   :  { %v199_v56 = vpop.permute.xlu0 %198 }
 0xd95   :  { %202 = vst.msk [vmem:[#allocation2] sm:$0xff] %vm201_vm3, %v199_v56  ;;  %203 = vst.msk [vmem:[#allocation3 + $0x38] sm:$0xff] %vm201_vm3, %v199_v56 }
 0xd98   :  { %v684_v38 = vpop.permute.xlu0 %683 }
 0xd99   :  { %686 = vst.msk [vmem:[#allocation2 + $0x30] sm:$0xff] %vm201_vm3, %v684_v38  ;;  %687 = vst.msk [vmem:[#allocation3 + $0x8] sm:$0xff] %vm201_vm3, %v684_v38 }
 0xd9c   :  { %v364_v34 = vpop.permute.xlu0 %363  ;;  %v768_v16 = vld [vmem:[#allocation2] sm:$0xff]  ;;  %v783_v10 = vld [vmem:[#allocation3 + $0x38] sm:$0xff] }
 0xd9d   :  { %366 = vst.msk [vmem:[#allocation2 + $0x10] sm:$0xff] %vm201_vm3, %v364_v34  ;;  %367 = vst.msk [vmem:[#allocation3 + $0x28] sm:$0xff] %vm201_vm3, %v364_v34 }
 0xda0   :  { %v524_v48 = vpop.permute.xlu0 %523 }
 0xda1   :  { %526 = vst.msk [vmem:[#allocation2 + $0x20] sm:$0xff] %vm201_vm3, %v524_v48  ;;  %527 = vst.msk [vmem:[#allocation3 + $0x18] sm:$0xff] %vm201_vm3, %v524_v48 }
 0xe64   :  { %v731_v11 = vpop.f32.mrb[28].mxu0 }
 0xe65   :  { %v738_v45 = vadd.f32 %v731_v11, %v688_v14  ;;  %v733_v40 = vpop.f32.mrb[29].mxu0  ;;  %v794_v14 = vld [vmem:[#allocation4 + $0xc0] sm:$0xff]  ;;  %v770_v11 = vld [vmem:[#allocation2 + $0x10] sm:$0xff] }
 0xe66   :  { %v739_v50 = vadd.f32 %v733_v40, %v689_v17  ;;  %v735_v52 = vpop.f32.mrb[30].mxu0  ;;  %v797_v17 = vld [vmem:[#allocation4 + $0xd8] sm:$0xff]  ;;  %v808_v59 = vpack.c.bf16 %v794_v14, %v792_v9 }
 0xe67   :  { %v1947_v15 = vmul.f32 -1.442695, %v738_v45  ;;  %v736_v18 = vpop.f32.mrb[31].mxu0  ;;  %v811_v60 = vpack.c.bf16 %v799_v51, %v797_v17  ;;  %v779_v40 = vld [vmem:[#allocation3 + $0x18] sm:$0xff]  ;;  %v774_v17 = vld [vmem:[#allocation2 + $0x30] sm:$0xff] }
 0xe68   :  { %870 = vmatpush1.bf16.msra.mxu1 %v808_v59  ;;  %v1948_v37 = vmul.f32 -1.442695, %v739_v50 }
 0xe69   :  { %2201 = vpow2.f32 %v1947_v15  ;;  %871 = vmatprep.subr.bf16.mxu1 %v811_v60  ;;  %v841_v60 = vld [vmem:[#allocation4 + $0x1b0] ss:$8 sm:$0x3] }
 0xe6a   :  { %2203 = vtanh.f32 %v739_v50 }
 0xe73   :  { %v2202_v24 = vpop.eup %2201 }
 0xe74   :  { %v743_v62 = vadd.f32 1.0, %v2202_v24  ;;  %v2204_v3 = vpop.eup %2203 }
 0xe76   :  { %2205 = vrcp.f32 %v743_v62  ;;  %v781_v62 = vld [vmem:[#allocation3 + $0x28] sm:$0xff] }
 0xe77   :  { %2207 = vpow2.f32 %v1948_v37 }
 0xe80   :  { %v2206_v36 = vpop.eup %2205 }
 0xe81   :  { %v754_v35 = vmul.f32 %v2206_v36, %v2204_v3  ;;  %v2208_v55 = vpop.eup %2207  ;;  %v753_v6 = vmul.f32 %v2206_v36, %v679_v2  ;;  %v772_v36 = vld [vmem:[#allocation2 + $0x20] sm:$0xff] }
 0xe82   :  { %v750_v61 = vadd.f32 1.0, %v2208_v55  ;;  %v850_v55 = vrot.slane %v841_v60, %v81_v21 }
 0xe83   :  { %756 = vrot.lane.b32.xlu1 %v754_v35, %s2401_s0 }
 0xe84   :  { %2209 = vrcp.f32 %v750_v61 }
 0xe87   :  { %283 = vrot.lane.b32.xlu1 %v2641_v43, %s2401_s0  ;;  %v798_v43 = vld [vmem:[#allocation4 + $0xe0] sm:$0xff] }
 0xe88   :  { %v810_v7 = vpack.c.bf16 %v798_v43, %v796_v22 }
 0xe8a   :  { %872 = vmatpush1.bf16.msra.mxu1 %v810_v7 }
 0xe8b   :  { %873 = vmatprep.subr.bf16.mxu1 %v813_v28 }
 0xe8e   :  { %874 = vmatpush1.bf16.msra.mxu1 %v812_v47  ;;  %v2210_v49 = vpop.eup %2209 }
 0xe8f   :  { %875 = vmatprep.subr.bf16.mxu1 %v815_v42 }
 0xe92   :  { %876 = vmatpush1.bf16.msra.mxu1 %v814_v8 }
 0xef5   :  { %v757_v19 = vpop.permute.xlu1 %756 }
 0xef6   :  { %v759_v25 = vadd.f32 %v757_v19, %v753_v6  ;;  %v854_v6 = vrot.slane %v841_v60, %v85_v23 }
 0xef8   :  { %2211 = vtanh.f32 %v759_v25 }
 0xef9   :  { %v284_v27 = vpop.permute.xlu1 %283 }
 0xefa   :  { %286 = vst.msk [vmem:[#allocation2 + $0x8] sm:$0xff] %vm201_vm3, %v284_v27  ;;  %287 = vst.msk [vmem:[#allocation3 + $0x30] sm:$0xff] %vm201_vm3, %v284_v27 }
 0xf01   :  { %v769_v33 = vld [vmem:[#allocation2 + $0x8] sm:$0xff]  ;;  %v782_v9 = vld [vmem:[#allocation3 + $0x30] sm:$0xff] }
 0xf02   :  { %v2212_v31 = vpop.eup %2211  ;;  %v790_v51 = vsel %vm33_vm4, %v774_v17, %v782_v9  ;;  %v817_v17 = vld [vmem:[#allocation4 + $0x138] sm:$0xff] }
 0xf03   :  { %v761_v2 = vmul.f32 %v2212_v31, %v2210_v49 }
 0xf05   :  { %763 = vrot.lane.b32.xlu1 %v761_v2, %s2401_s0 }
 0xf09   :  { %443 = vrot.lane.b32.xlu1 %v2693_v1, %s2401_s0  ;;  %v777_v1 = vld [vmem:[#allocation3 + $0x8] sm:$0xff] }
 0xf0a   :  { %v785_v38 = vsel %vm33_vm4, %v769_v33, %v777_v1 }
 0xf0d   :  { %603 = vrot.lane.b32.xlu1 %v2743_v13, %s2401_s0 }
 0xf77   :  { %v764_v12 = vpop.permute.xlu1 %763 }
 0xf78   :  { %766 = vst.msk [vmem:[#allocation2 + $0x38] sm:$0xff] %vm201_vm3, %v764_v12  ;;  %767 = vst.msk [vmem:[#allocation3] sm:$0xff] %vm201_vm3, %v764_v12 }
 0xf7b   :  { %v444_v57 = vpop.permute.xlu1 %443 }
 0xf7c   :  { %446 = vst.msk [vmem:[#allocation2 + $0x18] sm:$0xff] %vm201_vm3, %v444_v57  ;;  %447 = vst.msk [vmem:[#allocation3 + $0x20] sm:$0xff] %vm201_vm3, %v444_v57 }
 0xf7f   :  { %v604_v41 = vpop.permute.xlu1 %603  ;;  %v776_v56 = vld [vmem:[#allocation3] sm:$0xff]  ;;  %v775_v5 = vld [vmem:[#allocation2 + $0x38] sm:$0xff] }
 0xf80   :  { %606 = vst.msk [vmem:[#allocation2 + $0x28] sm:$0xff] %vm201_vm3, %v604_v41  ;;  %607 = vst.msk [vmem:[#allocation3 + $0x10] sm:$0xff] %vm201_vm3, %v604_v41  ;;  %v784_v13 = vsel %vm33_vm4, %v768_v16, %v776_v56  ;;  %v791_v14 = vsel %vm33_vm4, %v775_v5, %v783_v10 }
 0xf81   :  { %v842_v34 = vpack.c.bf16 %v785_v38, %v784_v13  ;;  %v845_v59 = vpack.c.bf16 %v791_v14, %v790_v51  ;;  %v819_v51 = vld [vmem:[#allocation4 + $0x148] sm:$0xff] }
 0xf82   :  { %v2930_v60 = vpack.c.bf16 %v819_v51, %v817_v17 }
 0xf83   :  { %1949 = vmatmul.mubr.msk.bf16.vlgmr.msra.gmra.mrb[12].mxu1 %vm201_vm3, %v842_v34  ;;  %v771_v48 = vld [vmem:[#allocation2 + $0x18] sm:$0xff]  ;;  %v780_v24 = vld [vmem:[#allocation3 + $0x20] sm:$0xff] }
 0xf84   :  { %911 = vmatprep.mubr.bf16.mxu1 %v2400_v0  ;;  %v787_v52 = vsel %vm33_vm4, %v771_v48, %v779_v40  ;;  %v788_v35 = vsel %vm33_vm4, %v772_v36, %v780_v24  ;;  %979 = vmatprep.subr.bf16.mxu0 %v2930_v60 }
 0xf85   :  { %1143 = vmatprep.subr.bf16.mxu1 %v2930_v60 }
 0xf87   :  { %v778_v45 = vld [vmem:[#allocation3 + $0x10] sm:$0xff]  ;;  %v773_v18 = vld [vmem:[#allocation2 + $0x28] sm:$0xff] }
 0xf88   :  { %v786_v50 = vsel %vm33_vm4, %v770_v11, %v778_v45  ;;  %v789_v3 = vsel %vm33_vm4, %v773_v18, %v781_v62 }
 0xf89   :  { %v843_v15 = vpack.c.bf16 %v787_v52, %v786_v50  ;;  %v844_v4 = vpack.c.bf16 %v789_v3, %v788_v35 }
 0xf8b   :  { %1950 = vmatmul.mubr.msk.bf16.gmra.mrb[16].mxu1 %vm201_vm3, %v843_v15 }
 0xf8c   :  { %921 = vmatprep.mubr.bf16.mxu1 %v2400_v0 }
 0xf93   :  { %1951 = vmatmul.mubr.msk.bf16.gmra.mrb[20].mxu1 %vm201_vm3, %v844_v4 }
 0xf94   :  { %931 = vmatprep.mubr.bf16.mxu1 %v2400_v0 }
 0xf9b   :  { %1952 = vmatmul.mubr.msk.bf16.gmra.mrb[24].mxu1 %vm201_vm3, %v845_v59  ;;  %v816_v59 = vld [vmem:[#allocation4 + $0x130] sm:$0xff] }
 0xf9c   :  { %1175 = vmatprep.mubr.bf16.mxu1 %v2400_v0 }
0x1056   :  { %v903_v37 = vpop.f32.mrb[12].mxu1 }
0x1057   :  { %v905_v61 = vpop.f32.mrb[13].mxu1  ;;  %v2890_v34 = vadd.f32 %v903_v37, %v850_v55  ;;  %v818_v37 = vld [vmem:[#allocation4 + $0x140] sm:$0xff] }
0x1058   :  { %v907_v19 = vpop.f32.mrb[14].mxu1  ;;  %v2902_v50 = vadd.f32 %v905_v61, %v854_v6  ;;  %v823_v61 = vld [vmem:[#allocation4 + $0x168] sm:$0xff] }
0x1059   :  { %v2834_v22 = vadd.f32 %v907_v19, %v850_v55  ;;  %v909_v43 = vpop.f32.mrb[15].mxu1 }
0x105a   :  { %v2836_v25 = vadd.f32 %v909_v43, %v854_v6  ;;  %v820_v43 = vld [vmem:[#allocation4 + $0x150] sm:$0xff] }
0x105e   :  { %v913_v7 = vpop.f32.mrb[16].mxu1 }
0x105f   :  { %v2838_v26 = vadd.f32 %v913_v7, %v850_v55  ;;  %v915_v30 = vpop.f32.mrb[17].mxu1  ;;  %v822_v7 = vld [vmem:[#allocation4 + $0x160] sm:$0xff] }
0x1060   :  { %v2840_v27 = vadd.f32 %v915_v30, %v854_v6  ;;  %v917_v28 = vpop.f32.mrb[18].mxu1  ;;  %v825_v30 = vld [vmem:[#allocation4 + $0x178] sm:$0xff] }
0x1061   :  { %v2842_v58 = vadd.f32 %v917_v28, %v850_v55  ;;  %v919_v21 = vpop.f32.mrb[19].mxu1  ;;  %v827_v28 = vld [vmem:[#allocation4 + $0x188] sm:$0xff] }
0x1062   :  { %v2844_v39 = vadd.f32 %v919_v21, %v854_v6  ;;  %v2939_v21 = vpack.c.bf16 %v822_v7, %v820_v43 }
0x1066   :  { %v923_v20 = vpop.f32.mrb[20].mxu1 }
0x1067   :  { %v2846_v23 = vadd.f32 %v923_v20, %v850_v55  ;;  %v925_v47 = vpop.f32.mrb[21].mxu1  ;;  %v2943_v20 = vpack.c.bf16 %v827_v28, %v825_v30 }
0x1068   :  { %v2848_v54 = vadd.f32 %v925_v47, %v854_v6  ;;  %v927_v53 = vpop.f32.mrb[22].mxu1  ;;  %v824_v47 = vld [vmem:[#allocation4 + $0x170] sm:$0xff] }
0x1069   :  { %v2850_v42 = vadd.f32 %v927_v53, %v850_v55  ;;  %v929_v29 = vpop.f32.mrb[23].mxu1  ;;  %v1134_v63 = vsel %vm2487_vm1, %v2842_v58, %v2846_v23  ;;  %v1214_v8 = vsel %vm2487_vm1, %v2846_v23, %v2842_v58  ;;  %v826_v53 = vld [vmem:[#allocation4 + $0x180] sm:$0xff] }
0x106a   :  { %v2860_v49 = vadd.f32 %v929_v29, %v854_v6  ;;  %v1135_v31 = vsel %vm2491_vm2, %v2844_v39, %v2848_v54  ;;  %v1215_v2 = vsel %vm2491_vm2, %v2848_v54, %v2844_v39  ;;  %v829_v29 = vld [vmem:[#allocation4 + $0x198] sm:$0xff] }
0x106b   :  { %v1054_v12 = vsel %vm2487_vm1, %v2838_v26, %v2850_v42  ;;  %v1294_v57 = vsel %vm2487_vm1, %v2850_v42, %v2838_v26 }
0x106c   :  { %v1055_v33 = vsel %vm2491_vm2, %v2840_v27, %v2860_v49  ;;  %v1295_v41 = vsel %vm2491_vm2, %v2860_v49, %v2840_v27 }
0x106e   :  { %v933_v16 = vpop.f32.mrb[24].mxu1 }
0x106f   :  { %v2886_v56 = vadd.f32 %v933_v16, %v850_v55  ;;  %v935_v1 = vpop.f32.mrb[25].mxu1  ;;  %v831_v16 = vld [vmem:[#allocation4 + $0x1a8] sm:$0xff] }
0x1070   :  { %v2888_v13 = vadd.f32 %v935_v1, %v854_v6  ;;  %v937_v38 = vpop.f32.mrb[26].mxu1 }
0x1071   :  { %v2892_v48 = vadd.f32 %v937_v38, %v850_v55  ;;  %v939_v11 = vpop.f32.mrb[27].mxu1  ;;  %v970_v45 = vsel %vm2487_vm1, %v2834_v22, %v2886_v56  ;;  %v1374_v40 = vsel %vm2487_vm1, %v2886_v56, %v2834_v22  ;;  %v821_v55 = vld [vmem:[#allocation4 + $0x158] sm:$0xff]  ;;  %v2947_v38 = vpack.c.bf16 %v826_v53, %v824_v47 }
0x1072   :  { %v2904_v52 = vadd.f32 %v939_v11, %v854_v6  ;;  %v971_v15 = vsel %vm2491_vm2, %v2836_v25, %v2888_v13  ;;  %v1375_v18 = vsel %vm2491_vm2, %v2888_v13, %v2836_v25  ;;  %v2932_v6 = vpack.c.bf16 %v818_v37, %v816_v59 }
0x1073   :  { %v942_v24 = vsel %vm2487_vm1, %v2890_v34, %v2892_v48  ;;  %v1454_v62 = vsel %vm2487_vm1, %v2892_v48, %v2890_v34  ;;  %v2934_v19 = vpack.c.bf16 %v823_v61, %v821_v55  ;;  %v2952_v11 = vpack.c.bf16 %v831_v16, %v829_v29  ;;  %v1559_v34 = vld [vmem:[#allocation4 + $0x1d0] sm:$0xff] }
0x1074   :  { %v1953_v3 = vmul.f32 -1.442695, %v942_v24  ;;  %v943_v36 = vsel %vm2491_vm2, %v2902_v50, %v2904_v52  ;;  %v1455_v35 = vsel %vm2491_vm2, %v2904_v52, %v2902_v50  ;;  %980 = vmatpush1.bf16.msra.mxu0 %v2932_v6  ;;  %1144 = vmatpush1.bf16.msra.mxu1 %v2932_v6  ;;  %v828_v24 = vld [vmem:[#allocation4 + $0x190] sm:$0xff]  ;;  %v1566_v48 = vpack.c.bf16 %v1559_v34, %v1558_v46 }
0x1075   :  { %981 = vmatprep.subr.bf16.mxu0 %v2934_v19  ;;  %1145 = vmatprep.subr.bf16.mxu1 %v2934_v19  ;;  %v1579_v34 = vld [vmem:[#allocation4 + $0x2d0] sm:$0xff] }
0x1076   :  { %2213 = vpow2.f32 %v1953_v3  ;;  %v830_v3 = vld [vmem:[#allocation4 + $0x1a0] sm:$0xff] }
0x1077   :  { %2215 = vtanh.f32 %v943_v36 }
0x1078   :  { %982 = vmatpush1.bf16.msra.mxu0 %v2939_v21  ;;  %1146 = vmatpush1.bf16.msra.mxu1 %v2939_v21 }
0x1079   :  { %983 = vmatprep.subr.bf16.mxu0 %v2943_v20  ;;  %1147 = vmatprep.subr.bf16.mxu1 %v2943_v20 }
0x107c   :  { %984 = vmatpush1.bf16.msra.mxu0 %v2947_v38  ;;  %1148 = vmatpush1.bf16.msra.mxu1 %v2947_v38 }
0x107d   :  { %985 = vmatprep.subr.bf16.mxu0 %v2952_v11  ;;  %1149 = vmatprep.subr.bf16.mxu1 %v2952_v11 }
0x1080   :  { %v2214_v4 = vpop.eup %2213 }
0x1081   :  { %v947_v5 = vadd.f32 1.0, %v2214_v4  ;;  %v2216_v9 = vpop.eup %2215  ;;  %v2956_v4 = vpack.c.bf16 %v830_v3, %v828_v24 }
0x1083   :  { %2217 = vrcp.f32 %v947_v5  ;;  %986 = vmatpush1.bf16.msra.mxu0 %v2956_v4  ;;  %1150 = vmatpush1.bf16.msra.mxu1 %v2956_v4  ;;  %v1954_v5 = vmul.f32 -1.442695, %v943_v36 }
0x1084   :  { %1063 = vmatprep.subr.bf16.mxu0 %v2930_v60  ;;  %1303 = vmatprep.subr.bf16.mxu1 %v2930_v60 }
0x108d   :  { %v2218_v10 = vpop.eup %2217 }
0x108e   :  { %v957_v14 = vmul.f32 %v2218_v10, %v2216_v9 }
0x1090   :  { %2219 = vtanh.f32 %v957_v14 }
0x1091   :  { %2221 = vpow2.f32 %v1954_v5 }
0x109a   :  { %v2220_v1 = vpop.eup %2219 }
0x109b   :  { %960 = vrot.lane.b32.xlu0 %v2220_v1, %s2401_s0  ;;  %v2222_v9 = vpop.eup %2221 }
0x109c   :  { %v954_v10 = vadd.f32 1.0, %v2222_v9 }
0x109e   :  { %2223 = vrcp.f32 %v954_v10 }
0x109f   :  { %1036 = vrot.lane.b32.xlu0 %v957_v14, %s2401_s0 }
0x10a8   :  { %v2224_v17 = vpop.eup %2223 }
0x110d   :  { %v961_v51 = vpop.permute.xlu0 %960 }
0x110e   :  { %v2966_v14 = vmul.f32 %v2224_v17, %v961_v51 }
0x1110   :  { %v972_v59 = vpack.c.bf16 %v2966_v14, %v2966_v14 }
0x1111   :  { %v1037_v3 = vpop.permute.xlu0 %1036 }
0x1112   :  { %974 = vrot.lane.b32.xlu1 %v972_v59, %s2401_s0 }
0x1184   :  { %v975_v37 = vpop.permute.xlu1 %974 }
0x1185   :  { %1955 = vmatmul.mubr.msk.bf16.vlgmr.msra.gmra.mrb[32].mxu0 %vm201_vm3, %v975_v37 }
0x1186   :  { %1064 = vmatpush1.bf16.msra.mxu0 %v2932_v6  ;;  %1095 = vmatprep.mubr.bf16.mxu0 %v2400_v0 }
0x1187   :  { %1065 = vmatprep.subr.bf16.mxu0 %v2934_v19 }
0x118a   :  { %1066 = vmatpush1.bf16.msra.mxu0 %v2939_v21 }
0x118b   :  { %1067 = vmatprep.subr.bf16.mxu0 %v2943_v20 }
0x118e   :  { %1068 = vmatpush1.bf16.msra.mxu0 %v2947_v38 }
0x118f   :  { %1069 = vmatprep.subr.bf16.mxu0 %v2952_v11 }
0x1192   :  { %1070 = vmatpush1.bf16.msra.mxu0 %v2956_v4 }
0x1193   :  { %1223 = vmatprep.subr.bf16.mxu0 %v2930_v60 }
0x1258   :  { %v1013_v36 = vpop.f32.mrb[32].mxu0 }
0x1259   :  { %v1020_v55 = vadd.f32 %v1013_v36, %v970_v45  ;;  %v1015_v61 = vpop.f32.mrb[33].mxu0 }
0x125a   :  { %v1021_v43 = vadd.f32 %v1015_v61, %v971_v15  ;;  %v1017_v7 = vpop.f32.mrb[34].mxu0 }
0x125b   :  { %v1956_v30 = vmul.f32 -1.442695, %v1020_v55  ;;  %v1018_v28 = vpop.f32.mrb[35].mxu0 }
0x125c   :  { %v1957_v45 = vmul.f32 -1.442695, %v1021_v43 }
0x125d   :  { %2225 = vpow2.f32 %v1956_v30 }
0x125e   :  { %2227 = vtanh.f32 %v1021_v43 }
0x1267   :  { %v2226_v47 = vpop.eup %2225 }
0x1268   :  { %v1025_v53 = vadd.f32 1.0, %v2226_v47  ;;  %v2228_v29 = vpop.eup %2227 }
0x126a   :  { %2229 = vrcp.f32 %v1025_v53 }
0x126b   :  { %2231 = vpow2.f32 %v1957_v45 }
0x1274   :  { %v2230_v16 = vpop.eup %2229 }
0x1275   :  { %v1040_v1 = vmul.f32 %v2230_v16, %v2228_v29  ;;  %v2232_v24 = vpop.eup %2231  ;;  %v1039_v9 = vmul.f32 %v2230_v16, %v1037_v3 }
0x1276   :  { %v1032_v5 = vadd.f32 1.0, %v2232_v24 }
0x1277   :  { %1042 = vrot.lane.b32.xlu1 %v1040_v1, %s2401_s0 }
0x1278   :  { %2233 = vrcp.f32 %v1032_v5 }
0x1282   :  { %v2234_v17 = vpop.eup %2233 }
0x12e9   :  { %v1043_v15 = vpop.permute.xlu1 %1042 }
0x12ea   :  { %v1045_v10 = vadd.f32 %v1043_v15, %v1039_v9 }
0x12ec   :  { %2235 = vtanh.f32 %v1045_v10 }
0x12f6   :  { %v2236_v51 = vpop.eup %2235 }
0x12f7   :  { %v2992_v59 = vmul.f32 %v2236_v51, %v2234_v17 }
0x12f9   :  { %v1056_v37 = vpack.c.bf16 %v2992_v59, %v2992_v59 }
0x12fb   :  { %1058 = vrot.lane.b32.xlu0 %v1056_v37, %s2401_s0 }
0x136d   :  { %v1059_v36 = vpop.permute.xlu0 %1058 }
0x136e   :  { %1958 = vmatmul.mubr.msk.bf16.vlgmr.msra.gmra.mrb[36].mxu0 %vm201_vm3, %v1059_v36 }
0x136f   :  { %1224 = vmatpush1.bf16.msra.mxu0 %v2932_v6  ;;  %1255 = vmatprep.mubr.bf16.mxu0 %v2400_v0 }
0x1370   :  { %1225 = vmatprep.subr.bf16.mxu0 %v2934_v19 }
0x1373   :  { %1226 = vmatpush1.bf16.msra.mxu0 %v2939_v21 }
0x1374   :  { %1227 = vmatprep.subr.bf16.mxu0 %v2943_v20 }
0x1377   :  { %1228 = vmatpush1.bf16.msra.mxu0 %v2947_v38 }
0x1378   :  { %1229 = vmatprep.subr.bf16.mxu0 %v2952_v11 }
0x137b   :  { %1230 = vmatpush1.bf16.msra.mxu0 %v2956_v4 }
0x137c   :  { %1383 = vmatprep.subr.bf16.mxu0 %v2930_v60 }
0x1441   :  { %v1097_v55 = vpop.f32.mrb[36].mxu0 }
0x1442   :  { %v1104_v61 = vadd.f32 %v1097_v55, %v1054_v12  ;;  %v1099_v43 = vpop.f32.mrb[37].mxu0 }
0x1443   :  { %v1105_v7 = vadd.f32 %v1099_v43, %v1055_v33  ;;  %v1101_v30 = vpop.f32.mrb[38].mxu0 }
0x1444   :  { %v1959_v28 = vmul.f32 -1.442695, %v1104_v61  ;;  %v1102_v47 = vpop.f32.mrb[39].mxu0 }
0x1445   :  { %v1960_v12 = vmul.f32 -1.442695, %v1105_v7 }
0x1446   :  { %2237 = vpow2.f32 %v1959_v28 }
0x1447   :  { %2239 = vtanh.f32 %v1105_v7 }
0x1450   :  { %v2238_v53 = vpop.eup %2237 }
0x1451   :  { %v1109_v29 = vadd.f32 1.0, %v2238_v53  ;;  %v2240_v16 = vpop.eup %2239 }
0x1453   :  { %2241 = vrcp.f32 %v1109_v29 }
0x1454   :  { %2243 = vpow2.f32 %v1960_v12 }
0x145d   :  { %v2242_v1 = vpop.eup %2241 }
0x145e   :  { %v1120_v45 = vmul.f32 %v2242_v1, %v2240_v16  ;;  %v2244_v24 = vpop.eup %2243  ;;  %v1119_v5 = vmul.f32 %v2242_v1, %v1045_v10 }
0x145f   :  { %v1116_v3 = vadd.f32 1.0, %v2244_v24 }
0x1460   :  { %1122 = vrot.lane.b32.xlu1 %v1120_v45, %s2401_s0 }
0x1461   :  { %2245 = vrcp.f32 %v1116_v3 }
0x146b   :  { %v2246_v15 = vpop.eup %2245 }
0x14d2   :  { %v1123_v9 = vpop.permute.xlu1 %1122 }
0x14d3   :  { %v1125_v33 = vadd.f32 %v1123_v9, %v1119_v5 }
0x14d5   :  { %2247 = vtanh.f32 %v1125_v33 }
0x14df   :  { %v2248_v17 = vpop.eup %2247 }
0x14e0   :  { %v3018_v51 = vmul.f32 %v2248_v17, %v2246_v15 }
0x14e2   :  { %v1136_v37 = vpack.c.bf16 %v3018_v51, %v3018_v51 }
0x14e4   :  { %1138 = vrot.lane.b32.xlu0 %v1136_v37, %s2401_s0 }
0x1556   :  { %v1139_v36 = vpop.permute.xlu0 %1138 }
0x1557   :  { %1961 = vmatmul.mubr.msk.bf16.vlgmr.msra.gmra.mrb[28].mxu1 %vm201_vm3, %v1139_v36 }
0x1558   :  { %1304 = vmatpush1.bf16.msra.mxu1 %v2932_v6  ;;  %1335 = vmatprep.mubr.bf16.mxu1 %v2400_v0 }
0x1559   :  { %1305 = vmatprep.subr.bf16.mxu1 %v2934_v19 }
0x155c   :  { %1306 = vmatpush1.bf16.msra.mxu1 %v2939_v21 }
0x155d   :  { %1307 = vmatprep.subr.bf16.mxu1 %v2943_v20 }
0x1560   :  { %1308 = vmatpush1.bf16.msra.mxu1 %v2947_v38 }
0x1561   :  { %1309 = vmatprep.subr.bf16.mxu1 %v2952_v11 }
0x1564   :  { %1310 = vmatpush1.bf16.msra.mxu1 %v2956_v4 }
0x1565   :  { %1463 = vmatprep.subr.bf16.mxu1 %v2930_v60 }
0x162a   :  { %v1177_v10 = vpop.f32.mrb[28].mxu1 }
0x162b   :  { %v1184_v55 = vadd.f32 %v1177_v10, %v1134_v63  ;;  %v1179_v61 = vpop.f32.mrb[29].mxu1 }
0x162c   :  { %v1185_v43 = vadd.f32 %v1179_v61, %v1135_v31  ;;  %v1181_v7 = vpop.f32.mrb[30].mxu1 }
0x162d   :  { %v1962_v30 = vmul.f32 -1.442695, %v1184_v55  ;;  %v1182_v28 = vpop.f32.mrb[31].mxu1 }
0x162e   :  { %v1963_v63 = vmul.f32 -1.442695, %v1185_v43 }
0x162f   :  { %2249 = vpow2.f32 %v1962_v30 }
0x1630   :  { %2251 = vtanh.f32 %v1185_v43 }
0x1639   :  { %v2250_v47 = vpop.eup %2249 }
0x163a   :  { %v1189_v60 = vadd.f32 1.0, %v2250_v47  ;;  %v2252_v53 = vpop.eup %2251 }
0x163c   :  { %2253 = vrcp.f32 %v1189_v60 }
0x163d   :  { %2255 = vpow2.f32 %v1963_v63 }
0x1646   :  { %v2254_v29 = vpop.eup %2253 }
0x1647   :  { %v1200_v16 = vmul.f32 %v2254_v29, %v2252_v53  ;;  %v2256_v1 = vpop.eup %2255  ;;  %v1199_v12 = vmul.f32 %v2254_v29, %v1125_v33 }
0x1648   :  { %v1196_v45 = vadd.f32 1.0, %v2256_v1 }
0x1649   :  { %1202 = vrot.lane.b32.xlu1 %v1200_v16, %s2401_s0 }
0x164a   :  { %2257 = vrcp.f32 %v1196_v45 }
0x1654   :  { %v2258_v3 = vpop.eup %2257 }
0x16bb   :  { %v1203_v24 = vpop.permute.xlu1 %1202 }
0x16bc   :  { %v1205_v31 = vadd.f32 %v1203_v24, %v1199_v12 }
0x16be   :  { %2259 = vtanh.f32 %v1205_v31 }
0x16c8   :  { %v2260_v5 = vpop.eup %2259 }
0x16c9   :  { %v3044_v9 = vmul.f32 %v2260_v5, %v2258_v3 }
0x16cb   :  { %v1216_v15 = vpack.c.bf16 %v3044_v9, %v3044_v9 }
0x16cd   :  { %1218 = vrot.lane.b32.xlu0 %v1216_v15, %s2401_s0 }
0x173f   :  { %v1219_v17 = vpop.permute.xlu0 %1218 }
0x1740   :  { %1964 = vmatmul.mubr.msk.bf16.vlgmr.msra.gmra.mrb[40].mxu0 %vm201_vm3, %v1219_v17 }
0x1741   :  { %1384 = vmatpush1.bf16.msra.mxu0 %v2932_v6  ;;  %1415 = vmatprep.mubr.bf16.mxu0 %v2400_v0 }
0x1742   :  { %1385 = vmatprep.subr.bf16.mxu0 %v2934_v19 }
0x1745   :  { %1386 = vmatpush1.bf16.msra.mxu0 %v2939_v21 }
0x1746   :  { %1387 = vmatprep.subr.bf16.mxu0 %v2943_v20 }
0x1749   :  { %1388 = vmatpush1.bf16.msra.mxu0 %v2947_v38 }
0x174a   :  { %1389 = vmatprep.subr.bf16.mxu0 %v2952_v11 }
0x174d   :  { %1390 = vmatpush1.bf16.msra.mxu0 %v2956_v4 }
0x174e   :  { %2020 = vmatprep.subr.bf16.mxu0 %v1566_v48 }
0x1813   :  { %v1257_v33 = vpop.f32.mrb[40].mxu0 }
0x1814   :  { %v1264_v37 = vadd.f32 %v1257_v33, %v1214_v8  ;;  %v1259_v36 = vpop.f32.mrb[41].mxu0 }
0x1815   :  { %v1265_v10 = vadd.f32 %v1259_v36, %v1215_v2  ;;  %v1261_v55 = vpop.f32.mrb[42].mxu0 }
0x1816   :  { %v1965_v61 = vmul.f32 -1.442695, %v1264_v37  ;;  %v1262_v43 = vpop.f32.mrb[43].mxu0 }
0x1817   :  { %v1966_v58 = vmul.f32 -1.442695, %v1265_v10 }
0x1818   :  { %2261 = vpow2.f32 %v1965_v61 }
0x1819   :  { %2263 = vtanh.f32 %v1265_v10 }
0x1822   :  { %v2262_v7 = vpop.eup %2261 }
0x1823   :  { %v1269_v30 = vadd.f32 1.0, %v2262_v7  ;;  %v2264_v28 = vpop.eup %2263 }
0x1825   :  { %2265 = vrcp.f32 %v1269_v30 }
0x1826   :  { %2267 = vpow2.f32 %v1966_v58 }
0x182f   :  { %v2266_v47 = vpop.eup %2265 }
0x1830   :  { %v1280_v60 = vmul.f32 %v2266_v47, %v2264_v28  ;;  %v2268_v23 = vpop.eup %2267  ;;  %v1279_v53 = vmul.f32 %v2266_v47, %v1205_v31 }
0x1831   :  { %v1276_v8 = vadd.f32 1.0, %v2268_v23 }
0x1832   :  { %1282 = vrot.lane.b32.xlu1 %v1280_v60, %s2401_s0 }
0x1833   :  { %2269 = vrcp.f32 %v1276_v8 }
0x183d   :  { %v2270_v2 = vpop.eup %2269 }
0x18a4   :  { %v1283_v39 = vpop.permute.xlu1 %1282 }
0x18a5   :  { %v1285_v54 = vadd.f32 %v1283_v39, %v1279_v53 }
0x18a7   :  { %2271 = vtanh.f32 %v1285_v54 }
0x18b1   :  { %v2272_v29 = vpop.eup %2271 }
0x18b2   :  { %v3069_v16 = vmul.f32 %v2272_v29, %v2270_v2 }
0x18b4   :  { %v1296_v63 = vpack.c.bf16 %v3069_v16, %v3069_v16 }
0x18b6   :  { %1298 = vrot.lane.b32.xlu0 %v1296_v63, %s2401_s0 }
0x1928   :  { %v1299_v1 = vpop.permute.xlu0 %1298 }
0x1929   :  { %1967 = vmatmul.mubr.msk.bf16.vlgmr.msra.gmra.mrb[32].mxu1 %vm201_vm3, %v1299_v1 }
0x192a   :  { %1464 = vmatpush1.bf16.msra.mxu1 %v2932_v6  ;;  %1495 = vmatprep.mubr.bf16.mxu1 %v2400_v0 }
0x192b   :  { %1465 = vmatprep.subr.bf16.mxu1 %v2934_v19 }
0x192e   :  { %1466 = vmatpush1.bf16.msra.mxu1 %v2939_v21 }
0x192f   :  { %1467 = vmatprep.subr.bf16.mxu1 %v2943_v20 }
0x1932   :  { %1468 = vmatpush1.bf16.msra.mxu1 %v2947_v38 }
0x1933   :  { %1469 = vmatprep.subr.bf16.mxu1 %v2952_v11 }
0x1936   :  { %1470 = vmatpush1.bf16.msra.mxu1 %v2956_v4 }
0x19fc   :  { %v1337_v45 = vpop.f32.mrb[32].mxu1 }
0x19fd   :  { %v1344_v6 = vadd.f32 %v1337_v45, %v1294_v57  ;;  %v1339_v0 = vpop.f32.mrb[33].mxu1 }
0x19fe   :  { %v1345_v19 = vadd.f32 %v1339_v0, %v1295_v41  ;;  %v1341_v21 = vpop.f32.mrb[34].mxu1 }
0x19ff   :  { %v1968_v20 = vmul.f32 -1.442695, %v1344_v6  ;;  %v1342_v38 = vpop.f32.mrb[35].mxu1 }
0x1a00   :  { %v1969_v26 = vmul.f32 -1.442695, %v1345_v19 }
0x1a01   :  { %2273 = vpow2.f32 %v1968_v20 }
0x1a02   :  { %2275 = vtanh.f32 %v1345_v19 }
0x1a0b   :  { %v2274_v11 = vpop.eup %2273 }
0x1a0c   :  { %v1349_v4 = vadd.f32 1.0, %v2274_v11  ;;  %v2276_v12 = vpop.eup %2275 }
0x1a0e   :  { %2277 = vrcp.f32 %v1349_v4 }
0x1a0f   :  { %2279 = vpow2.f32 %v1969_v26 }
0x1a18   :  { %v2278_v24 = vpop.eup %2277 }
0x1a19   :  { %v1360_v31 = vmul.f32 %v2278_v24, %v2276_v12  ;;  %v2280_v42 = vpop.eup %2279  ;;  %v1359_v3 = vmul.f32 %v2278_v24, %v1285_v54  ;;  %v1560_v24 = vld [vmem:[#allocation4 + $0x1e0] sm:$0xff] }
0x1a1a   :  { %v1356_v57 = vadd.f32 1.0, %v2280_v42  ;;  %v1563_v42 = vld [vmem:[#allocation4 + $0x210] sm:$0xff] }
0x1a1b   :  { %1362 = vrot.lane.b32.xlu1 %v1360_v31, %s2401_s0  ;;  %v1561_v31 = vld [vmem:[#allocation4 + $0x1f0] sm:$0xff] }
0x1a1c   :  { %2281 = vrcp.f32 %v1356_v57  ;;  %v1567_v26 = vpack.c.bf16 %v1561_v31, %v1560_v24  ;;  %v1564_v57 = vld [vmem:[#allocation4 + $0x220] sm:$0xff]  ;;  %v1585_v31 = vld [vmem:[#allocation4 + $0x330] sm:$0xff] }
0x1a26   :  { %v2282_v41 = vpop.eup %2281 }
0x1a8d   :  { %v1363_v27 = vpop.permute.xlu1 %1362 }
0x1a8e   :  { %v1365_v49 = vadd.f32 %v1363_v27, %v1359_v3 }
0x1a90   :  { %2283 = vtanh.f32 %v1365_v49 }
0x1a9a   :  { %v2284_v5 = vpop.eup %2283 }
0x1a9b   :  { %v3094_v15 = vmul.f32 %v2284_v5, %v2282_v41 }
0x1a9d   :  { %v1376_v17 = vpack.c.bf16 %v3094_v15, %v3094_v15 }
0x1a9f   :  { %1378 = vrot.lane.b32.xlu0 %v1376_v17, %s2401_s0 }
0x1b11   :  { %v1379_v33 = vpop.permute.xlu0 %1378 }
0x1b12   :  { %1970 = vmatmul.mubr.msk.bf16.vlgmr.msra.gmra.mrb[44].mxu0 %vm201_vm3, %v1379_v33 }
0x1b13   :  { %2021 = vmatpush3.bf16.msra.mxu0 %v1566_v48  ;;  %v1580_v48 = vld [vmem:[#allocation4 + $0x2e0] sm:$0xff] }
0x1b14   :  { %2022 = vmatprep.subr.bf16.mxu0 %v1567_v26 }
0x1b17   :  { %2023 = vmatpush3.bf16.msra.mxu0 %v1567_v26 }
0x1be5   :  { %v1417_v37 = vpop.f32.mrb[44].mxu0 }
0x1be6   :  { %v1424_v36 = vadd.f32 %v1417_v37, %v1374_v40  ;;  %v1419_v10 = vpop.f32.mrb[45].mxu0 }
0x1be7   :  { %v1425_v55 = vadd.f32 %v1419_v10, %v1375_v18  ;;  %v1421_v61 = vpop.f32.mrb[46].mxu0 }
0x1be8   :  { %v1971_v43 = vmul.f32 -1.442695, %v1424_v36  ;;  %v1422_v7 = vpop.f32.mrb[47].mxu0 }
0x1be9   :  { %v1972_v22 = vmul.f32 -1.442695, %v1425_v55 }
0x1bea   :  { %2285 = vpow2.f32 %v1971_v43 }
0x1beb   :  { %2287 = vtanh.f32 %v1425_v55 }
0x1bf4   :  { %v2286_v30 = vpop.eup %2285 }
0x1bf5   :  { %v1429_v28 = vadd.f32 1.0, %v2286_v30  ;;  %v2288_v47 = vpop.eup %2287 }
0x1bf7   :  { %2289 = vrcp.f32 %v1429_v28 }
0x1bf8   :  { %2291 = vpow2.f32 %v1972_v22 }
0x1c01   :  { %v2290_v60 = vpop.eup %2289 }
0x1c02   :  { %v1440_v58 = vmul.f32 %v2290_v60, %v2288_v47  ;;  %v2292_v56 = vpop.eup %2291  ;;  %v1439_v23 = vmul.f32 %v2290_v60, %v1365_v49  ;;  %v1565_v49 = vld [vmem:[#allocation4 + $0x230] sm:$0xff] }
0x1c03   :  { %v1436_v40 = vadd.f32 1.0, %v2292_v56  ;;  %v1569_v41 = vpack.c.bf16 %v1565_v49, %v1564_v57 }
0x1c04   :  { %1442 = vrot.lane.b32.xlu1 %v1440_v58, %s2401_s0 }
0x1c05   :  { %2293 = vrcp.f32 %v1436_v40 }
0x1c0f   :  { %v2294_v18 = vpop.eup %2293 }
0x1c76   :  { %v1443_v25 = vpop.permute.xlu1 %1442 }
0x1c77   :  { %v1445_v13 = vadd.f32 %v1443_v25, %v1439_v23 }
0x1c79   :  { %2295 = vtanh.f32 %v1445_v13 }
0x1c83   :  { %v2296_v8 = vpop.eup %2295 }
0x1c84   :  { %v1447_v53 = vmul.f32 %v2296_v8, %v2294_v18 }
0x1c86   :  { %v1456_v39 = vpack.c.bf16 %v1447_v53, %v1447_v53 }
0x1c88   :  { %1458 = vrot.lane.b32.xlu0 %v1456_v39, %s2401_s0 }
0x1c8c   :  { %965 = vrot.lane.b32.xlu0 %v2966_v14, %s2401_s0 }
0x1c90   :  { %1449 = vrot.lane.b32.xlu0 %v1447_v53, %s2401_s0 }
0x1c94   :  { %1129 = vrot.lane.b32.xlu0 %v3018_v51, %s2401_s0 }
0x1c98   :  { %1289 = vrot.lane.b32.xlu0 %v3069_v16, %s2401_s0 }
0x1cfa   :  { %v1459_v54 = vpop.permute.xlu0 %1458 }
0x1cfb   :  { %1973 = vmatmul.mubr.msk.bf16.vlgmr.msra.gmra.mrb[36].mxu1 %vm201_vm3, %v1459_v54 }
0x1cfe   :  { %v966_v2 = vpop.permute.xlu0 %965 }
0x1cff   :  { %968 = vst.msk [vmem:[#allocation2] sm:$0xff] %vm201_vm3, %v966_v2  ;;  %969 = vst.msk [vmem:[#allocation3 + $0x38] sm:$0xff] %vm201_vm3, %v966_v2 }
0x1d02   :  { %v1450_v29 = vpop.permute.xlu0 %1449 }
0x1d03   :  { %1452 = vst.msk [vmem:[#allocation2 + $0x30] sm:$0xff] %vm201_vm3, %v1450_v29  ;;  %1453 = vst.msk [vmem:[#allocation3 + $0x8] sm:$0xff] %vm201_vm3, %v1450_v29 }
0x1d06   :  { %v1130_v14 = vpop.permute.xlu0 %1129  ;;  %v1534_v55 = vld [vmem:[#allocation2] sm:$0xff]  ;;  %v1549_v29 = vld [vmem:[#allocation3 + $0x38] sm:$0xff] }
0x1d07   :  { %1132 = vst.msk [vmem:[#allocation2 + $0x10] sm:$0xff] %vm201_vm3, %v1130_v14  ;;  %1133 = vst.msk [vmem:[#allocation3 + $0x28] sm:$0xff] %vm201_vm3, %v1130_v14 }
0x1d0a   :  { %v1290_v51 = vpop.permute.xlu0 %1289  ;;  %v1543_v43 = vld [vmem:[#allocation3 + $0x8] sm:$0xff] }
0x1d0b   :  { %1292 = vst.msk [vmem:[#allocation2 + $0x20] sm:$0xff] %vm201_vm3, %v1290_v51  ;;  %1293 = vst.msk [vmem:[#allocation3 + $0x18] sm:$0xff] %vm201_vm3, %v1290_v51  ;;  %v1540_v51 = vld [vmem:[#allocation2 + $0x30] sm:$0xff] }
0x1d0e   :  { %v1536_v60 = vld [vmem:[#allocation2 + $0x10] sm:$0xff]  ;;  %v1547_v22 = vld [vmem:[#allocation3 + $0x28] sm:$0xff] }
0x1d12   :  { %v1545_v58 = vld [vmem:[#allocation3 + $0x18] sm:$0xff]  ;;  %v1538_v40 = vld [vmem:[#allocation2 + $0x20] sm:$0xff] }
0x1dce   :  { %v1497_v16 = vpop.f32.mrb[36].mxu1 }
0x1dcf   :  { %v1504_v63 = vadd.f32 %v1497_v16, %v1454_v62  ;;  %v1499_v1 = vpop.f32.mrb[37].mxu1 }
0x1dd0   :  { %v1505_v45 = vadd.f32 %v1499_v1, %v1455_v35  ;;  %v1501_v6 = vpop.f32.mrb[38].mxu1  ;;  %v1571_v1 = vld [vmem:[#allocation4 + $0x250] sm:$0xff] }
0x1dd1   :  { %v1974_v0 = vmul.f32 -1.442695, %v1504_v63  ;;  %v1502_v19 = vpop.f32.mrb[39].mxu1 }
0x1dd2   :  { %v1975_v50 = vmul.f32 -1.442695, %v1505_v45  ;;  %v1574_v19 = vld [vmem:[#allocation4 + $0x280] sm:$0xff] }
0x1dd3   :  { %2297 = vpow2.f32 %v1974_v0  ;;  %v1573_v0 = vld [vmem:[#allocation4 + $0x270] sm:$0xff] }
0x1dd4   :  { %2299 = vtanh.f32 %v1505_v45  ;;  %v1572_v45 = vld [vmem:[#allocation4 + $0x260] sm:$0xff] }
0x1dd5   :  { %v2080_v6 = vpack.c.bf16 %v1572_v45, %v1571_v1 }
0x1dd7   :  { %2081 = vmatprep.subr.bf16.mxu1 %v2080_v6 }
0x1dd8   :  { %2083 = vmatpush3.bf16.msra.mxu1 %v2080_v6 }
0x1ddd   :  { %v2298_v21 = vpop.eup %2297 }
0x1dde   :  { %v1509_v20 = vadd.f32 1.0, %v2298_v21  ;;  %v2300_v44 = vpop.eup %2299  ;;  %v2084_v21 = vpack.c.bf16 %v1574_v19, %v1573_v0 }
0x1de0   :  { %2301 = vrcp.f32 %v1509_v20  ;;  %2085 = vmatprep.subr.bf16.mxu1 %v2084_v21  ;;  %v1575_v20 = vld [vmem:[#allocation4 + $0x290] sm:$0xff] }
0x1de1   :  { %2303 = vpow2.f32 %v1975_v50  ;;  %2087 = vmatpush3.bf16.msra.mxu1 %v2084_v21  ;;  %v2096_v50 = vpack.c.bf16 %v1580_v48, %v1579_v34 }
0x1dea   :  { %v2302_v38 = vpop.eup %2301 }
0x1deb   :  { %v1520_v11 = vmul.f32 %v2302_v38, %v2300_v44  ;;  %v2304_v52 = vpop.eup %2303  ;;  %v1519_v35 = vmul.f32 %v2302_v38, %v1445_v13  ;;  %v1576_v44 = vld [vmem:[#allocation4 + $0x2a0] sm:$0xff] }
0x1dec   :  { %v1516_v62 = vadd.f32 1.0, %v2304_v52  ;;  %v2088_v38 = vpack.c.bf16 %v1576_v44, %v1575_v20  ;;  %v1581_v52 = vld [vmem:[#allocation4 + $0x2f0] sm:$0xff] }
0x1ded   :  { %1522 = vrot.lane.b32.xlu1 %v1520_v11, %s2401_s0  ;;  %v1578_v11 = vld [vmem:[#allocation4 + $0x2c0] sm:$0xff] }
0x1dee   :  { %2305 = vrcp.f32 %v1516_v62  ;;  %2089 = vmatprep.subr.bf16.mxu1 %v2088_v38  ;;  %v2092_v46 = vpack.c.bf16 %v1578_v11, %v1577_v32  ;;  %v1582_v62 = vld [vmem:[#allocation4 + $0x300] sm:$0xff] }
0x1def   :  { %2091 = vmatpush3.bf16.msra.mxu1 %v2088_v38 }
0x1df0   :  { %2093 = vmatprep.subr.bf16.mxu1 %v2092_v46 }
0x1df1   :  { %1049 = vrot.lane.b32.xlu1 %v2992_v59, %s2401_s0 }
0x1df3   :  { %2095 = vmatpush3.bf16.msra.mxu1 %v2092_v46 }
0x1df4   :  { %2097 = vmatprep.subr.bf16.mxu1 %v2096_v50 }
0x1df5   :  { %1209 = vrot.lane.b32.xlu1 %v3044_v9, %s2401_s0  ;;  %v1562_v9 = vld [vmem:[#allocation4 + $0x200] sm:$0xff] }
0x1df6   :  { %v1568_v27 = vpack.c.bf16 %v1563_v42, %v1562_v9  ;;  %v1570_v9 = vld [vmem:[#allocation4 + $0x240] ss:$0 sm:$0xff] }
0x1df7   :  { %2099 = vmatpush3.bf16.msra.mxu1 %v2096_v50 }
0x1df8   :  { %2024 = vmatprep.subr.bf16.mxu0 %v1568_v27  ;;  %v2306_v5 = vpop.eup %2305 }
0x1df9   :  { %2025 = vmatpush3.bf16.msra.mxu0 %v1568_v27 }
0x1dfa   :  { %2026 = vmatprep.subr.bf16.mxu0 %v1569_v41 }
0x1dfd   :  { %2027 = vmatpush3.bf16.msra.mxu0 %v1569_v41 }
0x1e5f   :  { %v1523_v4 = vpop.permute.xlu1 %1522 }
0x1e60   :  { %v1525_v12 = vadd.f32 %v1523_v4, %v1519_v35  ;;  %v2100_v35 = vpack.c.bf16 %v1582_v62, %v1581_v52  ;;  %v1583_v4 = vld [vmem:[#allocation4 + $0x310] sm:$0xff] }
0x1e62   :  { %2307 = vtanh.f32 %v1525_v12  ;;  %2101 = vmatprep.subr.bf16.mxu1 %v2100_v35  ;;  %v1584_v12 = vld [vmem:[#allocation4 + $0x320] sm:$0xff] }
0x1e63   :  { %v1050_v59 = vpop.permute.xlu1 %1049  ;;  %2103 = vmatpush3.bf16.msra.mxu1 %v2100_v35  ;;  %v2104_v24 = vpack.c.bf16 %v1584_v12, %v1583_v4 }
0x1e64   :  { %1052 = vst.msk [vmem:[#allocation2 + $0x8] sm:$0xff] %vm201_vm3, %v1050_v59  ;;  %1053 = vst.msk [vmem:[#allocation3 + $0x30] sm:$0xff] %vm201_vm3, %v1050_v59  ;;  %v1586_v59 = vld [vmem:[#allocation4 + $0x340] sm:$0xff] }
0x1e65   :  { %2105 = vmatprep.subr.bf16.mxu1 %v2104_v24  ;;  %v2108_v26 = vpack.c.bf16 %v1586_v59, %v1585_v31 }
0x1e67   :  { %v1210_v3 = vpop.permute.xlu1 %1209  ;;  %2107 = vmatpush3.bf16.msra.mxu1 %v2104_v24 }
0x1e68   :  { %1212 = vst.msk [vmem:[#allocation2 + $0x18] sm:$0xff] %vm201_vm3, %v1210_v3  ;;  %1213 = vst.msk [vmem:[#allocation3 + $0x20] sm:$0xff] %vm201_vm3, %v1210_v3  ;;  %2109 = vmatprep.subr.bf16.mxu1 %v2108_v26 }
0x1e6b   :  { %v1535_v10 = vld [vmem:[#allocation2 + $0x8] sm:$0xff]  ;;  %v1548_v2 = vld [vmem:[#allocation3 + $0x30] sm:$0xff]  ;;  %2111 = vmatpush3.bf16.msra.mxu1 %v2108_v26 }
0x1e6c   :  { %v2308_v17 = vpop.eup %2307  ;;  %v1556_v16 = vsel %vm33_vm4, %v1540_v51, %v1548_v2 }
0x1e6d   :  { %v1527_v33 = vmul.f32 %v2308_v17, %v2306_v5 }
0x1e6f   :  { %1529 = vrot.lane.b32.xlu1 %v1527_v33, %s2401_s0  ;;  %v1537_v28 = vld [vmem:[#allocation2 + $0x18] sm:$0xff]  ;;  %v1546_v47 = vld [vmem:[#allocation3 + $0x20] sm:$0xff] }
0x1e70   :  { %v1553_v13 = vsel %vm33_vm4, %v1537_v28, %v1545_v58  ;;  %v1554_v18 = vsel %vm33_vm4, %v1538_v40, %v1546_v47 }
0x1e73   :  { %1369 = vrot.lane.b32.xlu1 %v3094_v15, %s2401_s0  ;;  %v1551_v15 = vsel %vm33_vm4, %v1535_v10, %v1543_v43 }
0x1ee1   :  { %v1530_v37 = vpop.permute.xlu1 %1529 }
0x1ee2   :  { %1532 = vst.msk [vmem:[#allocation2 + $0x38] sm:$0xff] %vm201_vm3, %v1530_v37  ;;  %1533 = vst.msk [vmem:[#allocation3] sm:$0xff] %vm201_vm3, %v1530_v37 }
0x1ee5   :  { %v1370_v36 = vpop.permute.xlu1 %1369 }
0x1ee6   :  { %1372 = vst.msk [vmem:[#allocation2 + $0x28] sm:$0xff] %vm201_vm3, %v1370_v36  ;;  %1373 = vst.msk [vmem:[#allocation3 + $0x10] sm:$0xff] %vm201_vm3, %v1370_v36 }
0x1ee9   :  { %v1542_v61 = vld [vmem:[#allocation3] sm:$0xff]  ;;  %v1541_v54 = vld [vmem:[#allocation2 + $0x38] sm:$0xff] }
0x1eea   :  { %v1550_v7 = vsel %vm33_vm4, %v1534_v55, %v1542_v61  ;;  %v1557_v14 = vsel %vm33_vm4, %v1541_v54, %v1549_v29 }
0x1eeb   :  { %v1587_v30 = vpack.c.bf16 %v1551_v15, %v1550_v7  ;;  %v1590_v63 = vpack.c.bf16 %v1557_v14, %v1556_v16 }
0x1eed   :  { %2028 = vmatprep.mubr.msk.bf16.mxu0 %vm201_vm3, %v1587_v30  ;;  %v1544_v56 = vld [vmem:[#allocation3 + $0x10] sm:$0xff]  ;;  %v1539_v23 = vld [vmem:[#allocation2 + $0x28] sm:$0xff] }
0x1eee   :  { %v1552_v25 = vsel %vm33_vm4, %v1536_v60, %v1544_v56  ;;  %v1555_v8 = vsel %vm33_vm4, %v1539_v23, %v1547_v22 }
0x1eef   :  { %v1588_v53 = vpack.c.bf16 %v1553_v13, %v1552_v25  ;;  %v1589_v39 = vpack.c.bf16 %v1555_v8, %v1554_v18 }
0x1ef1   :  { %2029 = vmatmul.mubr.msk.bf16.vlgmr.msra.gmra.mrb[48].mxu0 %vm201_vm3, %v1588_v53 }
0x1ef2   :  { %2032 = vmatprep.mubr.msk.bf16.mxu0 %vm201_vm3, %v1589_v39 }
0x1ef9   :  { %2033 = vmatmul.mubr.msk.bf16.gmra.mrb[52].mxu0 %vm201_vm3, %v1590_v63 }
0x1fc4   :  { %v2030_v42 = vpop.f32.mrb[48].mxu0 }
0x1fc5   :  { %v1646_v57 = vadd.f32 %v2030_v42, %v1570_v9  ;;  %v1637_v3 = vpop.f32.mrb[49].mxu0 }
0x1fc6   :  { %v1638_v27 = vadd.f32 %v1637_v3, %v1570_v9  ;;  %v2031_v49 = vpop.f32.mrb[50].mxu0 }
0x1fc7   :  { %v1982_v41 = vmul.f32 -1.442695, %v1646_v57  ;;  %v1649_v5 = vadd.f32 %v2031_v49, %v1570_v9  ;;  %v1640_v17 = vpop.f32.mrb[51].mxu0 }
0x1fc8   :  { %v1980_v33 = vmul.f32 -1.442695, %v1638_v27  ;;  %v1641_v37 = vadd.f32 %v1640_v17, %v1570_v9 }
0x1fc9   :  { %2309 = vpow2.f32 %v1982_v41  ;;  %v1983_v36 = vmul.f32 -1.442695, %v1649_v5 }
0x1fca   :  { %2311 = vpow2.f32 %v1980_v33  ;;  %v1981_v10 = vmul.f32 -1.442695, %v1641_v37 }
0x1fcb   :  { %2313 = vpow2.f32 %v1983_v36 }
0x1fcc   :  { %2315 = vpow2.f32 %v1981_v10  ;;  %v2034_v55 = vpop.f32.mrb[52].mxu0 }
0x1fcd   :  { %v1662_v61 = vadd.f32 %v2034_v55, %v1570_v9  ;;  %v1653_v43 = vpop.f32.mrb[53].mxu0 }
0x1fce   :  { %v1654_v7 = vadd.f32 %v1653_v43, %v1570_v9  ;;  %v2035_v15 = vpop.f32.mrb[54].mxu0 }
0x1fcf   :  { %v1986_v30 = vmul.f32 -1.442695, %v1662_v61  ;;  %v1665_v28 = vadd.f32 %v2035_v15, %v1570_v9  ;;  %v1656_v47 = vpop.f32.mrb[55].mxu0 }
0x1fd0   :  { %v1984_v60 = vmul.f32 -1.442695, %v1654_v7  ;;  %v1657_v58 = vadd.f32 %v1656_v47, %v1570_v9 }
0x1fd1   :  { %2317 = vpow2.f32 %v1986_v30  ;;  %v1987_v22 = vmul.f32 -1.442695, %v1665_v28 }
0x1fd2   :  { %2319 = vpow2.f32 %v1984_v60  ;;  %v1985_v56 = vmul.f32 -1.442695, %v1657_v58 }
0x1fd3   :  { %v2310_v40 = vpop.eup %2309  ;;  %2321 = vpow2.f32 %v1987_v22 }
0x1fd4   :  { %v2312_v23 = vpop.eup %2311  ;;  %v1694_v25 = vadd.f32 1.0, %v2310_v40  ;;  %2323 = vpow2.f32 %v1985_v56 }
0x1fd5   :  { %v2314_v13 = vpop.eup %2313  ;;  %v1692_v18 = vadd.f32 1.0, %v2312_v23 }
0x1fd6   :  { %v2316_v8 = vpop.eup %2315  ;;  %v1695_v53 = vadd.f32 1.0, %v2314_v13 }
0x1fd7   :  { %2325 = vrcp.f32 %v1692_v18  ;;  %v1693_v39 = vadd.f32 1.0, %v2316_v8 }
0x1fd8   :  { %2327 = vrcp.f32 %v1694_v25 }
0x1fd9   :  { %2329 = vrcp.f32 %v1693_v39 }
0x1fda   :  { %2331 = vrcp.f32 %v1695_v53 }
0x1fdb   :  { %v2318_v54 = vpop.eup %2317 }
0x1fdc   :  { %v2320_v2 = vpop.eup %2319  ;;  %v1698_v29 = vadd.f32 1.0, %v2318_v54 }
0x1fdd   :  { %v2322_v14 = vpop.eup %2321  ;;  %v1696_v51 = vadd.f32 1.0, %v2320_v2 }
0x1fde   :  { %v2324_v16 = vpop.eup %2323  ;;  %v1699_v63 = vadd.f32 1.0, %v2322_v14 }
0x1fdf   :  { %2333 = vrcp.f32 %v1696_v51  ;;  %v1697_v1 = vadd.f32 1.0, %v2324_v16 }
0x1fe0   :  { %2335 = vrcp.f32 %v1698_v29 }
0x1fe1   :  { %v3174_v45 = vpop.eup %2325  ;;  %2337 = vrcp.f32 %v1697_v1 }
0x1fe2   :  { %v3176_v6 = vpop.eup %2327  ;;  %v1716_v0 = vmul.f32 %v3174_v45, %v3174_v45  ;;  %2339 = vrcp.f32 %v1699_v63 }
0x1fe3   :  { %v3180_v19 = vpop.eup %2329  ;;  %v1718_v44 = vmul.f32 %v3176_v6, %v3176_v6 }
0x1fe4   :  { %2068 = vmatprep.mubr.f32.mxu1 %v1716_v0  ;;  %v1717_v21 = vmul.f32 %v3180_v19, %v3180_v19  ;;  %v3184_v20 = vpop.eup %2331 }
0x1fe5   :  { %v1719_v38 = vmul.f32 %v3184_v20, %v3184_v20 }
0x1fe6   :  { %2069 = vmatmul.mubr.f32.vlgmr.msra.gmra.mrb[40].mxu1 %v1717_v21 }
0x1fe7   :  { %2071 = vmatprep.mubr.f32.mxu1 %v1718_v44 }
0x1fe9   :  { %v3190_v32 = vpop.eup %2333 }
0x1fea   :  { %v3192_v11 = vpop.eup %2335  ;;  %2072 = vmatmul.mubr.f32.gmra.mrb[42].mxu1 %v1719_v38  ;;  %v1720_v46 = vmul.f32 %v3190_v32, %v3190_v32 }
0x1feb   :  { %v3196_v34 = vpop.eup %2337  ;;  %v1722_v52 = vmul.f32 %v3192_v11, %v3192_v11 }
0x1fec   :  { %2074 = vmatprep.mubr.f32.mxu1 %v1720_v46  ;;  %v1721_v48 = vmul.f32 %v3196_v34, %v3196_v34  ;;  %v3200_v50 = vpop.eup %2339 }
0x1fed   :  { %v1723_v62 = vmul.f32 %v3200_v50, %v3200_v50 }
0x1fee   :  { %2075 = vmatmul.mubr.f32.gmra.mrb[44].mxu1 %v1721_v48 }
0x1fef   :  { %2077 = vmatprep.mubr.f32.mxu1 %v1722_v52 }
0x1ff2   :  { %2078 = vmatmul.mubr.f32.gmra.mrb[46].mxu1 %v1723_v62 }
0x20b9   :  { %v2070_v35 = vpop.f32.mrb[40].mxu1 }
0x20ba   :  { %2341 = vrsqrt.f32 %v2070_v35  ;;  %v1790_v4 = vpop.f32.mrb[41].mxu1  ;;  %vm1838_vm5 = vcmp.eq.f32.partialorder %v2070_v35, inf  ;;  %vm1840_vm6 = vcmp.eq.f32.partialorder %v2070_v35, 0.0  ;;  %v1841_v3 = vand.u32 2147483648, %v2070_v35 }
0x20bb   :  { %2343 = vrsqrt.f32 %v1790_v4  ;;  %vm1831_vm7 = vcmp.eq.f32.partialorder %v1790_v4, inf  ;;  %v1834_v5 = vand.u32 2147483648, %v1790_v4  ;;  %vm1833_vm8 = vcmp.eq.f32.partialorder %v1790_v4, 0.0 }
0x20bd   :  { %v2073_v12 = vpop.f32.mrb[42].mxu1 }
0x20be   :  { %2345 = vrsqrt.f32 %v2073_v12  ;;  %v1800_v24 = vpop.f32.mrb[43].mxu1  ;;  %vm1852_vm9 = vcmp.eq.f32.partialorder %v2073_v12, inf  ;;  %vm1854_vm10 = vcmp.eq.f32.partialorder %v2073_v12, 0.0  ;;  %v1855_v7 = vand.u32 2147483648, %v2073_v12 }
0x20bf   :  { %2347 = vrsqrt.f32 %v1800_v24  ;;  %vm1845_vm11 = vcmp.eq.f32.partialorder %v1800_v24, inf  ;;  %v1848_v28 = vand.u32 2147483648, %v1800_v24  ;;  %vm1847_vm12 = vcmp.eq.f32.partialorder %v1800_v24, 0.0 }
0x20c1   :  { %v2076_v31 = vpop.f32.mrb[44].mxu1 }
0x20c2   :  { %2349 = vrsqrt.f32 %v2076_v31  ;;  %v1810_v59 = vpop.f32.mrb[45].mxu1  ;;  %vm1866_vm13 = vcmp.eq.f32.partialorder %v2076_v31, inf  ;;  %vm1868_vm14 = vcmp.eq.f32.partialorder %v2076_v31, 0.0  ;;  %v1869_v13 = vand.u32 2147483648, %v2076_v31 }
0x20c3   :  { %2351 = vrsqrt.f32 %v1810_v59  ;;  %vm1859_vm15 = vcmp.eq.f32.partialorder %v1810_v59, inf  ;;  %v1862_v53 = vand.u32 2147483648, %v1810_v59  ;;  %vm1861_vm0 = vcmp.eq.f32.partialorder %v1810_v59, 0.0 }
0x20c4   :  { %v2342_v26 = vpop.eup %2341 }
0x20c5   :  { %v2344_v9 = vpop.eup %2343  ;;  %v1837_v42 = vmul.f32 %v2342_v26, %v2070_v35  ;;  %v3206_v57 = vpop.f32.mrb[46].mxu1 }
0x20c6   :  { %v1830_v27 = vmul.f32 %v2344_v9, %v1790_v4  ;;  %2353 = vrsqrt.f32 %v3206_v57  ;;  %v3209_v49 = vpop.f32.mrb[47].mxu1  ;;  %vm1880_vm1 = vcmp.eq.f32.partialorder %v3206_v57, inf  ;;  %vm1882_vm2 = vcmp.eq.f32.partialorder %v3206_v57, 0.0 }
0x20c7   :  { %v1839_v41 = vsel %vm1838_vm5, %v2070_v35, %v1837_v42  ;;  %2355 = vrsqrt.f32 %v3209_v49  ;;  %v1883_v1 = vand.u32 2147483648, %v3206_v57  ;;  %vm1873_vm3 = vcmp.eq.f32.partialorder %v3209_v49, inf }
0x20c8   :  { %v2346_v17 = vpop.eup %2345  ;;  %v1842_v33 = vsel %vm1840_vm6, %v1841_v3, %v1839_v41  ;;  %v1832_v37 = vsel %vm1831_vm7, %v1790_v4, %v1830_v27  ;;  %v1876_v44 = vand.u32 2147483648, %v3209_v49  ;;  %vm1875_vm4 = vcmp.eq.f32.partialorder %v3209_v49, 0.0 }
0x20c9   :  { %v2348_v36 = vpop.eup %2347  ;;  %v1886_v10 = vadd.f32 1e-09, %v1842_v33  ;;  %v1835_v55 = vsel %vm1833_vm8, %v1834_v5, %v1832_v37  ;;  %v1851_v61 = vmul.f32 %v2346_v17, %v2073_v12 }
0x20ca   :  { %v1885_v43 = vadd.f32 1e-09, %v1835_v55  ;;  %v1844_v15 = vmul.f32 %v2348_v36, %v1800_v24 }
0x20cb   :  { %2357 = vrcp.f32 %v1886_v10  ;;  %v1853_v30 = vsel %vm1852_vm9, %v2073_v12, %v1851_v61 }
0x20cc   :  { %v2350_v47 = vpop.eup %2349  ;;  %2359 = vrcp.f32 %v1885_v43  ;;  %v1856_v60 = vsel %vm1854_vm10, %v1855_v7, %v1853_v30  ;;  %v1846_v58 = vsel %vm1845_vm11, %v1800_v24, %v1844_v15 }
0x20cd   :  { %v2352_v22 = vpop.eup %2351  ;;  %v1888_v56 = vadd.f32 1e-09, %v1856_v60  ;;  %v1849_v40 = vsel %vm1847_vm12, %v1848_v28, %v1846_v58  ;;  %v1865_v23 = vmul.f32 %v2350_v47, %v2076_v31 }
0x20ce   :  { %v1887_v25 = vadd.f32 1e-09, %v1849_v40  ;;  %v1858_v18 = vmul.f32 %v2352_v22, %v1810_v59 }
0x20cf   :  { %2361 = vrcp.f32 %v1888_v56  ;;  %v1867_v8 = vsel %vm1866_vm13, %v2076_v31, %v1865_v23 }
0x20d0   :  { %v2354_v39 = vpop.eup %2353  ;;  %2363 = vrcp.f32 %v1887_v25  ;;  %v1870_v54 = vsel %vm1868_vm14, %v1869_v13, %v1867_v8  ;;  %v1860_v2 = vsel %vm1859_vm15, %v1810_v59, %v1858_v18 }
0x20d1   :  { %v2356_v29 = vpop.eup %2355  ;;  %v1890_v14 = vadd.f32 1e-09, %v1870_v54  ;;  %v1863_v51 = vsel %vm1861_vm0, %v1862_v53, %v1860_v2  ;;  %v1879_v16 = vmul.f32 %v2354_v39, %v3206_v57 }
0x20d2   :  { %v1889_v63 = vadd.f32 1e-09, %v1863_v51  ;;  %v1872_v0 = vmul.f32 %v2356_v29, %v3209_v49 }
0x20d3   :  { %2365 = vrcp.f32 %v1890_v14  ;;  %v1881_v21 = vsel %vm1880_vm1, %v3206_v57, %v1879_v16 }
0x20d4   :  { %2367 = vrcp.f32 %v1889_v63  ;;  %v1884_v38 = vsel %vm1882_vm2, %v1883_v1, %v1881_v21  ;;  %v1874_v46 = vsel %vm1873_vm3, %v3209_v49, %v1872_v0 }
0x20d5   :  { %v2358_v48 = vpop.eup %2357  ;;  %v1892_v52 = vadd.f32 1e-09, %v1884_v38  ;;  %v1877_v62 = vsel %vm1875_vm4, %v1876_v44, %v1874_v46 }
0x20d6   :  { %v2360_v35 = vpop.eup %2359  ;;  %v1896_v4 = vmul.f32 %v2358_v48, %v3180_v19  ;;  %v1891_v12 = vadd.f32 1e-09, %v1877_v62 }
0x20d7   :  { %v1894_v24 = vmul.f32 %v2360_v35, %v3174_v45  ;;  %2369 = vrcp.f32 %v1892_v52 }
0x20d8   :  { %1910 = vst [vmem:[%s3256_s2 + $0x8] sm:$0xff] %v1896_v4  ;;  %2371 = vrcp.f32 %v1891_v12 }
0x20d9   :  { %v2362_v31 = vpop.eup %2361  ;;  %1909 = vst [vmem:[%s3256_s2] sm:$0xff] %v1894_v24 }
0x20da   :  { %v2364_v59 = vpop.eup %2363  ;;  %v1900_v26 = vmul.f32 %v2362_v31, %v3184_v20 }
0x20db   :  { %v1898_v9 = vmul.f32 %v2364_v59, %v3176_v6 }
0x20dc   :  { %1912 = vst [vmem:[%s3256_s2 + $0x18] sm:$0xff] %v1900_v26 }
0x20dd   :  { %v2366_v45 = vpop.eup %2365  ;;  %1911 = vst [vmem:[%s3256_s2 + $0x10] sm:$0xff] %v1898_v9 }
0x20de   :  { %v2368_v19 = vpop.eup %2367  ;;  %v1904_v42 = vmul.f32 %v2366_v45, %v3196_v34 }
0x20df   :  { %v1902_v57 = vmul.f32 %v2368_v19, %v3190_v32 }
0x20e0   :  { %1914 = vst [vmem:[%s3256_s2 + $0x28] sm:$0xff] %v1904_v42 }
0x20e1   :  { %v2370_v20 = vpop.eup %2369  ;;  %1913 = vst [vmem:[%s3256_s2 + $0x20] sm:$0xff] %v1902_v57 }
0x20e2   :  { %v2372_v6 = vpop.eup %2371  ;;  %v1908_v3 = vmul.f32 %v2370_v20, %v3200_v50 }
0x20e3   :  { %v1906_v27 = vmul.f32 %v2372_v6, %v3192_v11 }
0x20e4   :  { %1916 = vst [vmem:[%s3256_s2 + $0x38] sm:$0xff] %v1908_v3 }
0x20e5   :  { %1915 = vst [vmem:[%s3256_s2 + $0x30] sm:$0xff] %v1906_v27 }
0x20e6   :  { %1921 = vsyncpa [#allocation5], 1 }

</bundles_post_ra>
